<compile_context>
chip_gen: v5e
topology: v5e:2x2
jax: 0.10.0
libtpu: 0.0.40
codegen_flags: <defaults>
</compile_context>

<pallas_src>
import jax
import jax.numpy as jnp
from jax.experimental import pallas as pl
from jax.experimental.pallas import tpu as pltpu

EMBED_DIM = 32
NUM_HEADS = 4
HEAD_DIM = EMBED_DIM // NUM_HEADS
HIDDEN_DIM = 128
NUM_LAYERS = 2
OUTPUT_DIM = 1
LN_EPS = 1e-5


def _layer_norm(y, g, b):
    mu = jnp.mean(y, axis=-1, keepdims=True)
    var = jnp.mean((y - mu) ** 2, axis=-1, keepdims=True)
    return (y - mu) * jax.lax.rsqrt(var + LN_EPS) * g + b


def _group_layer_norm(y, mean_mat, g, b):
    """LayerNorm over D=32 lane groups of a lane-dense (TB, S*D) activation.

    mean_mat is the (S*D, S*D) segment-mean matrix (1/D inside each D-lane
    block), so one matmul yields per-group means broadcast back to all lanes.
    All math stays f32 (v5e-friendly)."""
    mu = jnp.dot(y, mean_mat, preferred_element_type=jnp.float32)
    diff = y - mu
    var = jnp.dot(diff * diff, mean_mat, preferred_element_type=jnp.float32)
    return diff * jax.lax.rsqrt(var + LN_EPS) * g + b


# ---------------------------------------------------------------------------
# Fused Pallas kernel: embeddings -> 2x TransformerEncoderLayer -> head MLP
# ---------------------------------------------------------------------------

def fused_tab_kernel(xcat_ref, xnum_ref, emb_ref,
                     wqkv_ref, bqkv_ref, wo_ref, bo_ref,
                     w1_ref, b1_ref, w2_ref, b2_ref, ln_ref,
                     b8_ref, b32_ref,
                     wn_ref, bn_ref, w1a_ref, w1b_ref, b1h_ref,
                     w2h_ref, b2h_ref, out_ref):
    f32 = jnp.float32
    bf16 = jnp.bfloat16
    TB, S = xcat_ref.shape                       # batch tile, num categorical
    D = EMBED_DIM
    SD = S * D                                   # lane-dense token slab width
    MAXC = emb_ref.shape[0] // S                 # padded per-column vocab

    b8 = b8_ref[...]                             # (SD,SD) head(8-lane) reduce
    b32 = b32_ref[...]                           # (SD,SD) token(32-lane) mean

    # ---- embedding gather as a one-hot matmul; output is lane-dense --------
    # onehot[b, s*MAXC + c] = 1  iff  x_cat[b, s] == c
    xcat = xcat_ref[...]                                           # (TB,S) i32
    col = jax.lax.broadcasted_iota(jnp.int32, (TB, S * MAXC), 1)
    onehot = jnp.zeros((TB, S * MAXC), f32)
    for s in range(S):                                             # static
        onehot = onehot + (col == (xcat[:, s:s + 1] + s * MAXC)).astype(f32)
    # block-diagonal table -> x[b, s*D + d] = emb_s[x_cat[b,s], d]   (f32)
    x = jnp.dot(onehot, emb_ref[...], preferred_element_type=f32)  # (TB, SD)

    scale = 1.0 / (HEAD_DIM ** 0.5)

    # ---- transformer encoder layers (post-norm, relu FFN, dropout=id) ------
    for l in range(NUM_LAYERS):                                    # static
        ln = ln_ref[l]                                             # (4, SD)
        qkv = (jnp.dot(x.astype(bf16), wqkv_ref[l],
                       preferred_element_type=f32) + bqkv_ref[l])  # (TB, 3SD)
        q = qkv[:, 0:SD] * scale
        k = qkv[:, SD:2 * SD]
        v = qkv[:, 2 * SD:3 * SD]                                  # (TB, SD)

        # scores per relative key offset r, broadcast across the 8 head lanes
        s_bcast = []
        for r in range(S):                                         # static
            k_r = k if r == 0 else pltpu.roll(k, shift=(S - r) * D, axis=1)
            s_bcast.append(jnp.dot(q * k_r, b8,
                                   preferred_element_type=f32))    # (TB, SD)
        m = s_bcast[0]
        for r in range(1, S):
            m = jnp.maximum(m, s_bcast[r])
        e = [jnp.exp(sb - m) for sb in s_bcast]
        denom = e[0]
        for r in range(1, S):
            denom = denom + e[r]
        inv = pl.reciprocal(denom, approx=True)                    # EUP slot

        # PV: probs are already broadcast over head lanes -> roll V and FMA
        o = (e[0] * inv) * v
        for r in range(1, S):
            v_r = pltpu.roll(v, shift=(S - r) * D, axis=1)
            o = o + (e[r] * inv) * v_r                             # (TB, SD)

        attn = (jnp.dot(o.astype(bf16), wo_ref[l],
                        preferred_element_type=f32) + bo_ref[l])

        x = _group_layer_norm(x + attn, b32, ln[0:1, :], ln[1:2, :])   # norm1
        hid = jnp.maximum(
            jnp.dot(x.astype(bf16), w1_ref[l],
                    preferred_element_type=f32) + b1_ref[l], 0.0)  # (TB,S*HID)
        ff = (jnp.dot(hid.astype(bf16), w2_ref[l],
                      preferred_element_type=f32) + b2_ref[l])
        x = _group_layer_norm(x + ff, b32, ln[2:3, :], ln[3:4, :])     # norm2

    # ---- head: numeric projection + fc (Linear -> ReLU -> [Drop] -> Linear)
    num_feat = (jnp.dot(xnum_ref[...], wn_ref[...],
                        preferred_element_type=f32) + bn_ref[...])     # (TB,D)
    # x is already the lane-dense flattened categorical features (TB, S*D)
    h1 = (jnp.dot(x.astype(bf16), w1a_ref[...], preferred_element_type=f32)
          + jnp.dot(num_feat.astype(bf16), w1b_ref[...],
                    preferred_element_type=f32)
          + b1h_ref[...])                                          # (TB, HID)
    h1 = jnp.maximum(h1, 0.0)
    if OUTPUT_DIM == 1:   # VPU mult + lane reduce: avoids a lane-1 MXU matmul
        out = jnp.sum(h1 * w2h_ref[...], axis=-1, keepdims=True) + b2h_ref[...]
    else:
        out = jax.lax.dot_general(h1, w2h_ref[...], (((1,), (1,)), ((), ())),
                                  preferred_element_type=f32) + b2h_ref[...]
    out_ref[...] = out


# ---------------------------------------------------------------------------
# Wrapper: parameter packing + single pallas_call
# ---------------------------------------------------------------------------

def pack_params(params, cards):
    """Pack PyTorch-style params into lane-dense / block-diagonal arrays."""
    D, S, HD = EMBED_DIM, len(cards), HEAD_DIM
    SD = S * D
    bf16 = jnp.bfloat16
    maxc = ((max(cards) + 7) // 8) * 8

    # Block-diagonal embedding matrix: table s occupies rows [s*maxc, ...)
    # and columns [s*D, (s+1)*D).  Kept f32 (pure row selection).
    emb_bd = jnp.zeros((S * maxc, SD), jnp.float32)
    for s, t in enumerate(params['emb']):
        emb_bd = emb_bd.at[s * maxc:s * maxc + t.shape[0],
                           s * D:(s + 1) * D].set(t)

    def bdiag(w):                       # (i, o) -> (S*i, S*o) block diagonal
        i, o = w.shape
        out = jnp.zeros((S * i, S * o), jnp.float32)
        for s in range(S):
            out = out.at[s * i:(s + 1) * i, s * o:(s + 1) * o].set(w)
        return out

    def trow(v):                        # (n,) -> (1, S*n), tiled per token
        return jnp.tile(v, S)[None, :]

    wqkv, bqkv, wo, bo, w1, b1, w2, b2, ln = ([] for _ in range(9))
    for lp in params['layers']:
        wqkv.append(jnp.concatenate(
            [bdiag(lp['wq'].T), bdiag(lp['wk'].T), bdiag(lp['wv'].T)], axis=1))
        bqkv.append(jnp.concatenate(
            [trow(lp['bq']), trow(lp['bk']), trow(lp['bv'])], axis=1))
        wo.append(bdiag(lp['wo'].T))
        bo.append(trow(lp['bo']))
        w1.append(bdiag(lp['w1'].T))
        b1.append(trow(lp['b1']))
        w2.append(bdiag(lp['w2'].T))
        b2.append(trow(lp['b2']))
        ln.append(jnp.stack([jnp.tile(lp['g1'], S), jnp.tile(lp['be1'], S),
                             jnp.tile(lp['g2'], S), jnp.tile(lp['be2'], S)],
                            axis=0))

    # Segmented lane-reduce matrices (values exact; kept f32).
    lane = jnp.arange(SD)
    b8 = (lane[:, None] // HD == lane[None, :] // HD).astype(jnp.float32)
    b32 = (lane[:, None] // D == lane[None, :] // D).astype(jnp.float32) / D

    hp = params['head']
    return dict(
        emb=emb_bd,
        wqkv=jnp.stack(wqkv).astype(bf16), bqkv=jnp.stack(bqkv),
        wo=jnp.stack(wo).astype(bf16), bo=jnp.stack(bo),
        w1=jnp.stack(w1).astype(bf16), b1=jnp.stack(b1),
        w2=jnp.stack(w2).astype(bf16), b2=jnp.stack(b2),
        ln=jnp.stack(ln),
        b8=b8, b32=b32,
        wn=hp['wn'].T, bn=hp['bn'][None, :],
        w1a=hp['w1a'].T.astype(bf16), w1b=hp['w1b'].T.astype(bf16),
        b1h=hp['b1'][None, :],
        w2h=hp['w2'], b2h=hp['b2'][None, :],
    )


def _default_batch_tile(B):
    """TB <= 128, multiple of 8, dividing B, and >= 2 grid steps when possible
    (so v7x's two TensorCores both get work)."""
    if B <= 8:
        return B
    cap = min(128, max(8, B // 2))
    best = None
    for cand in range(8, cap + 1, 8):
        if B % cand == 0:
            best = cand
    return best if best is not None else B


def tab_transformer_forward(kp, x_cat, x_num, batch_tile=None):
    B, S = x_cat.shape
    C = x_num.shape[1]
    TB = batch_tile if batch_tile is not None else _default_batch_tile(B)
    assert B % TB == 0 and (TB == B or TB % 8 == 0)
    nb = B // TB

    weights = [kp['emb'], kp['wqkv'], kp['bqkv'], kp['wo'], kp['bo'],
               kp['w1'], kp['b1'], kp['w2'], kp['b2'], kp['ln'],
               kp['b8'], kp['b32'],
               kp['wn'], kp['bn'], kp['w1a'], kp['w1b'], kp['b1h'],
               kp['w2h'], kp['b2h']]

    def rep_spec(arr):
        nd = arr.ndim
        return pl.BlockSpec(arr.shape, lambda i, nd=nd: (0,) * nd)

    in_specs = ([pl.BlockSpec((TB, S), lambda i: (i, 0)),
                 pl.BlockSpec((TB, C), lambda i: (i, 0))]
                + [rep_spec(w) for w in weights])
    out_spec = pl.BlockSpec((TB, OUTPUT_DIM), lambda i: (i, 0))

    return pl.pallas_call(
        fused_tab_kernel,
        out_shape=jax.ShapeDtypeStruct((B, OUTPUT_DIM), jnp.float32),
        grid_spec=pltpu.PrefetchScalarGridSpec(
            num_scalar_prefetch=0, grid=(nb,),
            in_specs=in_specs, out_specs=out_spec),
        compiler_params=pltpu.CompilerParams(
            dimension_semantics=("parallel",)),
    )(x_cat, x_num, *weights)


# ---------------------------------------------------------------------------
# Pure-JAX reference (natural PyTorch-style math) for correctness check
# ---------------------------------------------------------------------------

def _ref_layer(x, lp):
    B, S, D = x.shape
    q = x @ lp['wq'].T + lp['bq']
    k = x @ lp['wk'].T + lp['bk']
    v = x @ lp['wv'].T + lp['bv']

    def split(t):
        return t.reshape(B, S, NUM_HEADS, HEAD_DIM).transpose(0, 2, 1, 3)

    qh, kh, vh = split(q), split(k), split(v)
    s = jnp.einsum('bhqd,bhkd->bhqk', qh, kh) / (HEAD_DIM ** 0.5)
    p = jax.nn.softmax(s, axis=-1)
    o = jnp.einsum('bhqk,bhkd->bhqd', p, vh).transpose(0, 2, 1, 3).reshape(B, S, D)
    attn = o @ lp['wo'].T + lp['bo']
    x1 = _layer_norm(x + attn, lp['g1'], lp['be1'])
    ff = jnp.maximum(x1 @ lp['w1'].T + lp['b1'], 0.0) @ lp['w2'].T + lp['b2']
    return _layer_norm(x1 + ff, lp['g2'], lp['be2'])


def reference_forward(params, x_cat, x_num):
    x = jnp.stack([params['emb'][i][x_cat[:, i]] for i in range(x_cat.shape[1])],
                  axis=1)
    for lp in params['layers']:
        x = _ref_layer(x, lp)
    cat_flat = x.reshape(x.shape[0], -1)
    hp = params['head']
    num_feat = x_num @ hp['wn'].T + hp['bn']
    feats = jnp.concatenate([cat_flat, num_feat], axis=1)
    w1 = jnp.concatenate([hp['w1a'], hp['w1b']], axis=1)
    h = jnp.maximum(feats @ w1.T + hp['b1'], 0.0)
    return h @ hp['w2'].T + hp['b2']


# ---------------------------------------------------------------------------
# Deterministic synthetic parameters (shapes match the PyTorch module)
# ---------------------------------------------------------------------------

def init_params(key, cards, num_cont):
    D, HID, S = EMBED_DIM, HIDDEN_DIM, len(cards)
    n_keys = len(cards) + NUM_LAYERS * 12 + 7
    ks = iter(jax.random.split(key, n_keys))

    def nrm(shape, scale=0.05):
        return (scale * jax.random.normal(next(ks), shape)).astype(jnp.float32)

    params = {'emb': [nrm((c, D), 1.0) for c in cards]}
    layers = []
    for _ in range(NUM_LAYERS):
        layers.append(dict(
            wq=nrm((D, D)), wk=nrm((D, D)), wv=nrm((D, D)),
            bq=nrm((D,), 0.01), bk=nrm((D,), 0.01), bv=nrm((D,), 0.01),
            wo=nrm((D, D)), bo=nrm((D,), 0.01),
            w1=nrm((HID, D)), b1=nrm((HID,), 0.01),
            w2=nrm((D, HID)), b2=nrm((D,), 0.01),
            g1=jnp.ones((D,), jnp.float32), be1=jnp.zeros((D,), jnp.float32),
            g2=jnp.ones((D,), jnp.float32), be2=jnp.zeros((D,), jnp.float32),
        ))
    params['layers'] = layers
    params['head'] = dict(
        wn=nrm((D, num_cont)), bn=nrm((D,), 0.01),
        w1a=nrm((HID, S * D)), w1b=nrm((HID, D)), b1=nrm((HID,), 0.01),
        w2=nrm((OUTPUT_DIM, HID)), b2=nrm((OUTPUT_DIM,), 0.01),
    )
    return params


if __name__ == "__main__":
    cards = [5, 7, 11, 13]        # categorical_cardinalities
    num_cont = 3                  # num_continuous
    B = 8
    S = len(cards)

    key = jax.random.PRNGKey(0)
    k_param, k_num, *k_cats = jax.random.split(key, 2 + S)

    params = init_params(k_param, cards, num_cont)
    packed = pack_params(params, cards)

    x_cat = jnp.stack(
        [jax.random.randint(k, (B,), 0, c, dtype=jnp.int32)
         for k, c in zip(k_cats, cards)], axis=1)                 # (B, 4) int32
    x_num = jax.random.normal(k_num, (B, num_cont), jnp.float32)  # (B, 3)

    out = tab_transformer_forward(packed, x_cat, x_num)
    out = jax.block_until_ready(out)

    ref = reference_forward(params, x_cat, x_num)
    assert out.shape == (B, OUTPUT_DIM)
    # 2e-2 tolerance: bf16 matmul operands (f32 accumulation) + approx-EUP
    # reciprocal in the softmax denominator, compared against an all-f32 ref.
    assert jnp.allclose(out, ref, atol=2e-2, rtol=2e-2)
    print("KERNEL_OK")
</pallas_src>

<mosaic_0001>
module attributes {stable_mosaic.version = 11 : i64} {
  func.func @fused_tab_kernel(%arg0: i32, %arg1: memref<8x4xi32, #tpu.memory_space<vmem>>, %arg2: memref<8x3xf32, #tpu.memory_space<vmem>>, %arg3: memref<64x128xf32, #tpu.memory_space<vmem>>, %arg4: memref<2x128x384xbf16, #tpu.memory_space<vmem>>, %arg5: memref<2x1x384xf32, #tpu.memory_space<vmem>>, %arg6: memref<2x128x128xbf16, #tpu.memory_space<vmem>>, %arg7: memref<2x1x128xf32, #tpu.memory_space<vmem>>, %arg8: memref<2x128x512xbf16, #tpu.memory_space<vmem>>, %arg9: memref<2x1x512xf32, #tpu.memory_space<vmem>>, %arg10: memref<2x512x128xbf16, #tpu.memory_space<vmem>>, %arg11: memref<2x1x128xf32, #tpu.memory_space<vmem>>, %arg12: memref<2x4x128xf32, #tpu.memory_space<vmem>>, %arg13: memref<128x128xf32, #tpu.memory_space<vmem>>, %arg14: memref<128x128xf32, #tpu.memory_space<vmem>>, %arg15: memref<3x32xf32, #tpu.memory_space<vmem>>, %arg16: memref<1x32xf32, #tpu.memory_space<vmem>>, %arg17: memref<128x128xbf16, #tpu.memory_space<vmem>>, %arg18: memref<32x128xbf16, #tpu.memory_space<vmem>>, %arg19: memref<1x128xf32, #tpu.memory_space<vmem>>, %arg20: memref<1x128xf32, #tpu.memory_space<vmem>>, %arg21: memref<1x1xf32, #tpu.memory_space<vmem>>, %arg22: memref<8x1xf32, #tpu.memory_space<vmem>>) attributes {dimension_semantics = [#tpu.dimension_semantics<parallel>], iteration_bounds = array<i64: 1>, scalar_prefetch = 0 : i64, scratch_operands = 0 : i64, tpu.core_type = #tpu.core_type<tc>, window_params = [{transform_indices = @transform_0, window_bounds = array<i64: 8, 4>}, {transform_indices = @transform_1, window_bounds = array<i64: 8, 3>}, {pipeline_mode = #tpu.pipeline_mode<synchronous>, transform_indices = @transform_2, window_bounds = array<i64: 64, 128>}, {pipeline_mode = #tpu.pipeline_mode<synchronous>, transform_indices = @transform_3, window_bounds = array<i64: 2, 128, 384>}, {pipeline_mode = #tpu.pipeline_mode<synchronous>, transform_indices = @transform_4, window_bounds = array<i64: 2, 1, 384>}, {pipeline_mode = #tpu.pipeline_mode<synchronous>, transform_indices = @transform_5, window_bounds = array<i64: 2, 128, 128>}, {pipeline_mode = #tpu.pipeline_mode<synchronous>, transform_indices = @transform_6, window_bounds = array<i64: 2, 1, 128>}, {pipeline_mode = #tpu.pipeline_mode<synchronous>, transform_indices = @transform_7, window_bounds = array<i64: 2, 128, 512>}, {pipeline_mode = #tpu.pipeline_mode<synchronous>, transform_indices = @transform_8, window_bounds = array<i64: 2, 1, 512>}, {pipeline_mode = #tpu.pipeline_mode<synchronous>, transform_indices = @transform_9, window_bounds = array<i64: 2, 512, 128>}, {pipeline_mode = #tpu.pipeline_mode<synchronous>, transform_indices = @transform_10, window_bounds = array<i64: 2, 1, 128>}, {pipeline_mode = #tpu.pipeline_mode<synchronous>, transform_indices = @transform_11, window_bounds = array<i64: 2, 4, 128>}, {pipeline_mode = #tpu.pipeline_mode<synchronous>, transform_indices = @transform_12, window_bounds = array<i64: 128, 128>}, {pipeline_mode = #tpu.pipeline_mode<synchronous>, transform_indices = @transform_13, window_bounds = array<i64: 128, 128>}, {pipeline_mode = #tpu.pipeline_mode<synchronous>, transform_indices = @transform_14, window_bounds = array<i64: 3, 32>}, {pipeline_mode = #tpu.pipeline_mode<synchronous>, transform_indices = @transform_15, window_bounds = array<i64: 1, 32>}, {pipeline_mode = #tpu.pipeline_mode<synchronous>, transform_indices = @transform_16, window_bounds = array<i64: 128, 128>}, {pipeline_mode = #tpu.pipeline_mode<synchronous>, transform_indices = @transform_17, window_bounds = array<i64: 32, 128>}, {pipeline_mode = #tpu.pipeline_mode<synchronous>, transform_indices = @transform_18, window_bounds = array<i64: 1, 128>}, {pipeline_mode = #tpu.pipeline_mode<synchronous>, transform_indices = @transform_19, window_bounds = array<i64: 1, 128>}, {pipeline_mode = #tpu.pipeline_mode<synchronous>, transform_indices = @transform_20, window_bounds = array<i64: 1, 1>}, {transform_indices = @transform_21, window_bounds = array<i64: 8, 1>}]} {
    %c0 = arith.constant 0 : index
    %c0_0 = arith.constant 0 : index
    %0 = vector.load %arg13[%c0, %c0_0] : memref<128x128xf32, #tpu.memory_space<vmem>>, vector<128x128xf32>
    %c0_1 = arith.constant 0 : index
    %c0_2 = arith.constant 0 : index
    %1 = vector.load %arg14[%c0_1, %c0_2] : memref<128x128xf32, #tpu.memory_space<vmem>>, vector<128x128xf32>
    %c0_3 = arith.constant 0 : index
    %c0_4 = arith.constant 0 : index
    %2 = vector.load %arg1[%c0_3, %c0_4] : memref<8x4xi32, #tpu.memory_space<vmem>>, vector<8x4xi32>
    %3 = tpu.iota {dimensions = array<i32: 1>} : vector<8x64xi32>
    %cst = arith.constant 0.000000e+00 : f32
    %4 = vector.broadcast %cst : f32 to vector<8x64xf32>
    %5 = vector.extract_strided_slice %2 {offsets = [0, 0], sizes = [8, 1], strides = [1, 1]} : vector<8x4xi32> to vector<8x1xi32>
    %c0_i32 = arith.constant 0 : i32
    %6 = vector.broadcast %c0_i32 : i32 to vector<8x1xi32>
    %7 = arith.addi %5, %6 : vector<8x1xi32>
    %8 = vector.broadcast %7 : vector<8x1xi32> to vector<8x64xi32>
    %9 = arith.cmpi eq, %3, %8 : vector<8x64xi32>
    %10 = arith.extui %9 : vector<8x64xi1> to vector<8x64xi32>
    %11 = arith.sitofp %10 : vector<8x64xi32> to vector<8x64xf32>
    %12 = arith.addf %4, %11 : vector<8x64xf32>
    %13 = vector.extract_strided_slice %2 {offsets = [0, 1], sizes = [8, 1], strides = [1, 1]} : vector<8x4xi32> to vector<8x1xi32>
    %c16_i32 = arith.constant 16 : i32
    %14 = vector.broadcast %c16_i32 : i32 to vector<8x1xi32>
    %15 = arith.addi %13, %14 : vector<8x1xi32>
    %16 = vector.broadcast %15 : vector<8x1xi32> to vector<8x64xi32>
    %17 = arith.cmpi eq, %3, %16 : vector<8x64xi32>
    %18 = arith.extui %17 : vector<8x64xi1> to vector<8x64xi32>
    %19 = arith.sitofp %18 : vector<8x64xi32> to vector<8x64xf32>
    %20 = arith.addf %12, %19 : vector<8x64xf32>
    %21 = vector.extract_strided_slice %2 {offsets = [0, 2], sizes = [8, 1], strides = [1, 1]} : vector<8x4xi32> to vector<8x1xi32>
    %c32_i32 = arith.constant 32 : i32
    %22 = vector.broadcast %c32_i32 : i32 to vector<8x1xi32>
    %23 = arith.addi %21, %22 : vector<8x1xi32>
    %24 = vector.broadcast %23 : vector<8x1xi32> to vector<8x64xi32>
    %25 = arith.cmpi eq, %3, %24 : vector<8x64xi32>
    %26 = arith.extui %25 : vector<8x64xi1> to vector<8x64xi32>
    %27 = arith.sitofp %26 : vector<8x64xi32> to vector<8x64xf32>
    %28 = arith.addf %20, %27 : vector<8x64xf32>
    %29 = vector.extract_strided_slice %2 {offsets = [0, 3], sizes = [8, 1], strides = [1, 1]} : vector<8x4xi32> to vector<8x1xi32>
    %c48_i32 = arith.constant 48 : i32
    %30 = vector.broadcast %c48_i32 : i32 to vector<8x1xi32>
    %31 = arith.addi %29, %30 : vector<8x1xi32>
    %32 = vector.broadcast %31 : vector<8x1xi32> to vector<8x64xi32>
    %33 = arith.cmpi eq, %3, %32 : vector<8x64xi32>
    %34 = arith.extui %33 : vector<8x64xi1> to vector<8x64xi32>
    %35 = arith.sitofp %34 : vector<8x64xi32> to vector<8x64xf32>
    %36 = arith.addf %28, %35 : vector<8x64xf32>
    %c0_5 = arith.constant 0 : index
    %c0_6 = arith.constant 0 : index
    %37 = vector.load %arg3[%c0_5, %c0_6] : memref<64x128xf32, #tpu.memory_space<vmem>>, vector<64x128xf32>
    %cst_7 = arith.constant dense<0.000000e+00> : vector<8x128xf32>
    %38 = tpu.matmul %36, %37, %cst_7 {dimension_numbers = #tpu.dot_dimension_numbers<[1], [0], [0], [1], [0, 0, 1, 1], [], []>} : vector<8x64xf32>, vector<64x128xf32>, vector<8x128xf32> -> vector<8x128xf32>
    %c0_8 = arith.constant 0 : index
    %c0_9 = arith.constant 0 : index
    %c0_10 = arith.constant 0 : index
    %39 = vector.load %arg12[%c0_8, %c0_9, %c0_10] : memref<2x4x128xf32, #tpu.memory_space<vmem>>, vector<1x4x128xf32>
    %40 = vector.shape_cast %39 : vector<1x4x128xf32> to vector<4x128xf32>
    %41 = arith.truncf %38 : vector<8x128xf32> to vector<8x128xbf16>
    %c0_11 = arith.constant 0 : index
    %c0_12 = arith.constant 0 : index
    %c0_13 = arith.constant 0 : index
    %42 = vector.load %arg4[%c0_11, %c0_12, %c0_13] : memref<2x128x384xbf16, #tpu.memory_space<vmem>>, vector<1x128x384xbf16>
    %43 = vector.shape_cast %42 : vector<1x128x384xbf16> to vector<128x384xbf16>
    %cst_14 = arith.constant dense<0.000000e+00> : vector<8x384xf32>
    %44 = tpu.matmul %41, %43, %cst_14 {dimension_numbers = #tpu.dot_dimension_numbers<[1], [0], [0], [1], [0, 0, 1, 1], [], []>} : vector<8x128xbf16>, vector<128x384xbf16>, vector<8x384xf32> -> vector<8x384xf32>
    %c0_15 = arith.constant 0 : index
    %c0_16 = arith.constant 0 : index
    %c0_17 = arith.constant 0 : index
    %45 = vector.load %arg5[%c0_15, %c0_16, %c0_17] : memref<2x1x384xf32, #tpu.memory_space<vmem>>, vector<1x1x384xf32>
    %46 = vector.shape_cast %45 : vector<1x1x384xf32> to vector<1x384xf32>
    %47 = vector.broadcast %46 : vector<1x384xf32> to vector<8x384xf32>
    %48 = arith.addf %44, %47 : vector<8x384xf32>
    %49 = vector.extract_strided_slice %48 {offsets = [0, 0], sizes = [8, 128], strides = [1, 1]} : vector<8x384xf32> to vector<8x128xf32>
    %cst_18 = arith.constant 0.353553385 : f32
    %50 = vector.broadcast %cst_18 : f32 to vector<8x128xf32>
    %51 = arith.mulf %49, %50 : vector<8x128xf32>
    %52 = vector.extract_strided_slice %48 {offsets = [0, 128], sizes = [8, 128], strides = [1, 1]} : vector<8x384xf32> to vector<8x128xf32>
    %53 = vector.extract_strided_slice %48 {offsets = [0, 256], sizes = [8, 128], strides = [1, 1]} : vector<8x384xf32> to vector<8x128xf32>
    %54 = arith.mulf %51, %52 : vector<8x128xf32>
    %cst_19 = arith.constant dense<0.000000e+00> : vector<8x128xf32>
    %55 = tpu.matmul %54, %0, %cst_19 {dimension_numbers = #tpu.dot_dimension_numbers<[1], [0], [0], [1], [0, 0, 1, 1], [], []>} : vector<8x128xf32>, vector<128x128xf32>, vector<8x128xf32> -> vector<8x128xf32>
    %c96_i32 = arith.constant 96 : i32
    %56 = tpu.dynamic_rotate %52 by %c96_i32 dim 1 : vector<8x128xf32>, i32 -> vector<8x128xf32>
    %57 = arith.mulf %51, %56 : vector<8x128xf32>
    %cst_20 = arith.constant dense<0.000000e+00> : vector<8x128xf32>
    %58 = tpu.matmul %57, %0, %cst_20 {dimension_numbers = #tpu.dot_dimension_numbers<[1], [0], [0], [1], [0, 0, 1, 1], [], []>} : vector<8x128xf32>, vector<128x128xf32>, vector<8x128xf32> -> vector<8x128xf32>
    %c64_i32 = arith.constant 64 : i32
    %59 = tpu.dynamic_rotate %52 by %c64_i32 dim 1 : vector<8x128xf32>, i32 -> vector<8x128xf32>
    %60 = arith.mulf %51, %59 : vector<8x128xf32>
    %cst_21 = arith.constant dense<0.000000e+00> : vector<8x128xf32>
    %61 = tpu.matmul %60, %0, %cst_21 {dimension_numbers = #tpu.dot_dimension_numbers<[1], [0], [0], [1], [0, 0, 1, 1], [], []>} : vector<8x128xf32>, vector<128x128xf32>, vector<8x128xf32> -> vector<8x128xf32>
    %c32_i32_22 = arith.constant 32 : i32
    %62 = tpu.dynamic_rotate %52 by %c32_i32_22 dim 1 : vector<8x128xf32>, i32 -> vector<8x128xf32>
    %63 = arith.mulf %51, %62 : vector<8x128xf32>
    %cst_23 = arith.constant dense<0.000000e+00> : vector<8x128xf32>
    %64 = tpu.matmul %63, %0, %cst_23 {dimension_numbers = #tpu.dot_dimension_numbers<[1], [0], [0], [1], [0, 0, 1, 1], [], []>} : vector<8x128xf32>, vector<128x128xf32>, vector<8x128xf32> -> vector<8x128xf32>
    %65 = arith.maximumf %55, %58 : vector<8x128xf32>
    %66 = arith.maximumf %65, %61 : vector<8x128xf32>
    %67 = arith.maximumf %66, %64 : vector<8x128xf32>
    %68 = arith.subf %55, %67 : vector<8x128xf32>
    %69 = math.exp %68 : vector<8x128xf32>
    %70 = arith.subf %58, %67 : vector<8x128xf32>
    %71 = math.exp %70 : vector<8x128xf32>
    %72 = arith.subf %61, %67 : vector<8x128xf32>
    %73 = math.exp %72 : vector<8x128xf32>
    %74 = arith.subf %64, %67 : vector<8x128xf32>
    %75 = math.exp %74 : vector<8x128xf32>
    %76 = arith.addf %69, %71 : vector<8x128xf32>
    %77 = arith.addf %76, %73 : vector<8x128xf32>
    %78 = arith.addf %77, %75 : vector<8x128xf32>
    %79 = tpu.reciprocal %78 {approx = true} : vector<8x128xf32> -> vector<8x128xf32>
    %80 = arith.mulf %69, %79 : vector<8x128xf32>
    %81 = arith.mulf %80, %53 : vector<8x128xf32>
    %c96_i32_24 = arith.constant 96 : i32
    %82 = tpu.dynamic_rotate %53 by %c96_i32_24 dim 1 : vector<8x128xf32>, i32 -> vector<8x128xf32>
    %83 = arith.mulf %71, %79 : vector<8x128xf32>
    %84 = arith.mulf %83, %82 : vector<8x128xf32>
    %85 = arith.addf %81, %84 : vector<8x128xf32>
    %c64_i32_25 = arith.constant 64 : i32
    %86 = tpu.dynamic_rotate %53 by %c64_i32_25 dim 1 : vector<8x128xf32>, i32 -> vector<8x128xf32>
    %87 = arith.mulf %73, %79 : vector<8x128xf32>
    %88 = arith.mulf %87, %86 : vector<8x128xf32>
    %89 = arith.addf %85, %88 : vector<8x128xf32>
    %c32_i32_26 = arith.constant 32 : i32
    %90 = tpu.dynamic_rotate %53 by %c32_i32_26 dim 1 : vector<8x128xf32>, i32 -> vector<8x128xf32>
    %91 = arith.mulf %75, %79 : vector<8x128xf32>
    %92 = arith.mulf %91, %90 : vector<8x128xf32>
    %93 = arith.addf %89, %92 : vector<8x128xf32>
    %94 = arith.truncf %93 : vector<8x128xf32> to vector<8x128xbf16>
    %c0_27 = arith.constant 0 : index
    %c0_28 = arith.constant 0 : index
    %c0_29 = arith.constant 0 : index
    %95 = vector.load %arg6[%c0_27, %c0_28, %c0_29] : memref<2x128x128xbf16, #tpu.memory_space<vmem>>, vector<1x128x128xbf16>
    %96 = vector.shape_cast %95 : vector<1x128x128xbf16> to vector<128x128xbf16>
    %cst_30 = arith.constant dense<0.000000e+00> : vector<8x128xf32>
    %97 = tpu.matmul %94, %96, %cst_30 {dimension_numbers = #tpu.dot_dimension_numbers<[1], [0], [0], [1], [0, 0, 1, 1], [], []>} : vector<8x128xbf16>, vector<128x128xbf16>, vector<8x128xf32> -> vector<8x128xf32>
    %c0_31 = arith.constant 0 : index
    %c0_32 = arith.constant 0 : index
    %c0_33 = arith.constant 0 : index
    %98 = vector.load %arg7[%c0_31, %c0_32, %c0_33] : memref<2x1x128xf32, #tpu.memory_space<vmem>>, vector<1x1x128xf32>
    %99 = vector.shape_cast %98 : vector<1x1x128xf32> to vector<1x128xf32>
    %100 = vector.broadcast %99 : vector<1x128xf32> to vector<8x128xf32>
    %101 = arith.addf %97, %100 : vector<8x128xf32>
    %102 = arith.addf %38, %101 : vector<8x128xf32>
    %103 = vector.extract_strided_slice %40 {offsets = [0, 0], sizes = [1, 128], strides = [1, 1]} : vector<4x128xf32> to vector<1x128xf32>
    %104 = vector.extract_strided_slice %40 {offsets = [1, 0], sizes = [1, 128], strides = [1, 1]} : vector<4x128xf32> to vector<1x128xf32>
    %cst_34 = arith.constant dense<0.000000e+00> : vector<8x128xf32>
    %105 = tpu.matmul %102, %1, %cst_34 {dimension_numbers = #tpu.dot_dimension_numbers<[1], [0], [0], [1], [0, 0, 1, 1], [], []>} : vector<8x128xf32>, vector<128x128xf32>, vector<8x128xf32> -> vector<8x128xf32>
    %106 = arith.subf %102, %105 : vector<8x128xf32>
    %107 = arith.mulf %106, %106 : vector<8x128xf32>
    %cst_35 = arith.constant dense<0.000000e+00> : vector<8x128xf32>
    %108 = tpu.matmul %107, %1, %cst_35 {dimension_numbers = #tpu.dot_dimension_numbers<[1], [0], [0], [1], [0, 0, 1, 1], [], []>} : vector<8x128xf32>, vector<128x128xf32>, vector<8x128xf32> -> vector<8x128xf32>
    %cst_36 = arith.constant 9.99999974E-6 : f32
    %109 = vector.broadcast %cst_36 : f32 to vector<8x128xf32>
    %110 = arith.addf %108, %109 : vector<8x128xf32>
    %111 = math.rsqrt %110 : vector<8x128xf32>
    %112 = arith.mulf %106, %111 : vector<8x128xf32>
    %113 = vector.broadcast %103 : vector<1x128xf32> to vector<8x128xf32>
    %114 = arith.mulf %112, %113 : vector<8x128xf32>
    %115 = vector.broadcast %104 : vector<1x128xf32> to vector<8x128xf32>
    %116 = arith.addf %114, %115 : vector<8x128xf32>
    %117 = arith.truncf %116 : vector<8x128xf32> to vector<8x128xbf16>
    %c0_37 = arith.constant 0 : index
    %c0_38 = arith.constant 0 : index
    %c0_39 = arith.constant 0 : index
    %118 = vector.load %arg8[%c0_37, %c0_38, %c0_39] : memref<2x128x512xbf16, #tpu.memory_space<vmem>>, vector<1x128x512xbf16>
    %119 = vector.shape_cast %118 : vector<1x128x512xbf16> to vector<128x512xbf16>
    %cst_40 = arith.constant dense<0.000000e+00> : vector<8x512xf32>
    %120 = tpu.matmul %117, %119, %cst_40 {dimension_numbers = #tpu.dot_dimension_numbers<[1], [0], [0], [1], [0, 0, 1, 1], [], []>} : vector<8x128xbf16>, vector<128x512xbf16>, vector<8x512xf32> -> vector<8x512xf32>
    %c0_41 = arith.constant 0 : index
    %c0_42 = arith.constant 0 : index
    %c0_43 = arith.constant 0 : index
    %121 = vector.load %arg9[%c0_41, %c0_42, %c0_43] : memref<2x1x512xf32, #tpu.memory_space<vmem>>, vector<1x1x512xf32>
    %122 = vector.shape_cast %121 : vector<1x1x512xf32> to vector<1x512xf32>
    %123 = vector.broadcast %122 : vector<1x512xf32> to vector<8x512xf32>
    %124 = arith.addf %120, %123 : vector<8x512xf32>
    %cst_44 = arith.constant 0.000000e+00 : f32
    %125 = vector.broadcast %cst_44 : f32 to vector<8x512xf32>
    %126 = arith.maximumf %124, %125 : vector<8x512xf32>
    %127 = arith.truncf %126 : vector<8x512xf32> to vector<8x512xbf16>
    %c0_45 = arith.constant 0 : index
    %c0_46 = arith.constant 0 : index
    %c0_47 = arith.constant 0 : index
    %128 = vector.load %arg10[%c0_45, %c0_46, %c0_47] : memref<2x512x128xbf16, #tpu.memory_space<vmem>>, vector<1x512x128xbf16>
    %129 = vector.shape_cast %128 : vector<1x512x128xbf16> to vector<512x128xbf16>
    %cst_48 = arith.constant dense<0.000000e+00> : vector<8x128xf32>
    %130 = tpu.matmul %127, %129, %cst_48 {dimension_numbers = #tpu.dot_dimension_numbers<[1], [0], [0], [1], [0, 0, 1, 1], [], []>} : vector<8x512xbf16>, vector<512x128xbf16>, vector<8x128xf32> -> vector<8x128xf32>
    %c0_49 = arith.constant 0 : index
    %c0_50 = arith.constant 0 : index
    %c0_51 = arith.constant 0 : index
    %131 = vector.load %arg11[%c0_49, %c0_50, %c0_51] : memref<2x1x128xf32, #tpu.memory_space<vmem>>, vector<1x1x128xf32>
    %132 = vector.shape_cast %131 : vector<1x1x128xf32> to vector<1x128xf32>
    %133 = vector.broadcast %132 : vector<1x128xf32> to vector<8x128xf32>
    %134 = arith.addf %130, %133 : vector<8x128xf32>
    %135 = arith.addf %116, %134 : vector<8x128xf32>
    %136 = vector.extract_strided_slice %40 {offsets = [2, 0], sizes = [1, 128], strides = [1, 1]} : vector<4x128xf32> to vector<1x128xf32>
    %137 = vector.extract_strided_slice %40 {offsets = [3, 0], sizes = [1, 128], strides = [1, 1]} : vector<4x128xf32> to vector<1x128xf32>
    %cst_52 = arith.constant dense<0.000000e+00> : vector<8x128xf32>
    %138 = tpu.matmul %135, %1, %cst_52 {dimension_numbers = #tpu.dot_dimension_numbers<[1], [0], [0], [1], [0, 0, 1, 1], [], []>} : vector<8x128xf32>, vector<128x128xf32>, vector<8x128xf32> -> vector<8x128xf32>
    %139 = arith.subf %135, %138 : vector<8x128xf32>
    %140 = arith.mulf %139, %139 : vector<8x128xf32>
    %cst_53 = arith.constant dense<0.000000e+00> : vector<8x128xf32>
    %141 = tpu.matmul %140, %1, %cst_53 {dimension_numbers = #tpu.dot_dimension_numbers<[1], [0], [0], [1], [0, 0, 1, 1], [], []>} : vector<8x128xf32>, vector<128x128xf32>, vector<8x128xf32> -> vector<8x128xf32>
    %cst_54 = arith.constant 9.99999974E-6 : f32
    %142 = vector.broadcast %cst_54 : f32 to vector<8x128xf32>
    %143 = arith.addf %141, %142 : vector<8x128xf32>
    %144 = math.rsqrt %143 : vector<8x128xf32>
    %145 = arith.mulf %139, %144 : vector<8x128xf32>
    %146 = vector.broadcast %136 : vector<1x128xf32> to vector<8x128xf32>
    %147 = arith.mulf %145, %146 : vector<8x128xf32>
    %148 = vector.broadcast %137 : vector<1x128xf32> to vector<8x128xf32>
    %149 = arith.addf %147, %148 : vector<8x128xf32>
    %c1 = arith.constant 1 : index
    %c0_55 = arith.constant 0 : index
    %c0_56 = arith.constant 0 : index
    %150 = vector.load %arg12[%c1, %c0_55, %c0_56] : memref<2x4x128xf32, #tpu.memory_space<vmem>>, vector<1x4x128xf32>
    %151 = vector.shape_cast %150 : vector<1x4x128xf32> to vector<4x128xf32>
    %152 = arith.truncf %149 : vector<8x128xf32> to vector<8x128xbf16>
    %c1_57 = arith.constant 1 : index
    %c0_58 = arith.constant 0 : index
    %c0_59 = arith.constant 0 : index
    %153 = vector.load %arg4[%c1_57, %c0_58, %c0_59] : memref<2x128x384xbf16, #tpu.memory_space<vmem>>, vector<1x128x384xbf16>
    %154 = vector.shape_cast %153 : vector<1x128x384xbf16> to vector<128x384xbf16>
    %cst_60 = arith.constant dense<0.000000e+00> : vector<8x384xf32>
    %155 = tpu.matmul %152, %154, %cst_60 {dimension_numbers = #tpu.dot_dimension_numbers<[1], [0], [0], [1], [0, 0, 1, 1], [], []>} : vector<8x128xbf16>, vector<128x384xbf16>, vector<8x384xf32> -> vector<8x384xf32>
    %c1_61 = arith.constant 1 : index
    %c0_62 = arith.constant 0 : index
    %c0_63 = arith.constant 0 : index
    %156 = vector.load %arg5[%c1_61, %c0_62, %c0_63] : memref<2x1x384xf32, #tpu.memory_space<vmem>>, vector<1x1x384xf32>
    %157 = vector.shape_cast %156 : vector<1x1x384xf32> to vector<1x384xf32>
    %158 = vector.broadcast %157 : vector<1x384xf32> to vector<8x384xf32>
    %159 = arith.addf %155, %158 : vector<8x384xf32>
    %160 = vector.extract_strided_slice %159 {offsets = [0, 0], sizes = [8, 128], strides = [1, 1]} : vector<8x384xf32> to vector<8x128xf32>
    %cst_64 = arith.constant 0.353553385 : f32
    %161 = vector.broadcast %cst_64 : f32 to vector<8x128xf32>
    %162 = arith.mulf %160, %161 : vector<8x128xf32>
    %163 = vector.extract_strided_slice %159 {offsets = [0, 128], sizes = [8, 128], strides = [1, 1]} : vector<8x384xf32> to vector<8x128xf32>
    %164 = vector.extract_strided_slice %159 {offsets = [0, 256], sizes = [8, 128], strides = [1, 1]} : vector<8x384xf32> to vector<8x128xf32>
    %165 = arith.mulf %162, %163 : vector<8x128xf32>
    %cst_65 = arith.constant dense<0.000000e+00> : vector<8x128xf32>
    %166 = tpu.matmul %165, %0, %cst_65 {dimension_numbers = #tpu.dot_dimension_numbers<[1], [0], [0], [1], [0, 0, 1, 1], [], []>} : vector<8x128xf32>, vector<128x128xf32>, vector<8x128xf32> -> vector<8x128xf32>
    %c96_i32_66 = arith.constant 96 : i32
    %167 = tpu.dynamic_rotate %163 by %c96_i32_66 dim 1 : vector<8x128xf32>, i32 -> vector<8x128xf32>
    %168 = arith.mulf %162, %167 : vector<8x128xf32>
    %cst_67 = arith.constant dense<0.000000e+00> : vector<8x128xf32>
    %169 = tpu.matmul %168, %0, %cst_67 {dimension_numbers = #tpu.dot_dimension_numbers<[1], [0], [0], [1], [0, 0, 1, 1], [], []>} : vector<8x128xf32>, vector<128x128xf32>, vector<8x128xf32> -> vector<8x128xf32>
    %c64_i32_68 = arith.constant 64 : i32
    %170 = tpu.dynamic_rotate %163 by %c64_i32_68 dim 1 : vector<8x128xf32>, i32 -> vector<8x128xf32>
    %171 = arith.mulf %162, %170 : vector<8x128xf32>
    %cst_69 = arith.constant dense<0.000000e+00> : vector<8x128xf32>
    %172 = tpu.matmul %171, %0, %cst_69 {dimension_numbers = #tpu.dot_dimension_numbers<[1], [0], [0], [1], [0, 0, 1, 1], [], []>} : vector<8x128xf32>, vector<128x128xf32>, vector<8x128xf32> -> vector<8x128xf32>
    %c32_i32_70 = arith.constant 32 : i32
    %173 = tpu.dynamic_rotate %163 by %c32_i32_70 dim 1 : vector<8x128xf32>, i32 -> vector<8x128xf32>
    %174 = arith.mulf %162, %173 : vector<8x128xf32>
    %cst_71 = arith.constant dense<0.000000e+00> : vector<8x128xf32>
    %175 = tpu.matmul %174, %0, %cst_71 {dimension_numbers = #tpu.dot_dimension_numbers<[1], [0], [0], [1], [0, 0, 1, 1], [], []>} : vector<8x128xf32>, vector<128x128xf32>, vector<8x128xf32> -> vector<8x128xf32>
    %176 = arith.maximumf %166, %169 : vector<8x128xf32>
    %177 = arith.maximumf %176, %172 : vector<8x128xf32>
    %178 = arith.maximumf %177, %175 : vector<8x128xf32>
    %179 = arith.subf %166, %178 : vector<8x128xf32>
    %180 = math.exp %179 : vector<8x128xf32>
    %181 = arith.subf %169, %178 : vector<8x128xf32>
    %182 = math.exp %181 : vector<8x128xf32>
    %183 = arith.subf %172, %178 : vector<8x128xf32>
    %184 = math.exp %183 : vector<8x128xf32>
    %185 = arith.subf %175, %178 : vector<8x128xf32>
    %186 = math.exp %185 : vector<8x128xf32>
    %187 = arith.addf %180, %182 : vector<8x128xf32>
    %188 = arith.addf %187, %184 : vector<8x128xf32>
    %189 = arith.addf %188, %186 : vector<8x128xf32>
    %190 = tpu.reciprocal %189 {approx = true} : vector<8x128xf32> -> vector<8x128xf32>
    %191 = arith.mulf %180, %190 : vector<8x128xf32>
    %192 = arith.mulf %191, %164 : vector<8x128xf32>
    %c96_i32_72 = arith.constant 96 : i32
    %193 = tpu.dynamic_rotate %164 by %c96_i32_72 dim 1 : vector<8x128xf32>, i32 -> vector<8x128xf32>
    %194 = arith.mulf %182, %190 : vector<8x128xf32>
    %195 = arith.mulf %194, %193 : vector<8x128xf32>
    %196 = arith.addf %192, %195 : vector<8x128xf32>
    %c64_i32_73 = arith.constant 64 : i32
    %197 = tpu.dynamic_rotate %164 by %c64_i32_73 dim 1 : vector<8x128xf32>, i32 -> vector<8x128xf32>
    %198 = arith.mulf %184, %190 : vector<8x128xf32>
    %199 = arith.mulf %198, %197 : vector<8x128xf32>
    %200 = arith.addf %196, %199 : vector<8x128xf32>
    %c32_i32_74 = arith.constant 32 : i32
    %201 = tpu.dynamic_rotate %164 by %c32_i32_74 dim 1 : vector<8x128xf32>, i32 -> vector<8x128xf32>
    %202 = arith.mulf %186, %190 : vector<8x128xf32>
    %203 = arith.mulf %202, %201 : vector<8x128xf32>
    %204 = arith.addf %200, %203 : vector<8x128xf32>
    %205 = arith.truncf %204 : vector<8x128xf32> to vector<8x128xbf16>
    %c1_75 = arith.constant 1 : index
    %c0_76 = arith.constant 0 : index
    %c0_77 = arith.constant 0 : index
    %206 = vector.load %arg6[%c1_75, %c0_76, %c0_77] : memref<2x128x128xbf16, #tpu.memory_space<vmem>>, vector<1x128x128xbf16>
    %207 = vector.shape_cast %206 : vector<1x128x128xbf16> to vector<128x128xbf16>
    %cst_78 = arith.constant dense<0.000000e+00> : vector<8x128xf32>
    %208 = tpu.matmul %205, %207, %cst_78 {dimension_numbers = #tpu.dot_dimension_numbers<[1], [0], [0], [1], [0, 0, 1, 1], [], []>} : vector<8x128xbf16>, vector<128x128xbf16>, vector<8x128xf32> -> vector<8x128xf32>
    %c1_79 = arith.constant 1 : index
    %c0_80 = arith.constant 0 : index
    %c0_81 = arith.constant 0 : index
    %209 = vector.load %arg7[%c1_79, %c0_80, %c0_81] : memref<2x1x128xf32, #tpu.memory_space<vmem>>, vector<1x1x128xf32>
    %210 = vector.shape_cast %209 : vector<1x1x128xf32> to vector<1x128xf32>
    %211 = vector.broadcast %210 : vector<1x128xf32> to vector<8x128xf32>
    %212 = arith.addf %208, %211 : vector<8x128xf32>
    %213 = arith.addf %149, %212 : vector<8x128xf32>
    %214 = vector.extract_strided_slice %151 {offsets = [0, 0], sizes = [1, 128], strides = [1, 1]} : vector<4x128xf32> to vector<1x128xf32>
    %215 = vector.extract_strided_slice %151 {offsets = [1, 0], sizes = [1, 128], strides = [1, 1]} : vector<4x128xf32> to vector<1x128xf32>
    %cst_82 = arith.constant dense<0.000000e+00> : vector<8x128xf32>
    %216 = tpu.matmul %213, %1, %cst_82 {dimension_numbers = #tpu.dot_dimension_numbers<[1], [0], [0], [1], [0, 0, 1, 1], [], []>} : vector<8x128xf32>, vector<128x128xf32>, vector<8x128xf32> -> vector<8x128xf32>
    %217 = arith.subf %213, %216 : vector<8x128xf32>
    %218 = arith.mulf %217, %217 : vector<8x128xf32>
    %cst_83 = arith.constant dense<0.000000e+00> : vector<8x128xf32>
    %219 = tpu.matmul %218, %1, %cst_83 {dimension_numbers = #tpu.dot_dimension_numbers<[1], [0], [0], [1], [0, 0, 1, 1], [], []>} : vector<8x128xf32>, vector<128x128xf32>, vector<8x128xf32> -> vector<8x128xf32>
    %cst_84 = arith.constant 9.99999974E-6 : f32
    %220 = vector.broadcast %cst_84 : f32 to vector<8x128xf32>
    %221 = arith.addf %219, %220 : vector<8x128xf32>
    %222 = math.rsqrt %221 : vector<8x128xf32>
    %223 = arith.mulf %217, %222 : vector<8x128xf32>
    %224 = vector.broadcast %214 : vector<1x128xf32> to vector<8x128xf32>
    %225 = arith.mulf %223, %224 : vector<8x128xf32>
    %226 = vector.broadcast %215 : vector<1x128xf32> to vector<8x128xf32>
    %227 = arith.addf %225, %226 : vector<8x128xf32>
    %228 = arith.truncf %227 : vector<8x128xf32> to vector<8x128xbf16>
    %c1_85 = arith.constant 1 : index
    %c0_86 = arith.constant 0 : index
    %c0_87 = arith.constant 0 : index
    %229 = vector.load %arg8[%c1_85, %c0_86, %c0_87] : memref<2x128x512xbf16, #tpu.memory_space<vmem>>, vector<1x128x512xbf16>
    %230 = vector.shape_cast %229 : vector<1x128x512xbf16> to vector<128x512xbf16>
    %cst_88 = arith.constant dense<0.000000e+00> : vector<8x512xf32>
    %231 = tpu.matmul %228, %230, %cst_88 {dimension_numbers = #tpu.dot_dimension_numbers<[1], [0], [0], [1], [0, 0, 1, 1], [], []>} : vector<8x128xbf16>, vector<128x512xbf16>, vector<8x512xf32> -> vector<8x512xf32>
    %c1_89 = arith.constant 1 : index
    %c0_90 = arith.constant 0 : index
    %c0_91 = arith.constant 0 : index
    %232 = vector.load %arg9[%c1_89, %c0_90, %c0_91] : memref<2x1x512xf32, #tpu.memory_space<vmem>>, vector<1x1x512xf32>
    %233 = vector.shape_cast %232 : vector<1x1x512xf32> to vector<1x512xf32>
    %234 = vector.broadcast %233 : vector<1x512xf32> to vector<8x512xf32>
    %235 = arith.addf %231, %234 : vector<8x512xf32>
    %cst_92 = arith.constant 0.000000e+00 : f32
    %236 = vector.broadcast %cst_92 : f32 to vector<8x512xf32>
    %237 = arith.maximumf %235, %236 : vector<8x512xf32>
    %238 = arith.truncf %237 : vector<8x512xf32> to vector<8x512xbf16>
    %c1_93 = arith.constant 1 : index
    %c0_94 = arith.constant 0 : index
    %c0_95 = arith.constant 0 : index
    %239 = vector.load %arg10[%c1_93, %c0_94, %c0_95] : memref<2x512x128xbf16, #tpu.memory_space<vmem>>, vector<1x512x128xbf16>
    %240 = vector.shape_cast %239 : vector<1x512x128xbf16> to vector<512x128xbf16>
    %cst_96 = arith.constant dense<0.000000e+00> : vector<8x128xf32>
    %241 = tpu.matmul %238, %240, %cst_96 {dimension_numbers = #tpu.dot_dimension_numbers<[1], [0], [0], [1], [0, 0, 1, 1], [], []>} : vector<8x512xbf16>, vector<512x128xbf16>, vector<8x128xf32> -> vector<8x128xf32>
    %c1_97 = arith.constant 1 : index
    %c0_98 = arith.constant 0 : index
    %c0_99 = arith.constant 0 : index
    %242 = vector.load %arg11[%c1_97, %c0_98, %c0_99] : memref<2x1x128xf32, #tpu.memory_space<vmem>>, vector<1x1x128xf32>
    %243 = vector.shape_cast %242 : vector<1x1x128xf32> to vector<1x128xf32>
    %244 = vector.broadcast %243 : vector<1x128xf32> to vector<8x128xf32>
    %245 = arith.addf %241, %244 : vector<8x128xf32>
    %246 = arith.addf %227, %245 : vector<8x128xf32>
    %247 = vector.extract_strided_slice %151 {offsets = [2, 0], sizes = [1, 128], strides = [1, 1]} : vector<4x128xf32> to vector<1x128xf32>
    %248 = vector.extract_strided_slice %151 {offsets = [3, 0], sizes = [1, 128], strides = [1, 1]} : vector<4x128xf32> to vector<1x128xf32>
    %cst_100 = arith.constant dense<0.000000e+00> : vector<8x128xf32>
    %249 = tpu.matmul %246, %1, %cst_100 {dimension_numbers = #tpu.dot_dimension_numbers<[1], [0], [0], [1], [0, 0, 1, 1], [], []>} : vector<8x128xf32>, vector<128x128xf32>, vector<8x128xf32> -> vector<8x128xf32>
    %250 = arith.subf %246, %249 : vector<8x128xf32>
    %251 = arith.mulf %250, %250 : vector<8x128xf32>
    %cst_101 = arith.constant dense<0.000000e+00> : vector<8x128xf32>
    %252 = tpu.matmul %251, %1, %cst_101 {dimension_numbers = #tpu.dot_dimension_numbers<[1], [0], [0], [1], [0, 0, 1, 1], [], []>} : vector<8x128xf32>, vector<128x128xf32>, vector<8x128xf32> -> vector<8x128xf32>
    %cst_102 = arith.constant 9.99999974E-6 : f32
    %253 = vector.broadcast %cst_102 : f32 to vector<8x128xf32>
    %254 = arith.addf %252, %253 : vector<8x128xf32>
    %255 = math.rsqrt %254 : vector<8x128xf32>
    %256 = arith.mulf %250, %255 : vector<8x128xf32>
    %257 = vector.broadcast %247 : vector<1x128xf32> to vector<8x128xf32>
    %258 = arith.mulf %256, %257 : vector<8x128xf32>
    %259 = vector.broadcast %248 : vector<1x128xf32> to vector<8x128xf32>
    %260 = arith.addf %258, %259 : vector<8x128xf32>
    %c0_103 = arith.constant 0 : index
    %c0_104 = arith.constant 0 : index
    %261 = vector.load %arg2[%c0_103, %c0_104] : memref<8x3xf32, #tpu.memory_space<vmem>>, vector<8x3xf32>
    %c0_105 = arith.constant 0 : index
    %c0_106 = arith.constant 0 : index
    %262 = vector.load %arg15[%c0_105, %c0_106] : memref<3x32xf32, #tpu.memory_space<vmem>>, vector<3x32xf32>
    %cst_107 = arith.constant dense<0.000000e+00> : vector<8x32xf32>
    %263 = tpu.matmul %261, %262, %cst_107 {dimension_numbers = #tpu.dot_dimension_numbers<[1], [0], [0], [1], [0, 0, 1, 1], [], []>} : vector<8x3xf32>, vector<3x32xf32>, vector<8x32xf32> -> vector<8x32xf32>
    %c0_108 = arith.constant 0 : index
    %c0_109 = arith.constant 0 : index
    %264 = vector.load %arg16[%c0_108, %c0_109] : memref<1x32xf32, #tpu.memory_space<vmem>>, vector<1x32xf32>
    %265 = vector.broadcast %264 : vector<1x32xf32> to vector<8x32xf32>
    %266 = arith.addf %263, %265 : vector<8x32xf32>
    %267 = arith.truncf %260 : vector<8x128xf32> to vector<8x128xbf16>
    %c0_110 = arith.constant 0 : index
    %c0_111 = arith.constant 0 : index
    %268 = vector.load %arg17[%c0_110, %c0_111] : memref<128x128xbf16, #tpu.memory_space<vmem>>, vector<128x128xbf16>
    %cst_112 = arith.constant dense<0.000000e+00> : vector<8x128xf32>
    %269 = tpu.matmul %267, %268, %cst_112 {dimension_numbers = #tpu.dot_dimension_numbers<[1], [0], [0], [1], [0, 0, 1, 1], [], []>} : vector<8x128xbf16>, vector<128x128xbf16>, vector<8x128xf32> -> vector<8x128xf32>
    %270 = arith.truncf %266 : vector<8x32xf32> to vector<8x32xbf16>
    %c0_113 = arith.constant 0 : index
    %c0_114 = arith.constant 0 : index
    %271 = vector.load %arg18[%c0_113, %c0_114] : memref<32x128xbf16, #tpu.memory_space<vmem>>, vector<32x128xbf16>
    %cst_115 = arith.constant dense<0.000000e+00> : vector<8x128xf32>
    %272 = tpu.matmul %270, %271, %cst_115 {dimension_numbers = #tpu.dot_dimension_numbers<[1], [0], [0], [1], [0, 0, 1, 1], [], []>} : vector<8x32xbf16>, vector<32x128xbf16>, vector<8x128xf32> -> vector<8x128xf32>
    %273 = arith.addf %269, %272 : vector<8x128xf32>
    %c0_116 = arith.constant 0 : index
    %c0_117 = arith.constant 0 : index
    %274 = vector.load %arg19[%c0_116, %c0_117] : memref<1x128xf32, #tpu.memory_space<vmem>>, vector<1x128xf32>
    %275 = vector.broadcast %274 : vector<1x128xf32> to vector<8x128xf32>
    %276 = arith.addf %273, %275 : vector<8x128xf32>
    %cst_118 = arith.constant 0.000000e+00 : f32
    %277 = vector.broadcast %cst_118 : f32 to vector<8x128xf32>
    %278 = arith.maximumf %276, %277 : vector<8x128xf32>
    %c0_119 = arith.constant 0 : index
    %c0_120 = arith.constant 0 : index
    %279 = vector.load %arg20[%c0_119, %c0_120] : memref<1x128xf32, #tpu.memory_space<vmem>>, vector<1x128xf32>
    %280 = vector.broadcast %279 : vector<1x128xf32> to vector<8x128xf32>
    %281 = arith.mulf %278, %280 : vector<8x128xf32>
    %cst_121 = arith.constant dense<0.000000e+00> : vector<8xf32>
    %282 = vector.multi_reduction <add>, %281, %cst_121 [1] : vector<8x128xf32> to vector<8xf32>
    %283 = vector.shape_cast %282 : vector<8xf32> to vector<8x1xf32>
    %c0_122 = arith.constant 0 : index
    %c0_123 = arith.constant 0 : index
    %284 = vector.load %arg21[%c0_122, %c0_123] : memref<1x1xf32, #tpu.memory_space<vmem>>, vector<1x1xf32>
    %285 = vector.broadcast %284 : vector<1x1xf32> to vector<8x1xf32>
    %286 = arith.addf %283, %285 : vector<8x1xf32>
    %c0_124 = arith.constant 0 : index
    %c0_125 = arith.constant 0 : index
    %287 = vector.load %arg22[%c0_124, %c0_125] : memref<8x1xf32, #tpu.memory_space<vmem>>, vector<8x1xf32>
    tpu.vector_store %arg22[%c0_124, %c0_125], %286 {strides = array<i32>} : memref<8x1xf32, #tpu.memory_space<vmem>>, vector<8x1xf32>,
    return
  }
  func.func @transform_0(%arg0: i32) -> (i32, i32) {
    %c0_i32 = arith.constant 0 : i32
    %c0_i32_0 = arith.constant 0 : i32
    return %arg0, %c0_i32 : i32, i32
  }
  func.func @transform_1(%arg0: i32) -> (i32, i32) {
    %c0_i32 = arith.constant 0 : i32
    %c0_i32_0 = arith.constant 0 : i32
    return %arg0, %c0_i32 : i32, i32
  }
  func.func @transform_2(%arg0: i32) -> (i32, i32) {
    %c0_i32 = arith.constant 0 : i32
    %c0_i32_0 = arith.constant 0 : i32
    %c0_i32_1 = arith.constant 0 : i32
    return %c0_i32, %c0_i32_0 : i32, i32
  }
  func.func @transform_3(%arg0: i32) -> (i32, i32, i32) {
    %c0_i32 = arith.constant 0 : i32
    %c0_i32_0 = arith.constant 0 : i32
    %c0_i32_1 = arith.constant 0 : i32
    %c0_i32_2 = arith.constant 0 : i32
    return %c0_i32, %c0_i32_0, %c0_i32_1 : i32, i32, i32
  }
  func.func @transform_4(%arg0: i32) -> (i32, i32, i32) {
    %c0_i32 = arith.constant 0 : i32
    %c0_i32_0 = arith.constant 0 : i32
    %c0_i32_1 = arith.constant 0 : i32
    %c0_i32_2 = arith.constant 0 : i32
    return %c0_i32, %c0_i32_0, %c0_i32_1 : i32, i32, i32
  }
  func.func @transform_5(%arg0: i32) -> (i32, i32, i32) {
    %c0_i32 = arith.constant 0 : i32
    %c0_i32_0 = arith.constant 0 : i32
    %c0_i32_1 = arith.constant 0 : i32
    %c0_i32_2 = arith.constant 0 : i32
    return %c0_i32, %c0_i32_0, %c0_i32_1 : i32, i32, i32
  }
  func.func @transform_6(%arg0: i32) -> (i32, i32, i32) {
    %c0_i32 = arith.constant 0 : i32
    %c0_i32_0 = arith.constant 0 : i32
    %c0_i32_1 = arith.constant 0 : i32
    %c0_i32_2 = arith.constant 0 : i32
    return %c0_i32, %c0_i32_0, %c0_i32_1 : i32, i32, i32
  }
  func.func @transform_7(%arg0: i32) -> (i32, i32, i32) {
    %c0_i32 = arith.constant 0 : i32
    %c0_i32_0 = arith.constant 0 : i32
    %c0_i32_1 = arith.constant 0 : i32
    %c0_i32_2 = arith.constant 0 : i32
    return %c0_i32, %c0_i32_0, %c0_i32_1 : i32, i32, i32
  }
  func.func @transform_8(%arg0: i32) -> (i32, i32, i32) {
    %c0_i32 = arith.constant 0 : i32
    %c0_i32_0 = arith.constant 0 : i32
    %c0_i32_1 = arith.constant 0 : i32
    %c0_i32_2 = arith.constant 0 : i32
    return %c0_i32, %c0_i32_0, %c0_i32_1 : i32, i32, i32
  }
  func.func @transform_9(%arg0: i32) -> (i32, i32, i32) {
    %c0_i32 = arith.constant 0 : i32
    %c0_i32_0 = arith.constant 0 : i32
    %c0_i32_1 = arith.constant 0 : i32
    %c0_i32_2 = arith.constant 0 : i32
    return %c0_i32, %c0_i32_0, %c0_i32_1 : i32, i32, i32
  }
  func.func @transform_10(%arg0: i32) -> (i32, i32, i32) {
    %c0_i32 = arith.constant 0 : i32
    %c0_i32_0 = arith.constant 0 : i32
    %c0_i32_1 = arith.constant 0 : i32
    %c0_i32_2 = arith.constant 0 : i32
    return %c0_i32, %c0_i32_0, %c0_i32_1 : i32, i32, i32
  }
  func.func @transform_11(%arg0: i32) -> (i32, i32, i32) {
    %c0_i32 = arith.constant 0 : i32
    %c0_i32_0 = arith.constant 0 : i32
    %c0_i32_1 = arith.constant 0 : i32
    %c0_i32_2 = arith.constant 0 : i32
    return %c0_i32, %c0_i32_0, %c0_i32_1 : i32, i32, i32
  }
  func.func @transform_12(%arg0: i32) -> (i32, i32) {
    %c0_i32 = arith.constant 0 : i32
    %c0_i32_0 = arith.constant 0 : i32
    %c0_i32_1 = arith.constant 0 : i32
    return %c0_i32, %c0_i32_0 : i32, i32
  }
  func.func @transform_13(%arg0: i32) -> (i32, i32) {
    %c0_i32 = arith.constant 0 : i32
    %c0_i32_0 = arith.constant 0 : i32
    %c0_i32_1 = arith.constant 0 : i32
    return %c0_i32, %c0_i32_0 : i32, i32
  }
  func.func @transform_14(%arg0: i32) -> (i32, i32) {
    %c0_i32 = arith.constant 0 : i32
    %c0_i32_0 = arith.constant 0 : i32
    %c0_i32_1 = arith.constant 0 : i32
    return %c0_i32, %c0_i32_0 : i32, i32
  }
  func.func @transform_15(%arg0: i32) -> (i32, i32) {
    %c0_i32 = arith.constant 0 : i32
    %c0_i32_0 = arith.constant 0 : i32
    %c0_i32_1 = arith.constant 0 : i32
    return %c0_i32, %c0_i32_0 : i32, i32
  }
  func.func @transform_16(%arg0: i32) -> (i32, i32) {
    %c0_i32 = arith.constant 0 : i32
    %c0_i32_0 = arith.constant 0 : i32
    %c0_i32_1 = arith.constant 0 : i32
    return %c0_i32, %c0_i32_0 : i32, i32
  }
  func.func @transform_17(%arg0: i32) -> (i32, i32) {
    %c0_i32 = arith.constant 0 : i32
    %c0_i32_0 = arith.constant 0 : i32
    %c0_i32_1 = arith.constant 0 : i32
    return %c0_i32, %c0_i32_0 : i32, i32
  }
  func.func @transform_18(%arg0: i32) -> (i32, i32) {
    %c0_i32 = arith.constant 0 : i32
    %c0_i32_0 = arith.constant 0 : i32
    %c0_i32_1 = arith.constant 0 : i32
    return %c0_i32, %c0_i32_0 : i32, i32
  }
  func.func @transform_19(%arg0: i32) -> (i32, i32) {
    %c0_i32 = arith.constant 0 : i32
    %c0_i32_0 = arith.constant 0 : i32
    %c0_i32_1 = arith.constant 0 : i32
    return %c0_i32, %c0_i32_0 : i32, i32
  }
  func.func @transform_20(%arg0: i32) -> (i32, i32) {
    %c0_i32 = arith.constant 0 : i32
    %c0_i32_0 = arith.constant 0 : i32
    %c0_i32_1 = arith.constant 0 : i32
    return %c0_i32, %c0_i32_0 : i32, i32
  }
  func.func @transform_21(%arg0: i32) -> (i32, i32) {
    %c0_i32 = arith.constant 0 : i32
    %c0_i32_0 = arith.constant 0 : i32
    return %arg0, %c0_i32 : i32, i32
  }
}

</mosaic_0001>

<bundles_post_ra>
// kernel: tpu_custom_call.1
= control target key start
LH: loop header
LB: loop body
LE: loop exit
PB: predicated region body
PF: predicated region fallthrough
CT: control target
= control target key end

     0   :  { %s4754_s0 = inlined_call_operand.vmem [shape: s32[8,4], index: 0, kind: input, shape index: {}]   ;;  %s4755_s1 = inlined_call_operand.vmem [shape: f32[8,3], index: 1, kind: input, shape index: {}]   ;;  %s4756_s2 = inlined_call_operand.hbm [shape: f32[64,128], index: 2, kind: input, shape index: {}]   ;;  %s4757_s3 = inlined_call_operand.hbm [shape: bf16[2,128,384], index: 3, kind: input, shape index: {}]   ;;  %s4758_s4 = inlined_call_operand.hbm [shape: f32[2,1,384], index: 4, kind: input, shape index: {}]   ;;  %s4759_s5 = inlined_call_operand.hbm [shape: bf16[2,128,128], index: 5, kind: input, shape index: {}]   ;;  %s4760_s6 = inlined_call_operand.hbm [shape: f32[2,1,128], index: 6, kind: input, shape index: {}]   ;;  %s4761_s7 = inlined_call_operand.hbm [shape: bf16[2,128,512], index: 7, kind: input, shape index: {}]   ;;  %s4762_s8 = inlined_call_operand.vmem [shape: f32[2,1,512], index: 8, kind: input, shape index: {}]   ;;  %s4763_s9 = inlined_call_operand.hbm [shape: bf16[2,512,128], index: 9, kind: input, shape index: {}]   ;;  %s4764_s10 = inlined_call_operand.vmem [shape: f32[2,1,128], index: 10, kind: input, shape index: {}]   ;;  %s4765_s11 = inlined_call_operand.hbm [shape: f32[2,4,128], index: 11, kind: input, shape index: {}]   ;;  %s4766_s12 = inlined_call_operand.hbm [shape: f32[128,128], index: 12, kind: input, shape index: {}]   ;;  %s4767_s13 = inlined_call_operand.hbm [shape: f32[128,128], index: 13, kind: input, shape index: {}]   ;;  %s4768_s14 = inlined_call_operand.vmem [shape: f32[3,32], index: 14, kind: input, shape index: {}]   ;;  %s4769_s15 = inlined_call_operand.vmem [shape: f32[1,32], index: 15, kind: input, shape index: {}]   ;;  %s4770_s16 = inlined_call_operand.hbm [shape: bf16[128,128], index: 16, kind: input, shape index: {}]   ;;  %s4771_s17 = inlined_call_operand.vmem [shape: bf16[32,128], index: 17, kind: input, shape index: {}]   ;;  %s4772_s18 = inlined_call_operand.vmem [shape: f32[1,128], index: 18, kind: input, shape index: {}]   ;;  %s4773_s19 = inlined_call_operand.vmem [shape: f32[1,128], index: 19, kind: input, shape index: {}]   ;;  %s4774_s20 = inlined_call_operand.<no memory space> [shape: f32[1,1], index: 20, kind: input, shape index: {}]   ;;  %s4775_s21 = inlined_call_operand.vmem [shape: f32[8,1], index: 21, kind: output, shape index: {}]  }
   0x1   :  { %4780 = sst [smem:[#allocation26_spill]] %s4754_s0  ;;  %v26_v0 = vstv %s4774_s20 }
   0x2   :  { %4781 = sst [smem:[#allocation27_spill]] %s4755_s1  ;;  %27 = vst [vmem:[#allocation2] sm:$0x1] %v26_v0 }
   0x3   :  { %4782 = sst [smem:[#allocation28_spill]] %s4756_s2 }
   0x4   :  { %4783 = sst [smem:[#allocation29_spill]] %s4757_s3 }
   0x5   :  { %4784 = sst [smem:[#allocation30_spill]] %s4758_s4 }
   0x6   :  { %4785 = sst [smem:[#allocation31_spill]] %s4759_s5 }
   0x7   :  { %28 = vsyncpa [#allocation4], 0 }
   0x8   :  { %29 = vsyncpa [#allocation6], 0 }
   0x9   :  { %30 = vsyncpa [#allocation9], 0 }
   0xa   :  { %31 = vsyncpa [#allocation12], 0 }
   0xb   :  { %32 = vsyncpa [#allocation15], 0  ;;  %s4786_s3 = sld [smem:[#allocation29_spill]] }
  0x11   :  { %s55_s28 = sshll.u32 %s4786_s3, 4  ;;  %s56_s28 = int_to_ptr.hbm [resolvable:$true] %s55_s28 }
  0x12   :  { %33 = vsyncpa [#allocation18], 0  ;;  %s4141_s29 = smov [#allocation5]   ;;  %s4787_s5 = sld [smem:[#allocation31_spill]] }
  0x13   :  { %s57_s0 = sshll.u32 %s4141_s29, 4  ;;  %s4142_s20 = smov 192   ;;  %s58_s0 = int_to_ptr.vmem [resolvable:$true] %s57_s0 }
  0x14   :  { %s4143_s23 = smov 12   ;;  %s4144_s1 = smov [#allocation8]  }
  0x15   :  { %63 = dma.hbm_to_vmem [thread:$0]  %s56_s28, 6144, %s58_s0, [#allocation6], %s4142_s20, %s4142_s20, %s4143_s23  }
  0x16   :  { %s83_s24 = sshll.u32 %s4144_s1, 4  ;;  %s4776_s2 = smov 64   ;;  %s84_s24 = int_to_ptr.vmem [resolvable:$true] %s83_s24 }
  0x17   :  { %s4778_s25 = smov 4   ;;  %s107_s3 = sshll.u32 %s4761_s7, 4  ;;  %s108_s3 = int_to_ptr.hbm [resolvable:$true] %s107_s3 }
  0x18   :  { %s81_s22 = sshll.u32 %s4787_s5, 4  ;;  %s4147_s29 = smov [#allocation11]   ;;  %s82_s22 = int_to_ptr.hbm [resolvable:$true] %s81_s22 }
  0x19   :  { %89 = dma.hbm_to_vmem [thread:$0]  %s82_s22, 2048, %s84_s24, [#allocation9], %s4776_s2, %s4776_s2, %s4778_s25  }
  0x1a   :  { %s109_s4 = sshll.u32 %s4147_s29, 4  ;;  %s137_s0 = sshll.u32 %s4765_s11, 4  ;;  %s110_s4 = int_to_ptr.vmem [resolvable:$true] %s109_s4  ;;  %s138_s0 = int_to_ptr.hbm [resolvable:$true] %s137_s0 }
  0x1b   :  { %s4148_s5 = smov 256   ;;  %s4149_s20 = smov 16  }
  0x1c   :  { %115 = dma.hbm_to_vmem [thread:$0]  %s108_s3, 8192, %s110_s4, [#allocation12], %s4148_s5, %s4148_s5, %s4149_s20  }
  0x1d   :  { %s4150_s23 = smov [#allocation14]   ;;  %s163_s24 = sshll.u32 %s4767_s13, 4  ;;  %s164_s24 = int_to_ptr.hbm [resolvable:$true] %s163_s24 }
  0x1e   :  { %s139_s1 = sshll.u32 %s4150_s23, 4  ;;  %s4151_s26 = smov [#allocation17]   ;;  %s140_s1 = int_to_ptr.vmem [resolvable:$true] %s139_s1 }
  0x1f   :  { %145 = dma.hbm_to_vmem [thread:$0]  %s138_s0, 128, %s140_s1, [#allocation15], %s4776_s2, %s4776_s2, %s4778_s25  }
  0x20   :  { %s165_s27 = sshll.u32 %s4151_s26, 4  ;;  %s4788_s30 = sld [smem:[#allocation28_spill]]  ;;  %s166_s27 = int_to_ptr.vmem [resolvable:$true] %s165_s27 }
  0x21   :  { %s4152_s4 = smov 128   ;;  %s4153_s28 = smov 8  }
  0x22   :  { %171 = dma.hbm_to_vmem [thread:$0]  %s164_s24, 2048, %s166_s27, [#allocation18], %s4152_s4, %s4152_s4, %s4153_s28  }
  0x23   :  { %s4154_s0 = smov [#allocation3]   ;;  %s4789_s13 = sld [smem:[#allocation30_spill]] }
  0x24   :  { %s44_s5 = sshll.u32 %s4154_s0, 4  ;;  %s4155_s22 = smov [#allocation7]   ;;  %s45_s5 = int_to_ptr.vmem [resolvable:$true] %s44_s5 }
  0x25   :  { %s70_s26 = sshll.u32 %s4155_s22, 4  ;;  %s94_s24 = sshll.u32 %s4760_s6, 4  ;;  %s71_s26 = int_to_ptr.vmem [resolvable:$true] %s70_s26  ;;  %s95_s24 = int_to_ptr.hbm [resolvable:$true] %s94_s24 }
  0x26   :  { %s42_s3 = sshll.u32 %s4788_s30, 4  ;;  %s4156_s27 = smov 48   ;;  %s43_s3 = int_to_ptr.hbm [resolvable:$true] %s42_s3 }
  0x27   :  { %50 = dma.hbm_to_vmem [thread:$0]  %s43_s3, 1024, %s45_s5, [#allocation4], %s4152_s4, %s4152_s4, %s4153_s28  }
  0x28   :  { %s4157_s30 = smov 3   ;;  %s4158_s0 = smov [#allocation10]  }
  0x29   :  { %s68_s7 = sshll.u32 %s4789_s13, 4  ;;  %s96_s23 = sshll.u32 %s4158_s0, 4  ;;  %s69_s7 = int_to_ptr.hbm [resolvable:$true] %s68_s7  ;;  %s97_s23 = int_to_ptr.vmem [resolvable:$true] %s96_s23 }
  0x2a   :  { %76 = dma.hbm_to_vmem [thread:$0]  %s69_s7, 96, %s71_s26, [#allocation6], %s4156_s27, %s4156_s27, %s4157_s30  }
  0x2b   :  { %s122_s2 = sshll.u32 %s4763_s9, 4  ;;  %s4159_s25 = smov 1   ;;  %s123_s2 = int_to_ptr.hbm [resolvable:$true] %s122_s2 }
  0x2c   :  { %102 = dma.hbm_to_vmem [thread:$0]  %s95_s24, 32, %s97_s23, [#allocation9], %s4149_s20, %s4149_s20, %s4159_s25  }
  0x2d   :  { %s4160_s3 = smov [#allocation13]   ;;  %s150_s11 = sshll.u32 %s4766_s12, 4  ;;  %s151_s11 = int_to_ptr.hbm [resolvable:$true] %s150_s11 }
  0x2e   :  { %s124_s5 = sshll.u32 %s4160_s3, 4  ;;  %s4790_s7 = smov 4   ;;  %s125_s5 = int_to_ptr.vmem [resolvable:$true] %s124_s5 }
  0x2f   :  { %s4791_s26 = smov 64   ;;  %s180_s9 = sshll.u32 %s4770_s16, 4  ;;  %s181_s9 = int_to_ptr.hbm [resolvable:$true] %s180_s9 }
  0x30   :  { %130 = dma.hbm_to_vmem [thread:$0]  %s123_s2, 8192, %s125_s5, [#allocation12], %s4791_s26, %s4791_s26, %s4790_s7  }
  0x31   :  { %s4161_s30 = smov [#allocation16]   ;;  %s4162_s25 = smov [#allocation19]  }
  0x32   :  { %s152_s0 = sshll.u32 %s4161_s30, 4  ;;  %s182_s12 = sshll.u32 %s4162_s25, 4  ;;  %s153_s0 = int_to_ptr.vmem [resolvable:$true] %s152_s0  ;;  %s183_s12 = int_to_ptr.vmem [resolvable:$true] %s182_s12 }
  0x33   :  { %158 = dma.hbm_to_vmem [thread:$0]  %s151_s11, 2048, %s153_s0, [#allocation15], %s4152_s4, %s4152_s4, %s4153_s28  }
  0x34   :  { %188 = dma.hbm_to_vmem [thread:$0]  %s181_s9, 1024, %s183_s12, [#allocation18], %s4791_s26, %s4791_s26, %s4790_s7  }
  0x35   :  { %4129 = dma.done.wait [#allocation4], 1024  }
  0x36   :  { %4130 = vsyncadd [#allocation4], 4294966272 }
  0x37   :  { %4131 = dma.done.wait [#allocation6], 6240  }
  0x38   :  { %4132 = vsyncadd [#allocation6], 4294961056 }
  0x39   :  { %4133 = dma.done.wait [#allocation9], 2080  }
  0x3a   :  { %4134 = vsyncadd [#allocation9], 4294965216 }
  0x3b   :  { %4135 = dma.done.wait [#allocation12], 16384  }
  0x3c   :  { %4136 = vsyncadd [#allocation12], 4294950912 }
  0x3d   :  { %4137 = dma.done.wait [#allocation15], 2176  }
  0x3e   :  { %4138 = vsyncadd [#allocation15], 4294965120 }
  0x3f   :  { %4139 = dma.done.wait [#allocation18], 3072  }
  0x40   :  { %4140 = vsyncadd [#allocation18], 4294964224  ;;  %v4163_v1 = vmov 0   ;;  %v4164_v2 = vmov 2   ;;  %s4792_s20 = sld [smem:[#allocation26_spill]]  ;;  %v4165_v7 = vmov 1   ;;  %v275_v59 = vlaneseq }
  0x41   :  { %3792 = vset.pattern.permute.xlu0 %v4163_v1  ;;  %3794 = vset.pattern.permute.xlu1 %v4164_v2  ;;  %v4166_v8 = vmov 3   ;;  %v315_v9 = vld [vmem:[#allocation3 + $0x38] sm:$0xff]  ;;  %v314_v10 = vld [vmem:[#allocation3 + $0x30] sm:$0xff]  ;;  %v313_v11 = vld [vmem:[#allocation3 + $0x28] sm:$0xff]  ;;  %vm316_vm4 = vcmask 523264   ;;  %s4168_s4 = smov 96  }
  0x42   :  { %328 = vmatpush.msra.mxu0 %v315_v9  ;;  %v312_v12 = vld [vmem:[#allocation3 + $0x20] sm:$0xff]  ;;  %v311_v13 = vld [vmem:[#allocation3 + $0x18] sm:$0xff]  ;;  %v310_v14 = vld [vmem:[#allocation3 + $0x10] sm:$0xff]  ;;  %s4169_s28 = smov 32   ;;  %vm2577_vm14 = vcmask 1042432   ;;  %s4793_s29 = sld [smem:[#allocation27_spill]] }
  0x43   :  { %v309_v15 = vld [vmem:[#allocation3 + $0x8] sm:$0xff]  ;;  %v308_v16 = vld [vmem:[#allocation3] sm:$0xff]  ;;  %v3583_v18 = vld [vmem:[#allocation5 + $0xb0] sm:$0xf0]  ;;  %vm2573_vm15 = vcmask 23552  }
  0x44   :  { %329 = vmatpush.msra.mxu0 %v314_v10  ;;  %v2834_v17 = vld [vmem:[#allocation5 + $0xa8] sm:$0xf]  ;;  %v3582_v19 = vld [vmem:[#allocation5 + $0xac] sm:$0xf]  ;;  %v2836_v21 = vld [vmem:[#allocation5 + $0xb4] sm:$0xf0] }
  0x45   :  { %v2835_v20 = vor.u32 %v3583_v18, %v2834_v17  ;;  %v2842_v22 = vld [vmem:[#allocation5 + $0xb0] sm:$0xf]  ;;  %v3584_v23 = vld [vmem:[#allocation5 + $0xb8] sm:$0xf0]  ;;  %v2839_v24 = vor.u32 %v3582_v19, %v2836_v21  ;;  %v3579_v28 = vld [vmem:[#allocation5 + $0x94] sm:$0xf] }
  0x46   :  { %v274_v3 = vld [vmem:[%s4792_s20] sm:$0xff]  ;;  %330 = vmatpush.msra.mxu0 %v313_v11  ;;  %v2843_v25 = vor.u32 %v3584_v23, %v2842_v22  ;;  %v2822_v26 = vld [vmem:[#allocation5 + $0x90] sm:$0xf]  ;;  %v2830_v31 = vld [vmem:[#allocation5 + $0x98] sm:$0xf]  ;;  %v4167_v21 = vmov 0.0  }
  0x47   :  { %278 = vperm.xlu0 %3792, %v274_v3   ;;  %v292_v4 = vadd.s32 32, %v274_v3  ;;  %v284_v5 = vadd.s32 16, %v274_v3  ;;  %v300_v6 = vadd.s32 48, %v274_v3  ;;  %v3580_v27 = vld [vmem:[#allocation5 + $0x98] sm:$0xf0]  ;;  %510 = vmatpush.bf16.msra.mxu1 %v2835_v20 }
  0x48   :  { %331 = vmatpush.msra.mxu0 %v312_v12  ;;  %v2823_v29 = vor.u32 %v3580_v27, %v2822_v26  ;;  %v2824_v30 = vld [vmem:[#allocation5 + $0x9c] sm:$0xf0]  ;;  %v3581_v32 = vld [vmem:[#allocation5 + $0xa0] sm:$0xf0]  ;;  %523 = vmatpush.bf16.msra.mxu2 %v2839_v24  ;;  %v2810_v35 = vld [vmem:[#allocation5 + $0x78] sm:$0xf] }
  0x49   :  { %294 = vperm.xlu1 %3794, %v292_v4   ;;  %536 = vmatpush.bf16.msra.mxu3 %v2843_v25  ;;  %v2827_v33 = vor.u32 %v3579_v28, %v2824_v30  ;;  %v2831_v34 = vor.u32 %v3581_v32, %v2830_v31  ;;  %v3577_v36 = vld [vmem:[#allocation5 + $0x80] sm:$0xf0]  ;;  %v3576_v37 = vld [vmem:[#allocation5 + $0x7c] sm:$0xf]  ;;  %v2812_v38 = vld [vmem:[#allocation5 + $0x84] sm:$0xf0] }
  0x4a   :  { %332 = vmatpush.msra.mxu0 %v311_v13  ;;  %v2818_v39 = vld [vmem:[#allocation5 + $0x80] sm:$0xf]  ;;  %v3578_v40 = vld [vmem:[#allocation5 + $0x88] sm:$0xf0]  ;;  %v2811_v41 = vor.u32 %v3577_v36, %v2810_v35  ;;  %v2815_v42 = vor.u32 %v3576_v37, %v2812_v38  ;;  %v3573_v46 = vld [vmem:[#allocation5 + $0x64] sm:$0xf] }
  0x4b   :  { %511 = vmatpush.bf16.msra.mxu1 %v2823_v29  ;;  %v2819_v43 = vor.u32 %v3578_v40, %v2818_v39  ;;  %v2798_v44 = vld [vmem:[#allocation5 + $0x60] sm:$0xf]  ;;  %v3574_v45 = vld [vmem:[#allocation5 + $0x68] sm:$0xf0]  ;;  %v2800_v47 = vld [vmem:[#allocation5 + $0x6c] sm:$0xf0] }
  0x4c   :  { %333 = vmatpush.msra.mxu0 %v310_v14  ;;  %524 = vmatpush.bf16.msra.mxu2 %v2827_v33  ;;  %v2806_v48 = vld [vmem:[#allocation5 + $0x68] sm:$0xf]  ;;  %v3575_v49 = vld [vmem:[#allocation5 + $0x70] sm:$0xf0]  ;;  %v2799_v50 = vor.u32 %v3574_v45, %v2798_v44  ;;  %v2803_v51 = vor.u32 %v3573_v46, %v2800_v47  ;;  %v3570_v55 = vld [vmem:[#allocation5 + $0x4c] sm:$0xf] }
  0x4d   :  { %537 = vmatpush.bf16.msra.mxu3 %v2831_v34  ;;  %v2807_v52 = vor.u32 %v3575_v49, %v2806_v48  ;;  %v2786_v53 = vld [vmem:[#allocation5 + $0x48] sm:$0xf]  ;;  %v3571_v54 = vld [vmem:[#allocation5 + $0x50] sm:$0xf0]  ;;  %v2788_v56 = vld [vmem:[#allocation5 + $0x54] sm:$0xf0] }
  0x4e   :  { %334 = vmatpush.msra.mxu0 %v309_v15  ;;  %v2794_v57 = vld [vmem:[#allocation5 + $0x50] sm:$0xf]  ;;  %v3572_v58 = vld [vmem:[#allocation5 + $0x58] sm:$0xf0]  ;;  %v2787_v61 = vor.u32 %v3571_v54, %v2786_v53  ;;  %v2791_v63 = vor.u32 %v3570_v55, %v2788_v56  ;;  %v3567_v3 = vld [vmem:[#allocation5 + $0x34] sm:$0xf] }
  0x4f   :  { %3793 = vset.pattern.permute.xlu0 %v4165_v7  ;;  %512 = vmatpush.bf16.msra.mxu1 %v2811_v41  ;;  %v2795_v0 = vor.u32 %v3572_v58, %v2794_v57  ;;  %v2774_v1 = vld [vmem:[#allocation5 + $0x30] sm:$0xf]  ;;  %v3568_v2 = vld [vmem:[#allocation5 + $0x38] sm:$0xf0]  ;;  %v2776_v4 = vld [vmem:[#allocation5 + $0x3c] sm:$0xf0] }
  0x50   :  { %286 = vperm.xlu0 %3793, %v284_v5   ;;  %335 = vmatpush.msra.mxu0 %v308_v16  ;;  %v2782_v5 = vld [vmem:[#allocation5 + $0x38] sm:$0xf]  ;;  %v276_v7 = vand.u32 127, %v275_v59  ;;  %v2779_v10 = vor.u32 %v3567_v3, %v2776_v4  ;;  %v3565_v12 = vld [vmem:[#allocation5 + $0x20] sm:$0xf0]  ;;  %v4343_v39 = vld [vmem:[#allocation16 + $0x78] sm:$0xff] }
  0x51   :  { %3795 = vset.pattern.permute.xlu1 %v4166_v8  ;;  %525 = vmatpush.bf16.msra.mxu2 %v2815_v42  ;;  %v2762_v9 = vld [vmem:[#allocation5 + $0x18] sm:$0xf]  ;;  %v3564_v13 = vld [vmem:[#allocation5 + $0x1c] sm:$0xf]  ;;  %v2764_v14 = vld [vmem:[#allocation5 + $0x24] sm:$0xf0] }
  0x52   :  { %302 = vperm.xlu1 %3795, %v300_v6   ;;  %538 = vmatpush.bf16.msra.mxu3 %v2819_v43  ;;  %v3569_v6 = vld [vmem:[#allocation5 + $0x40] sm:$0xf0]  ;;  %v2770_v15 = vld [vmem:[#allocation5 + $0x20] sm:$0xf]  ;;  %v3566_v16 = vld [vmem:[#allocation5 + $0x28] sm:$0xf0]  ;;  %v2763_v18 = vor.u32 %v3565_v12, %v2762_v9  ;;  %v2767_v19 = vor.u32 %v3564_v13, %v2764_v14 }
  0x53   :  { %513 = vmatpush.bf16.msra.mxu1 %v2799_v50  ;;  %v2783_v11 = vor.u32 %v3569_v6, %v2782_v5  ;;  %v2771_v20 = vor.u32 %v3566_v16, %v2770_v15  ;;  %v2750_v30 = vld [vmem:[#allocation5] sm:$0xf]  ;;  %v3562_v31 = vld [vmem:[#allocation5 + $0x8] sm:$0xf0]  ;;  %v3561_v32 = vld [vmem:[#allocation5 + $0x4] sm:$0xf]  ;;  %551 = vmatpush.msrb.mxu0 %v4343_v39 }
  0x54   :  { %v2751_v33 = vor.u32 %v3562_v31, %v2750_v30  ;;  %v2752_v34 = vld [vmem:[#allocation5 + $0xc] sm:$0xf0]  ;;  %v2758_v35 = vld [vmem:[#allocation5 + $0x8] sm:$0xf]  ;;  %v3563_v36 = vld [vmem:[#allocation5 + $0x10] sm:$0xf0] }
  0x55   :  { %526 = vmatpush.bf16.msra.mxu2 %v2803_v51  ;;  %v2755_v37 = vor.u32 %v3561_v32, %v2752_v34  ;;  %v2759_v38 = vor.u32 %v3563_v36, %v2758_v35  ;;  %v4345_v40 = vld [vmem:[#allocation16 + $0x70] sm:$0xff]  ;;  %v4349_v41 = vld [vmem:[#allocation16 + $0x68] sm:$0xff]  ;;  %v4355_v42 = vld [vmem:[#allocation16 + $0x60] sm:$0xff] }
  0x56   :  { %539 = vmatpush.bf16.msra.mxu3 %v2807_v52  ;;  %552 = vmatpush.msrb.mxu0 %v4345_v40  ;;  %v4361_v43 = vld [vmem:[#allocation16 + $0x58] sm:$0xff]  ;;  %v4367_v44 = vld [vmem:[#allocation16 + $0x50] sm:$0xff]  ;;  %v4373_v45 = vld [vmem:[#allocation16 + $0x48] sm:$0xff] }
  0x57   :  { %514 = vmatpush.bf16.msra.mxu1 %v2787_v61  ;;  %v4379_v46 = vld [vmem:[#allocation16 + $0x40] sm:$0xff]  ;;  %v4385_v47 = vld [vmem:[#allocation16 + $0x38] sm:$0xff]  ;;  %v4391_v48 = vld [vmem:[#allocation16 + $0x30] sm:$0xff] }
  0x58   :  { %3796 = vset.pattern.permute.xlu0 %v4166_v8  ;;  %v2775_v8 = vor.u32 %v3568_v2, %v2774_v1  ;;  %553 = vmatpush.msrb.mxu0 %v4349_v41  ;;  %v4407_v51 = vld [vmem:[#allocation16 + $0x28] sm:$0xff]  ;;  %v4411_v52 = vld [vmem:[#allocation16 + $0x20] sm:$0xff]  ;;  %v4416_v53 = vld [vmem:[#allocation16 + $0x18] sm:$0xff] }
  0x59   :  { %527 = vmatpush.bf16.msra.mxu2 %v2791_v63  ;;  %v4423_v54 = vld [vmem:[#allocation16 + $0x10] sm:$0xff]  ;;  %v4429_v55 = vld [vmem:[#allocation16 + $0x8] sm:$0xff]  ;;  %v4435_v56 = vld [vmem:[#allocation16] sm:$0xff] }
  0x5a   :  { %540 = vmatpush.bf16.msra.mxu3 %v2795_v0  ;;  %554 = vmatpush.msrb.mxu0 %v4355_v42  ;;  %v374_v57 = vld [vmem:[#allocation7] sm:$0x7]  ;;  %v3591_v15 = vld [vmem:[#allocation8 + $0x30] sm:$0xff]  ;;  %v3590_v16 = vld [vmem:[#allocation8 + $0x28] sm:$0xff] }
  0x5b   :  { %515 = vmatpush.bf16.msra.mxu1 %v2775_v8  ;;  %v376_v58 = vperm.slane %v374_v57, 0  ;;  %v377_v61 = vperm.slane %v374_v57, 1  ;;  %v3592_v14 = vld [vmem:[#allocation8 + $0x38] sm:$0xff]  ;;  %v3585_v31 = vld [vmem:[#allocation8] sm:$0xff] }
  0x5c   :  { %555 = vmatpush.msrb.mxu0 %v4361_v43 }
  0x5d   :  { %528 = vmatpush.bf16.msra.mxu2 %v2779_v10 }
  0x5e   :  { %541 = vmatpush.bf16.msra.mxu3 %v2783_v11  ;;  %556 = vmatpush.msrb.mxu0 %v4367_v44 }
  0x5f   :  { %516 = vmatpush.bf16.msra.mxu1 %v2763_v18  ;;  %v3588_v18 = vld [vmem:[#allocation8 + $0x18] sm:$0xff] }
  0x60   :  { %557 = vmatpush.msrb.mxu0 %v4373_v45 }
  0x61   :  { %529 = vmatpush.bf16.msra.mxu2 %v2767_v19 }
  0x62   :  { %542 = vmatpush.bf16.msra.mxu3 %v2771_v20  ;;  %558 = vmatpush.msrb.mxu0 %v4379_v46 }
  0x63   :  { %517 = vmatpush.bf16.msra.mxu1 %v2751_v33 }
  0x64   :  { %559 = vmatpush.msrb.mxu0 %v4385_v47 }
  0x65   :  { %530 = vmatpush.bf16.msra.mxu2 %v2755_v37  ;;  %v4454_v37 = vld [vmem:[#allocation17 + $0x78] sm:$0xff] }
  0x66   :  { %543 = vmatpush.bf16.msra.mxu3 %v2759_v38  ;;  %560 = vmatpush.msrb.mxu0 %v4391_v48  ;;  %v4456_v38 = vld [vmem:[#allocation17 + $0x70] sm:$0xff] }
  0x67   :  { %574 = vmatpush.msrb.mxu1 %v4343_v39 }
  0x68   :  { %561 = vmatpush.msrb.mxu0 %v4407_v51 }
  0x69   :  { %597 = vmatpush.msrb.mxu2 %v4343_v39  ;;  %575 = vmatpush.msrb.mxu1 %v4345_v40 }
  0x6a   :  { %620 = vmatpush.msrb.mxu3 %v4343_v39  ;;  %562 = vmatpush.msrb.mxu0 %v4411_v52 }
  0x6b   :  { %598 = vmatpush.msrb.mxu2 %v4345_v40  ;;  %576 = vmatpush.msrb.mxu1 %v4349_v41 }
  0x6c   :  { %621 = vmatpush.msrb.mxu3 %v4345_v40  ;;  %563 = vmatpush.msrb.mxu0 %v4416_v53 }
  0x6d   :  { %599 = vmatpush.msrb.mxu2 %v4349_v41  ;;  %577 = vmatpush.msrb.mxu1 %v4355_v42 }
  0x6e   :  { %622 = vmatpush.msrb.mxu3 %v4349_v41  ;;  %564 = vmatpush.msrb.mxu0 %v4423_v54 }
  0x6f   :  { %600 = vmatpush.msrb.mxu2 %v4355_v42  ;;  %578 = vmatpush.msrb.mxu1 %v4361_v43 }
  0x70   :  { %623 = vmatpush.msrb.mxu3 %v4355_v42  ;;  %565 = vmatpush.msrb.mxu0 %v4429_v55 }
  0x71   :  { %601 = vmatpush.msrb.mxu2 %v4361_v43  ;;  %579 = vmatpush.msrb.mxu1 %v4367_v44 }
  0x72   :  { %624 = vmatpush.msrb.mxu3 %v4361_v43  ;;  %566 = vmatpush.msrb.mxu0 %v4435_v56 }
  0x73   :  { %602 = vmatpush.msrb.mxu2 %v4367_v44  ;;  %580 = vmatpush.msrb.mxu1 %v4373_v45 }
  0x74   :  { %625 = vmatpush.msrb.mxu3 %v4367_v44 }
  0x75   :  { %603 = vmatpush.msrb.mxu2 %v4373_v45  ;;  %581 = vmatpush.msrb.mxu1 %v4379_v46 }
  0x76   :  { %626 = vmatpush.msrb.mxu3 %v4373_v45 }
  0x77   :  { %604 = vmatpush.msrb.mxu2 %v4379_v46  ;;  %582 = vmatpush.msrb.mxu1 %v4385_v47 }
  0x78   :  { %627 = vmatpush.msrb.mxu3 %v4379_v46 }
  0x79   :  { %605 = vmatpush.msrb.mxu2 %v4385_v47  ;;  %583 = vmatpush.msrb.mxu1 %v4391_v48 }
  0x7a   :  { %628 = vmatpush.msrb.mxu3 %v4385_v47 }
  0x7b   :  { %606 = vmatpush.msrb.mxu2 %v4391_v48  ;;  %584 = vmatpush.msrb.mxu1 %v4407_v51 }
  0x7c   :  { %629 = vmatpush.msrb.mxu3 %v4391_v48 }
  0x7d   :  { %607 = vmatpush.msrb.mxu2 %v4407_v51  ;;  %585 = vmatpush.msrb.mxu1 %v4411_v52 }
  0x7e   :  { %630 = vmatpush.msrb.mxu3 %v4407_v51 }
  0x7f   :  { %608 = vmatpush.msrb.mxu2 %v4411_v52  ;;  %586 = vmatpush.msrb.mxu1 %v4416_v53 }
  0x80   :  { %631 = vmatpush.msrb.mxu3 %v4411_v52 }
  0x81   :  { %609 = vmatpush.msrb.mxu2 %v4416_v53  ;;  %587 = vmatpush.msrb.mxu1 %v4423_v54 }
  0x82   :  { %632 = vmatpush.msrb.mxu3 %v4416_v53 }
  0x83   :  { %610 = vmatpush.msrb.mxu2 %v4423_v54  ;;  %588 = vmatpush.msrb.mxu1 %v4429_v55 }
  0x84   :  { %633 = vmatpush.msrb.mxu3 %v4423_v54 }
  0x85   :  { %611 = vmatpush.msrb.mxu2 %v4429_v55  ;;  %589 = vmatpush.msrb.mxu1 %v4435_v56 }
  0x86   :  { %634 = vmatpush.msrb.mxu3 %v4429_v55 }
  0x87   :  { %612 = vmatpush.msrb.mxu2 %v4435_v56 }
  0x88   :  { %635 = vmatpush.msrb.mxu3 %v4435_v56 }
  0xb9   :  { %v279_v60 = vpop.permute.xlu0 %278 }
  0xba   :  { %vm280_vm0 = vcmp.eq.s32.totalorder %v276_v7, %v279_v60 }
  0xbb   :  { %v295_v62 = vpop.permute.xlu1 %294  ;;  %v2743_v22 = vsel %vm280_vm0, 1.0, %v4167_v21  ;;  %vm2635_vm0 = vcmask 261120  }
  0xbc   :  { %vm296_vm1 = vcmp.eq.s32.totalorder %v276_v7, %v295_v62  ;;  %v378_v62 = vperm.slane %v374_v57, 2  ;;  %v4464_v57 = vld [vmem:[#allocation17 + $0x60] sm:$0xff] }
  0xbd   :  { %v2745_v26 = vsel %vm296_vm1, 1.0, %v4167_v21 }
  0xc2   :  { %v287_v17 = vpop.permute.xlu0 %286 }
  0xc3   :  { %vm288_vm2 = vcmp.eq.s32.totalorder %v276_v7, %v287_v17  ;;  %v3589_v17 = vld [vmem:[#allocation8 + $0x20] sm:$0xff] }
  0xc4   :  { %v2744_v23 = vsel %vm288_vm2, 1.0, %v4167_v21  ;;  %v303_v24 = vpop.permute.xlu1 %302 }
  0xc5   :  { %v291_v25 = vadd.f32 %v2744_v23, %v2743_v22  ;;  %vm304_vm3 = vcmp.eq.s32.totalorder %v276_v7, %v303_v24  ;;  %v3587_v22 = vld [vmem:[#allocation8 + $0x10] sm:$0xff] }
  0xc6   :  { %v2746_v27 = vsel %vm304_vm3, 1.0, %v4167_v21 }
  0xc7   :  { %v299_v28 = vadd.f32 %v2745_v26, %v291_v25  ;;  %v3586_v25 = vld [vmem:[#allocation8 + $0x8] sm:$0xff] }
  0xc9   :  { %v307_v29 = vadd.f32 %v2746_v27, %v299_v28 }
  0xcb   :  { %2747 = vmatmul.msk.f32.vlgmr.msra.gmra.mxu0 %vm316_vm4, %v307_v29  ;;  %vm2731_vm4 = vcmask 7168  }
  0xcc   :  { %745 = vmatpush.bf16.msra.mxu0 %v3592_v14 }
  0xd0   :  { %746 = vmatpush.bf16.msra.mxu0 %v3591_v15 }
  0xd4   :  { %747 = vmatpush.bf16.msra.mxu0 %v3590_v16 }
  0xd8   :  { %748 = vmatpush.bf16.msra.mxu0 %v3589_v17 }
  0xdc   :  { %749 = vmatpush.bf16.msra.mxu0 %v3588_v18  ;;  %v4501_v18 = vld [vmem:[#allocation17 + $0x18] sm:$0xff] }
  0xe0   :  { %750 = vmatpush.bf16.msra.mxu0 %v3587_v22 }
  0xe4   :  { %751 = vmatpush.bf16.msra.mxu0 %v3586_v25 }
  0xe8   :  { %752 = vmatpush.bf16.msra.mxu0 %v3585_v31 }
 0x148   :  { %v4403_v49 = vpop.f32.mrf.mxu0 }
 0x149   :  { %v341_v50 = vpack.c.bf16 %v4403_v49, %v4403_v49 }
 0x14b   :  { %518 = vmatmul.bf16.vlgmr.msra.gmra.mxu1 %v341_v50  ;;  %531 = vmatmul.bf16.vlgmr.msra.gmra.mxu2 %v341_v50 }
 0x14c   :  { %544 = vmatmul.bf16.vlgmr.msra.gmra.mxu3 %v341_v50  ;;  %759 = vmatpush.msra.mxu1 %v4454_v37  ;;  %v4460_v50 = vld [vmem:[#allocation17 + $0x68] sm:$0xff] }
 0x14d   :  { %781 = vmatpush.msra.mxu2 %v4454_v37 }
 0x14e   :  { %760 = vmatpush.msra.mxu1 %v4456_v38 }
 0x14f   :  { %782 = vmatpush.msra.mxu2 %v4456_v38 }
 0x150   :  { %761 = vmatpush.msra.mxu1 %v4460_v50 }
 0x151   :  { %783 = vmatpush.msra.mxu2 %v4460_v50 }
 0x152   :  { %762 = vmatpush.msra.mxu1 %v4464_v57 }
 0x153   :  { %784 = vmatpush.msra.mxu2 %v4464_v57 }
 0x1c8   :  { %v519_v59 = vpop.f32.mrf.mxu1 }
 0x1c9   :  { %v520_v60 = vadd.f32 %v519_v59, %v376_v58 }
 0x1cb   :  { %v549_v0 = vmul.f32 0.35355338, %v520_v60  ;;  %v4468_v60 = vld [vmem:[#allocation17 + $0x58] sm:$0xff] }
 0x1cc   :  { %763 = vmatpush.msra.mxu1 %v4468_v60  ;;  %785 = vmatpush.msra.mxu2 %v4468_v60 }
 0x1ce   :  { %v532_v63 = vpop.f32.mrf.mxu2 }
 0x1cf   :  { %v533_v1 = vadd.f32 %v532_v63, %v377_v61  ;;  %v545_v2 = vpop.f32.mrf.mxu3  ;;  %v4472_v63 = vld [vmem:[#allocation17 + $0x50] sm:$0xff] }
 0x1d0   :  { %v4443_v3 = vadd.f32 %v545_v2, %v378_v62  ;;  %v521_v4 = vpop.f32.mrf.mxu1  ;;  %v4476_v2 = vld [vmem:[#allocation17 + $0x48] sm:$0xff]  ;;  %764 = vmatpush.msra.mxu1 %v4472_v63  ;;  %786 = vmatpush.msra.mxu2 %v4472_v63 }
 0x1d1   :  { %571 = vrot.lane.b32.xlu1 %v533_v1, %s4168_s4  ;;  %594 = vrot.lane.b32.xlu2 %v533_v1, %s4791_s26  ;;  %v550_v5 = vmul.f32 %v549_v0, %v533_v1 }
 0x1d2   :  { %666 = vrot.lane.b32.xlu0 %v4443_v3, %s4791_s26  ;;  %765 = vmatpush.msra.mxu1 %v4476_v2 }
 0x1d3   :  { %567 = vmatmul.f32.vlgmr.msrb.gmra.mxu0 %v550_v5  ;;  %v4480_v5 = vld [vmem:[#allocation17 + $0x40] sm:$0xff]  ;;  %787 = vmatpush.msra.mxu2 %v4476_v2 }
 0x1d4   :  { %766 = vmatpush.msra.mxu1 %v4480_v5 }
 0x1d5   :  { %788 = vmatpush.msra.mxu2 %v4480_v5 }
 0x1d6   :  { %v534_v6 = vpop.f32.mrf.mxu2 }
 0x1d7   :  { %v547_v7 = vpop.f32.mrf.mxu3  ;;  %v4484_v6 = vld [vmem:[#allocation17 + $0x38] sm:$0xff] }
 0x1d8   :  { %v4488_v7 = vld [vmem:[#allocation17 + $0x30] sm:$0xff]  ;;  %767 = vmatpush.msra.mxu1 %v4484_v6  ;;  %789 = vmatpush.msra.mxu2 %v4484_v6 }
 0x1d9   :  { %671 = vrot.lane.b32.xlu1 %v4443_v3, %s4169_s28  ;;  %617 = vrot.lane.b32.xlu2 %v533_v1, %s4169_s28 }
 0x1da   :  { %768 = vmatpush.msra.mxu1 %v4488_v7  ;;  %790 = vmatpush.msra.mxu2 %v4488_v7 }
 0x1e1   :  { %661 = vrot.lane.b32.xlu2 %v4443_v3, %s4168_s4 }
 0x22b   :  { %v595_v8 = vpop.permute.xlu2 %594 }
 0x22c   :  { %v596_v9 = vmul.f32 %v595_v8, %v549_v0  ;;  %v4492_v8 = vld [vmem:[#allocation17 + $0x28] sm:$0xff] }
 0x22d   :  { %769 = vmatpush.msra.mxu1 %v4492_v8  ;;  %791 = vmatpush.msra.mxu2 %v4492_v8 }
 0x22e   :  { %613 = vmatmul.f32.vlgmr.msrb.gmra.mxu2 %v596_v9 }
 0x233   :  { %v618_v10 = vpop.permute.xlu2 %617 }
 0x234   :  { %v619_v11 = vmul.f32 %v618_v10, %v549_v0 }
 0x236   :  { %636 = vmatmul.f32.vlgmr.msrb.gmra.mxu3 %v619_v11 }
 0x23b   :  { %v662_v14 = vpop.permute.xlu2 %661 }
 0x243   :  { %v572_v12 = vpop.permute.xlu1 %571 }
 0x244   :  { %v573_v13 = vmul.f32 %v572_v12, %v549_v0 }
 0x246   :  { %590 = vmatmul.f32.vlgmr.msrb.gmra.mxu1 %v573_v13  ;;  %v4496_v13 = vld [vmem:[#allocation17 + $0x20] sm:$0xff] }
 0x247   :  { %770 = vmatpush.msra.mxu1 %v4496_v13  ;;  %792 = vmatpush.msra.mxu2 %v4496_v13 }
 0x249   :  { %771 = vmatpush.msra.mxu1 %v4501_v18  ;;  %793 = vmatpush.msra.mxu2 %v4501_v18 }
 0x24b   :  { %v672_v22 = vpop.permute.xlu1 %671 }
 0x250   :  { %v568_v19 = vpop.f32.mrf.mxu0 }
 0x2b1   :  { %v614_v23 = vpop.f32.mrf.mxu2 }
 0x2b9   :  { %v637_v26 = vpop.f32.mrf.mxu3 }
 0x2c3   :  { %v591_v20 = vpop.f32.mrf.mxu1 }
 0x2c4   :  { %v640_v21 = vmax.f32 %v568_v19, %v591_v20 }
 0x2c6   :  { %v641_v24 = vmax.f32 %v640_v21, %v614_v23 }
 0x2c8   :  { %v642_v27 = vmax.f32 %v641_v24, %v637_v26 }
 0x2ca   :  { %v643_v28 = vsub.f32 %v568_v19, %v642_v27  ;;  %v646_v29 = vsub.f32 %v591_v20, %v642_v27  ;;  %v649_v30 = vsub.f32 %v614_v23, %v642_v27  ;;  %v652_v32 = vsub.f32 %v637_v26, %v642_v27  ;;  %v667_v19 = vpop.permute.xlu0 %666  ;;  %v4511_v27 = vld [vmem:[#allocation17 + $0x8] sm:$0xff] }
 0x2cc   :  { %v644_v33 = vmul.f32 1.442695, %v643_v28  ;;  %v647_v34 = vmul.f32 1.442695, %v646_v29  ;;  %v650_v35 = vmul.f32 1.442695, %v649_v30 }
 0x2cd   :  { %v653_v36 = vmul.f32 1.442695, %v652_v32  ;;  %v4513_v28 = vld [vmem:[#allocation17] sm:$0xff]  ;;  %v3797_v29 = vld [vmem:[#allocation10] ss:$0 sm:$0xff] }
 0x2ce   :  { %3805 = vpow2.f32 %v644_v33 }
 0x2cf   :  { %3807 = vpow2.f32 %v647_v34  ;;  %v2990_v34 = vld [vmem:[#allocation11 + $0xe0] sm:$0xf] }
 0x2d0   :  { %3809 = vpow2.f32 %v650_v35  ;;  %v3623_v35 = vld [vmem:[#allocation11 + $0xec] sm:$0xf0] }
 0x2d1   :  { %3811 = vpow2.f32 %v653_v36  ;;  %v3621_v36 = vld [vmem:[#allocation11 + $0xe4] sm:$0xf] }
 0x2d4   :  { %v3806_v58 = vpop.eup %3805 }
 0x2d5   :  { %v3808_v59 = vpop.eup %3807 }
 0x2d6   :  { %v655_v61 = vadd.f32 %v3808_v59, %v3806_v58  ;;  %v3810_v62 = vpop.eup %3809 }
 0x2d7   :  { %v3812_v1 = vpop.eup %3811 }
 0x2d8   :  { %v656_v0 = vadd.f32 %v3810_v62, %v655_v61  ;;  %v2998_v61 = vld [vmem:[#allocation11 + $0xe8] sm:$0xf] }
 0x2da   :  { %v657_v4 = vadd.f32 %v3812_v1, %v656_v0 }
 0x2dc   :  { %3813 = vrcp.f32 %v657_v4  ;;  %v3622_v4 = vld [vmem:[#allocation11 + $0xec] sm:$0xf] }
 0x2e2   :  { %v3814_v9 = vpop.eup %3813 }
 0x2e3   :  { %v663_v10 = vmul.f32 %v3814_v9, %v3808_v59  ;;  %v659_v11 = vmul.f32 %v3814_v9, %v3806_v58  ;;  %v668_v12 = vmul.f32 %v3814_v9, %v3810_v62  ;;  %v673_v17 = vmul.f32 %v3814_v9, %v3812_v1  ;;  %v2992_v59 = vld [vmem:[#allocation11 + $0xf0] sm:$0xf0]  ;;  %v3624_v62 = vld [vmem:[#allocation11 + $0xf4] sm:$0xf0]  ;;  %v3000_v9 = vld [vmem:[#allocation11 + $0xf8] sm:$0xf0] }
 0x2e4   :  { %v2991_v58 = vor.u32 %v3623_v35, %v2990_v34  ;;  %v2995_v0 = vor.u32 %v3621_v36, %v2992_v59  ;;  %v2999_v1 = vor.u32 %v3624_v62, %v2998_v61  ;;  %v2966_v34 = vld [vmem:[#allocation11 + $0xa8] sm:$0xf]  ;;  %v3616_v35 = vld [vmem:[#allocation11 + $0xb4] sm:$0xf0]  ;;  %v3614_v59 = vld [vmem:[#allocation11 + $0xac] sm:$0xf] }
 0x2e5   :  { %v664_v15 = vmul.f32 %v663_v10, %v662_v14  ;;  %v660_v16 = vmul.f32 %v659_v11, %v4443_v3  ;;  %v669_v21 = vmul.f32 %v668_v12, %v667_v19  ;;  %v674_v24 = vmul.f32 %v673_v17, %v672_v22  ;;  %v4507_v3 = vld [vmem:[#allocation17 + $0x10] sm:$0xff]  ;;  %v2974_v14 = vld [vmem:[#allocation11 + $0xc0] sm:$0xf]  ;;  %v2976_v19 = vld [vmem:[#allocation11 + $0xd0] sm:$0xf0] }
 0x2e6   :  { %772 = vmatpush.msra.mxu1 %v4507_v3  ;;  %794 = vmatpush.msra.mxu2 %v4507_v3  ;;  %v3003_v10 = vor.u32 %v3622_v4, %v3000_v9  ;;  %v2968_v61 = vld [vmem:[#allocation11 + $0xb8] sm:$0xf0]  ;;  %v3609_v4 = vld [vmem:[#allocation11 + $0x84] sm:$0xf] }
 0x2e7   :  { %v665_v20 = vadd.f32 %v664_v15, %v660_v16  ;;  %1019 = vmatpush.bf16.msra.mxu3 %v2991_v58  ;;  %1032 = vmatpush.bf16.msrb.mxu0 %v2995_v0  ;;  %v3619_v15 = vld [vmem:[#allocation11 + $0xcc] sm:$0xf0]  ;;  %v3617_v16 = vld [vmem:[#allocation11 + $0xc4] sm:$0xf]  ;;  %v2967_v58 = vor.u32 %v3616_v35, %v2966_v34  ;;  %v2971_v62 = vor.u32 %v3614_v59, %v2968_v61  ;;  %v2942_v0 = vld [vmem:[#allocation11 + $0x80] sm:$0xf] }
 0x2e8   :  { %773 = vmatpush.msra.mxu1 %v4511_v27  ;;  %795 = vmatpush.msra.mxu2 %v4511_v27  ;;  %v2975_v17 = vor.u32 %v3619_v15, %v2974_v14  ;;  %v2979_v22 = vor.u32 %v3617_v16, %v2976_v19  ;;  %v3610_v16 = vld [vmem:[#allocation11 + $0x8c] sm:$0xf]  ;;  %v2910_v34 = vld [vmem:[#allocation11 + $0x40] sm:$0xf]  ;;  %v3603_v35 = vld [vmem:[#allocation11 + $0x4c] sm:$0xf0] }
 0x2e9   :  { %v670_v23 = vadd.f32 %v669_v21, %v665_v20  ;;  %v2982_v20 = vld [vmem:[#allocation11 + $0xc8] sm:$0xf]  ;;  %v3620_v21 = vld [vmem:[#allocation11 + $0xd4] sm:$0xf0]  ;;  %v2912_v59 = vld [vmem:[#allocation11 + $0x50] sm:$0xf0] }
 0x2ea   :  { %774 = vmatpush.msra.mxu1 %v4513_v28  ;;  %796 = vmatpush.msra.mxu2 %v4513_v28  ;;  %v2918_v61 = vld [vmem:[#allocation11 + $0x48] sm:$0xf] }
 0x2eb   :  { %v675_v25 = vadd.f32 %v674_v24, %v670_v23  ;;  %v2983_v23 = vor.u32 %v3620_v21, %v2982_v20  ;;  %v3618_v24 = vld [vmem:[#allocation11 + $0xcc] sm:$0xf]  ;;  %1020 = vmatpush.bf16.msra.mxu3 %v2975_v17  ;;  %1033 = vmatpush.bf16.msrb.mxu0 %v2979_v22  ;;  %v2952_v17 = vld [vmem:[#allocation11 + $0x98] sm:$0xf0]  ;;  %v2926_v20 = vld [vmem:[#allocation11 + $0x60] sm:$0xf] }
 0x2ec   :  { %1045 = vmatpush.bf16.msrb.mxu1 %v2999_v1  ;;  %1058 = vmatpush.bf16.msrb.mxu2 %v3003_v10  ;;  %v3611_v1 = vld [vmem:[#allocation11 + $0x8c] sm:$0xf0]  ;;  %v2944_v10 = vld [vmem:[#allocation11 + $0x90] sm:$0xf0]  ;;  %v2955_v19 = vor.u32 %v3610_v16, %v2952_v17  ;;  %v3605_v22 = vld [vmem:[#allocation11 + $0x64] sm:$0xf] }
 0x2ed   :  { %v676_v26 = vpack.c.bf16 %v675_v25, %v675_v25  ;;  %v2984_v25 = vld [vmem:[#allocation11 + $0xd8] sm:$0xf0]  ;;  %v2943_v9 = vor.u32 %v3611_v1, %v2942_v0  ;;  %v2947_v14 = vor.u32 %v3609_v4, %v2944_v10  ;;  %v3607_v21 = vld [vmem:[#allocation11 + $0x6c] sm:$0xf0]  ;;  %v3602_v4 = vld [vmem:[#allocation11 + $0x4c] sm:$0xf] }
 0x2ee   :  { %v2896_v16 = vld [vmem:[#allocation11 + $0x30] sm:$0xf0]  ;;  %v2902_v17 = vld [vmem:[#allocation11 + $0x28] sm:$0xf] }
 0x2ef   :  { %753 = vmatmul.bf16.vlgmr.msra.gmra.mxu0 %v676_v26  ;;  %v2987_v26 = vor.u32 %v3618_v24, %v2984_v25  ;;  %v2928_v24 = vld [vmem:[#allocation11 + $0x70] sm:$0xf0]  ;;  %v2934_v25 = vld [vmem:[#allocation11 + $0x68] sm:$0xf] }
 0x2f0   :  { %1046 = vmatpush.bf16.msrb.mxu1 %v2983_v23  ;;  %v2927_v23 = vor.u32 %v3607_v21, %v2926_v20  ;;  %v3600_v20 = vld [vmem:[#allocation11 + $0x34] sm:$0xf0]  ;;  %v3598_v21 = vld [vmem:[#allocation11 + $0x2c] sm:$0xf] }
 0x2f1   :  { %1059 = vmatpush.bf16.msrb.mxu2 %v2987_v26  ;;  %v3608_v26 = vld [vmem:[#allocation11 + $0x74] sm:$0xf0] }
 0x2f4   :  { %1047 = vmatpush.bf16.msrb.mxu1 %v2967_v58  ;;  %v2911_v58 = vor.u32 %v3603_v35, %v2910_v34 }
 0x2f5   :  { %1060 = vmatpush.bf16.msrb.mxu2 %v2971_v62  ;;  %v3604_v62 = vld [vmem:[#allocation11 + $0x54] sm:$0xf0] }
 0x2f6   :  { %v2919_v1 = vor.u32 %v3604_v62, %v2918_v61  ;;  %v3640_v61 = vld [vmem:[#allocation13 + $0x78] sm:$0xff] }
 0x2f7   :  { %v3648_v62 = vld [vmem:[#allocation13 + $0xb8] sm:$0xff] }
 0x2f9   :  { %1061 = vmatpush.bf16.msrb.mxu2 %v2955_v19 }
 0x36c   :  { %v754_v30 = vpop.f32.mrf.mxu0 }
 0x36d   :  { %v755_v31 = vadd.f32 %v3797_v29, %v754_v30  ;;  %v2958_v29 = vld [vmem:[#allocation11 + $0xa0] sm:$0xf]  ;;  %v3615_v30 = vld [vmem:[#allocation11 + $0xac] sm:$0xf0] }
 0x36f   :  { %v758_v32 = vadd.f32 %v755_v31, %v4403_v49  ;;  %v3613_v31 = vld [vmem:[#allocation11 + $0xa4] sm:$0xf] }
 0x371   :  { %775 = vmatmul.f32.vlgmr.msra.gmra.mxu1 %v758_v32 }
 0x374   :  { %v756_v33 = vpop.f32.mrf.mxu0 }
 0x375   :  { %v2960_v33 = vld [vmem:[#allocation11 + $0xb0] sm:$0xf0] }
 0x376   :  { %v2963_v36 = vor.u32 %v3613_v31, %v2960_v33  ;;  %v3606_v31 = vld [vmem:[#allocation11 + $0x6c] sm:$0xf] }
 0x378   :  { %1034 = vmatpush.bf16.msrb.mxu0 %v2963_v36  ;;  %v3601_v36 = vld [vmem:[#allocation11 + $0x44] sm:$0xf] }
 0x379   :  { %v2915_v0 = vor.u32 %v3601_v36, %v2912_v59  ;;  %v3594_v36 = vld [vmem:[#allocation11 + $0xc] sm:$0xf] }
 0x37c   :  { %1035 = vmatpush.bf16.msrb.mxu0 %v2947_v14 }
 0x3ee   :  { %v776_v11 = vpop.f32.mrf.mxu1 }
 0x3ef   :  { %v4520_v49 = vsub.f32 %v758_v32, %v776_v11  ;;  %v2959_v32 = vor.u32 %v3615_v30, %v2958_v29  ;;  %v2950_v11 = vld [vmem:[#allocation11 + $0x88] sm:$0xf]  ;;  %v2931_v29 = vor.u32 %v3605_v22, %v2928_v24  ;;  %v2935_v30 = vor.u32 %v3608_v26, %v2934_v25  ;;  %v2904_v22 = vld [vmem:[#allocation11 + $0x38] sm:$0xf0]  ;;  %v2878_v25 = vld [vmem:[#allocation11] sm:$0xf] }
 0x3f0   :  { %v2907_v24 = vor.u32 %v3598_v21, %v2904_v22  ;;  %v3595_v26 = vld [vmem:[#allocation11 + $0xc] sm:$0xf0]  ;;  %v3645_v21 = vld [vmem:[#allocation13 + $0xa0] sm:$0xff] }
 0x3f1   :  { %v780_v12 = vmul.f32 %v4520_v49, %v4520_v49  ;;  %1021 = vmatpush.bf16.msra.mxu3 %v2959_v32  ;;  %v2936_v32 = vld [vmem:[#allocation11 + $0x78] sm:$0xf0]  ;;  %1036 = vmatpush.bf16.msrb.mxu0 %v2931_v29  ;;  %v3593_v29 = vld [vmem:[#allocation11 + $0x4] sm:$0xf] }
 0x3f2   :  { %v2939_v33 = vor.u32 %v3606_v31, %v2936_v32  ;;  %v2880_v31 = vld [vmem:[#allocation11 + $0x10] sm:$0xf0]  ;;  %v2886_v32 = vld [vmem:[#allocation11 + $0x8] sm:$0xf] }
 0x3f3   :  { %797 = vmatmul.f32.vlgmr.msra.gmra.mxu2 %v780_v12  ;;  %v3612_v12 = vld [vmem:[#allocation11 + $0x94] sm:$0xf0]  ;;  %v2883_v34 = vor.u32 %v3593_v29, %v2880_v31 }
 0x3f4   :  { %v2951_v15 = vor.u32 %v3612_v12, %v2950_v11  ;;  %1062 = vmatpush.bf16.msrb.mxu2 %v2939_v33  ;;  %v2894_v11 = vld [vmem:[#allocation11 + $0x20] sm:$0xf]  ;;  %v3599_v12 = vld [vmem:[#allocation11 + $0x2c] sm:$0xf0]  ;;  %v3596_v33 = vld [vmem:[#allocation11 + $0x14] sm:$0xf0] }
 0x3f5   :  { %1022 = vmatpush.bf16.msra.mxu3 %v2943_v9  ;;  %v2920_v9 = vld [vmem:[#allocation11 + $0x58] sm:$0xf0]  ;;  %1037 = vmatpush.bf16.msrb.mxu0 %v2915_v0  ;;  %v2895_v14 = vor.u32 %v3599_v12, %v2894_v11  ;;  %v2887_v35 = vor.u32 %v3596_v33, %v2886_v32  ;;  %v3631_v12 = vld [vmem:[#allocation13 + $0x30] sm:$0xff] }
 0x3f6   :  { %1048 = vmatpush.bf16.msrb.mxu1 %v2951_v15  ;;  %v2923_v10 = vor.u32 %v3602_v4, %v2920_v9  ;;  %v3597_v15 = vld [vmem:[#allocation11 + $0x24] sm:$0xf]  ;;  %v3632_v0 = vld [vmem:[#allocation13 + $0x38] sm:$0xff]  ;;  %v3639_v9 = vld [vmem:[#allocation13 + $0x70] sm:$0xff] }
 0x3f7   :  { %v2899_v19 = vor.u32 %v3597_v15, %v2896_v16  ;;  %v3638_v15 = vld [vmem:[#allocation13 + $0x68] sm:$0xff]  ;;  %v3636_v29 = vld [vmem:[#allocation13 + $0x58] sm:$0xff] }
 0x3f8   :  { %1063 = vmatpush.bf16.msrb.mxu2 %v2923_v10  ;;  %v3647_v10 = vld [vmem:[#allocation13 + $0xb0] sm:$0xff]  ;;  %v3646_v16 = vld [vmem:[#allocation13 + $0xa8] sm:$0xff]  ;;  %v3628_v31 = vld [vmem:[#allocation13 + $0x18] sm:$0xff] }
 0x3f9   :  { %1023 = vmatpush.bf16.msra.mxu3 %v2927_v23  ;;  %v2903_v23 = vor.u32 %v3600_v20, %v2902_v17  ;;  %1038 = vmatpush.bf16.msrb.mxu0 %v2899_v19  ;;  %v3630_v17 = vld [vmem:[#allocation13 + $0x28] sm:$0xff]  ;;  %v3637_v20 = vld [vmem:[#allocation13 + $0x60] sm:$0xff]  ;;  %v3652_v32 = vld [vmem:[#allocation13 + $0xd8] sm:$0xff] }
 0x3fa   :  { %1049 = vmatpush.bf16.msrb.mxu1 %v2935_v30  ;;  %v2879_v30 = vor.u32 %v3595_v26, %v2878_v25  ;;  %v3654_v19 = vld [vmem:[#allocation13 + $0xe8] sm:$0xff] }
 0x3fc   :  { %1064 = vmatpush.bf16.msrb.mxu2 %v2907_v24  ;;  %v3653_v24 = vld [vmem:[#allocation13 + $0xe0] sm:$0xff] }
 0x3fd   :  { %1024 = vmatpush.bf16.msra.mxu3 %v2911_v58  ;;  %v2888_v58 = vld [vmem:[#allocation11 + $0x18] sm:$0xf0]  ;;  %1039 = vmatpush.bf16.msrb.mxu0 %v2883_v34  ;;  %v4524_v34 = vld [vmem:[#allocation14] sm:$0xf] }
 0x3fe   :  { %1050 = vmatpush.bf16.msrb.mxu1 %v2919_v1  ;;  %v2891_v59 = vor.u32 %v3594_v36, %v2888_v58  ;;  %v3656_v1 = vld [vmem:[#allocation13 + $0xf8] sm:$0xff]  ;;  %v3635_v36 = vld [vmem:[#allocation13 + $0x50] sm:$0xff] }
 0x3ff   :  { %v3643_v58 = vld [vmem:[#allocation13 + $0x90] sm:$0xff] }
 0x400   :  { %1065 = vmatpush.bf16.msrb.mxu2 %v2891_v59 }
 0x401   :  { %1025 = vmatpush.bf16.msra.mxu3 %v2895_v14  ;;  %1352 = vmatpush.bf16.msra.mxu0 %v3640_v61  ;;  %v3655_v14 = vld [vmem:[#allocation13 + $0xf0] sm:$0xff]  ;;  %v812_v61 = vperm.slane %v4524_v34, 0 }
 0x402   :  { %1051 = vmatpush.bf16.msrb.mxu1 %v2903_v23  ;;  %v3629_v23 = vld [vmem:[#allocation13 + $0x20] sm:$0xff] }
 0x404   :  { %1378 = vmatpush.bf16.msra.mxu2 %v3656_v1  ;;  %v814_v1 = vperm.slane %v4524_v34, 1 }
 0x405   :  { %1026 = vmatpush.bf16.msra.mxu3 %v2879_v30  ;;  %1353 = vmatpush.bf16.msra.mxu0 %v3639_v9  ;;  %v3644_v30 = vld [vmem:[#allocation13 + $0x98] sm:$0xff] }
 0x406   :  { %1052 = vmatpush.bf16.msrb.mxu1 %v2887_v35 }
 0x408   :  { %1379 = vmatpush.bf16.msra.mxu2 %v3655_v14  ;;  %v3627_v14 = vld [vmem:[#allocation13 + $0x10] sm:$0xff] }
 0x409   :  { %1339 = vmatpush.bf16.msrb.mxu3 %v3632_v0  ;;  %1354 = vmatpush.bf16.msra.mxu0 %v3638_v15  ;;  %v3651_v15 = vld [vmem:[#allocation13 + $0xd0] sm:$0xff] }
 0x40a   :  { %1365 = vmatpush.bf16.msra.mxu1 %v3648_v62 }
 0x40c   :  { %1380 = vmatpush.bf16.msra.mxu2 %v3654_v19  ;;  %v3650_v19 = vld [vmem:[#allocation13 + $0xc8] sm:$0xff] }
 0x40d   :  { %1340 = vmatpush.bf16.msrb.mxu3 %v3631_v12  ;;  %1355 = vmatpush.bf16.msra.mxu0 %v3637_v20  ;;  %v3642_v12 = vld [vmem:[#allocation13 + $0x88] sm:$0xff]  ;;  %v3625_v20 = vld [vmem:[#allocation13] sm:$0xff] }
 0x40e   :  { %1366 = vmatpush.bf16.msra.mxu1 %v3647_v10 }
 0x410   :  { %1381 = vmatpush.bf16.msra.mxu2 %v3653_v24 }
 0x411   :  { %1341 = vmatpush.bf16.msrb.mxu3 %v3630_v17  ;;  %1356 = vmatpush.bf16.msra.mxu0 %v3636_v29  ;;  %v3626_v17 = vld [vmem:[#allocation13 + $0x8] sm:$0xff] }
 0x412   :  { %1367 = vmatpush.bf16.msra.mxu1 %v3646_v16  ;;  %v3641_v16 = vld [vmem:[#allocation13 + $0x80] sm:$0xff] }
 0x414   :  { %1382 = vmatpush.bf16.msra.mxu2 %v3652_v32 }
 0x415   :  { %1342 = vmatpush.bf16.msrb.mxu3 %v3629_v23  ;;  %1357 = vmatpush.bf16.msra.mxu0 %v3635_v36  ;;  %v3220_v36 = vld [vmem:[#allocation5 + $0x174] sm:$0xf0] }
 0x416   :  { %1368 = vmatpush.bf16.msra.mxu1 %v3645_v21  ;;  %v3649_v21 = vld [vmem:[#allocation13 + $0xc0] sm:$0xff] }
 0x418   :  { %1383 = vmatpush.bf16.msra.mxu2 %v3651_v15  ;;  %v3214_v15 = vld [vmem:[#allocation5 + $0x158] sm:$0xf] }
 0x419   :  { %1343 = vmatpush.bf16.msrb.mxu3 %v3628_v31 }
 0x41a   :  { %1369 = vmatpush.bf16.msra.mxu1 %v3644_v30 }
 0x41c   :  { %1384 = vmatpush.bf16.msra.mxu2 %v3650_v19  ;;  %v3194_v19 = vld [vmem:[#allocation5 + $0x138] sm:$0xf] }
 0x41d   :  { %1344 = vmatpush.bf16.msrb.mxu3 %v3627_v14  ;;  %v3208_v14 = vld [vmem:[#allocation5 + $0x15c] sm:$0xf0] }
 0x41e   :  { %1370 = vmatpush.bf16.msra.mxu1 %v3643_v58  ;;  %v3226_v58 = vld [vmem:[#allocation5 + $0x170] sm:$0xf] }
 0x420   :  { %1385 = vmatpush.bf16.msra.mxu2 %v3649_v21  ;;  %v3672_v21 = vld [vmem:[#allocation5 + $0x13c] sm:$0xf] }
 0x421   :  { %1345 = vmatpush.bf16.msrb.mxu3 %v3626_v17 }
 0x422   :  { %1371 = vmatpush.bf16.msra.mxu1 %v3642_v12 }
 0x425   :  { %1346 = vmatpush.bf16.msrb.mxu3 %v3625_v20  ;;  %v3673_v20 = vld [vmem:[#allocation5 + $0x140] sm:$0xf0] }
 0x426   :  { %1372 = vmatpush.bf16.msra.mxu1 %v3641_v16 }
 0x476   :  { %v798_v4 = vpop.f32.mrf.mxu2 }
 0x477   :  { %v799_v11 = vadd.f32 1e-05, %v798_v4 }
 0x479   :  { %3815 = vrsqrt.f32 %v799_v11  ;;  %vm807_vm6 = vweird.f32 %v799_v11 }
 0x47f   :  { %v3816_v22 = vpop.eup %3815 }
 0x480   :  { %v802_v25 = vmul.f32 %v3816_v22, %v799_v11  ;;  %vm808_vm5 = vweird.f32 %v3816_v22  ;;  %v3634_v11 = vld [vmem:[#allocation13 + $0x48] sm:$0xff] }
 0x481   :  { %vm809_vm7 = vmor %vm807_vm6, %vm808_vm5  ;;  %1358 = vmatpush.bf16.msra.mxu0 %v3634_v11  ;;  %v3675_v11 = vld [vmem:[#allocation5 + $0x154] sm:$0xf] }
 0x482   :  { %v803_v26 = vmul.f32 %v3816_v22, %v802_v25  ;;  %v3211_v16 = vor.u32 %v3675_v11, %v3208_v14  ;;  %v3834_v11 = vld [vmem:[#allocation16 + $0x70] sm:$0xff] }
 0x484   :  { %v804_v33 = vmul.f32 0.5, %v803_v26 }
 0x486   :  { %v805_v35 = vsub.f32 1.5, %v804_v33 }
 0x488   :  { %v806_v59 = vmul.f32 %v3816_v22, %v805_v35 }
 0x48a   :  { %v810_v62 = vsel %vm809_vm7, %v3816_v22, %v806_v59  ;;  %v3680_v59 = vld [vmem:[#allocation5 + $0x178] sm:$0xf0] }
 0x48b   :  { %v811_v0 = vmul.f32 %v810_v62, %v4520_v49  ;;  %v3633_v49 = vld [vmem:[#allocation13 + $0x40] sm:$0xff]  ;;  %v3227_v62 = vor.u32 %v3680_v59, %v3226_v58  ;;  %v3657_v59 = vld [vmem:[#allocation5 + $0xc4] sm:$0xf] }
 0x48c   :  { %1359 = vmatpush.bf16.msra.mxu0 %v3633_v49  ;;  %v3677_v49 = vld [vmem:[#allocation5 + $0x160] sm:$0xf0] }
 0x48d   :  { %v813_v4 = vmul.f32 %v812_v61, %v811_v0  ;;  %v3215_v17 = vor.u32 %v3677_v49, %v3214_v15  ;;  %v3835_v15 = vld [vmem:[#allocation16 + $0x68] sm:$0xff]  ;;  %v3836_v49 = vld [vmem:[#allocation16 + $0x60] sm:$0xff] }
 0x48f   :  { %v4529_v9 = vadd.f32 %v814_v1, %v813_v4 }
 0x491   :  { %v816_v10 = vpack.c.bf16 %v4529_v9, %v4529_v9 }
 0x493   :  { %1027 = vmatmul.bf16.vlgmr.msra.gmra.mxu3 %v816_v10  ;;  %1040 = vmatmul.bf16.vlgmr.msrb.gmra.mxu0 %v816_v10 }
 0x494   :  { %1053 = vmatmul.bf16.vlgmr.msrb.gmra.mxu1 %v816_v10  ;;  %1066 = vmatmul.bf16.vlgmr.msrb.gmra.mxu2 %v816_v10  ;;  %v3676_v10 = vld [vmem:[#allocation5 + $0x158] sm:$0xf0] }
 0x495   :  { %1414 = vmatpush.msrb.mxu0 %v4454_v37  ;;  %1392 = vmatpush.msra.mxu3 %v4454_v37  ;;  %v849_v37 = vld [vmem:[%s4762_s8] sm:$0xf] }
 0x496   :  { %v851_v22 = vperm.slane %v849_v37, 0  ;;  %v854_v23 = vperm.slane %v849_v37, 3 }
 0x497   :  { %1415 = vmatpush.msrb.mxu0 %v4456_v38  ;;  %1393 = vmatpush.msra.mxu3 %v4456_v38  ;;  %v852_v38 = vperm.slane %v849_v37, 1 }
 0x499   :  { %1416 = vmatpush.msrb.mxu0 %v4460_v50  ;;  %1394 = vmatpush.msra.mxu3 %v4460_v50  ;;  %v853_v50 = vperm.slane %v849_v37, 2  ;;  %v3195_v37 = vor.u32 %v3673_v20, %v3194_v19  ;;  %v3839_v20 = vld [vmem:[#allocation16 + $0x48] sm:$0xff] }
 0x49b   :  { %1417 = vmatpush.msrb.mxu0 %v4464_v57  ;;  %1395 = vmatpush.msra.mxu3 %v4464_v57 }
 0x49d   :  { %1418 = vmatpush.msrb.mxu0 %v4468_v60  ;;  %1396 = vmatpush.msra.mxu3 %v4468_v60 }
 0x49f   :  { %1419 = vmatpush.msrb.mxu0 %v4472_v63  ;;  %1397 = vmatpush.msra.mxu3 %v4472_v63 }
 0x4a1   :  { %1420 = vmatpush.msrb.mxu0 %v4476_v2  ;;  %1398 = vmatpush.msra.mxu3 %v4476_v2 }
 0x4a3   :  { %1421 = vmatpush.msrb.mxu0 %v4480_v5  ;;  %1399 = vmatpush.msra.mxu3 %v4480_v5 }
 0x4a5   :  { %1422 = vmatpush.msrb.mxu0 %v4484_v6  ;;  %1400 = vmatpush.msra.mxu3 %v4484_v6 }
 0x4a7   :  { %1423 = vmatpush.msrb.mxu0 %v4488_v7  ;;  %1401 = vmatpush.msra.mxu3 %v4488_v7 }
 0x4a9   :  { %1424 = vmatpush.msrb.mxu0 %v4492_v8  ;;  %1402 = vmatpush.msra.mxu3 %v4492_v8 }
 0x4ab   :  { %1425 = vmatpush.msrb.mxu0 %v4496_v13  ;;  %1403 = vmatpush.msra.mxu3 %v4496_v13 }
 0x4ad   :  { %1426 = vmatpush.msrb.mxu0 %v4501_v18  ;;  %1404 = vmatpush.msra.mxu3 %v4501_v18 }
 0x4af   :  { %1427 = vmatpush.msrb.mxu0 %v4507_v3  ;;  %1405 = vmatpush.msra.mxu3 %v4507_v3 }
 0x4b1   :  { %1428 = vmatpush.msrb.mxu0 %v4511_v27  ;;  %1406 = vmatpush.msra.mxu3 %v4511_v27  ;;  %v3678_v27 = vld [vmem:[#allocation5 + $0x16c] sm:$0xf] }
 0x4b2   :  { %v3223_v61 = vor.u32 %v3678_v27, %v3220_v36  ;;  %v3134_v27 = vld [vmem:[#allocation5 + $0xc0] sm:$0xf] }
 0x4b3   :  { %1429 = vmatpush.msrb.mxu0 %v4513_v28  ;;  %1407 = vmatpush.msra.mxu3 %v4513_v28 }
 0x4b4   :  { %1635 = vmatpush.bf16.msrb.mxu2 %v3223_v61  ;;  %v3136_v61 = vld [vmem:[#allocation5 + $0xcc] sm:$0xf0] }
 0x4b8   :  { %1636 = vmatpush.bf16.msrb.mxu2 %v3211_v16  ;;  %v3837_v16 = vld [vmem:[#allocation16 + $0x58] sm:$0xff] }
 0x510   :  { %v1041_v57 = vpop.f32.mrf.mxu0 }
 0x511   :  { %v1042_v60 = vadd.f32 %v1041_v57, %v852_v38  ;;  %v1054_v63 = vpop.f32.mrf.mxu1  ;;  %v3196_v38 = vld [vmem:[#allocation5 + $0x144] sm:$0xf0]  ;;  %v3674_v57 = vld [vmem:[#allocation5 + $0x148] sm:$0xf0] }
 0x512   :  { %v1055_v2 = vadd.f32 %v1054_v63, %v853_v50  ;;  %v3202_v50 = vld [vmem:[#allocation5 + $0x140] sm:$0xf] }
 0x513   :  { %v1072_v5 = vmax.f32 %v1042_v60, 0.0  ;;  %v3199_v60 = vor.u32 %v3672_v21, %v3196_v38  ;;  %v3203_v63 = vor.u32 %v3674_v57, %v3202_v50  ;;  %v3841_v50 = vld [vmem:[#allocation16 + $0x38] sm:$0xff] }
 0x514   :  { %v1073_v6 = vmax.f32 %v1055_v2, 0.0  ;;  %v3182_v2 = vld [vmem:[#allocation5 + $0x120] sm:$0xf] }
 0x515   :  { %v1076_v24 = vpack.c.bf16 %v1072_v5, %v1072_v5  ;;  %1637 = vmatpush.bf16.msrb.mxu2 %v3199_v60  ;;  %v3670_v5 = vld [vmem:[#allocation5 + $0x128] sm:$0xf0]  ;;  %v3842_v60 = vld [vmem:[#allocation16 + $0x30] sm:$0xff] }
 0x516   :  { %v1077_v7 = vpack.c.bf16 %v1073_v6, %v1073_v6  ;;  %v1028_v25 = vpop.f32.mrf.mxu3  ;;  %v3183_v6 = vor.u32 %v3670_v5, %v3182_v2  ;;  %v3843_v2 = vld [vmem:[#allocation16 + $0x28] sm:$0xff] }
 0x517   :  { %v1029_v26 = vadd.f32 %v1028_v25, %v851_v22  ;;  %v1067_v8 = vpop.f32.mrf.mxu2  ;;  %1360 = vmatmul.bf16.vlgmr.msra.gmra.mxu0 %v1076_v24  ;;  %v3669_v22 = vld [vmem:[#allocation5 + $0x124] sm:$0xf]  ;;  %v3190_v24 = vld [vmem:[#allocation5 + $0x128] sm:$0xf] }
 0x518   :  { %v1068_v29 = vadd.f32 %v1067_v8, %v854_v23  ;;  %1373 = vmatmul.bf16.vlgmr.msra.gmra.mxu1 %v1077_v7  ;;  %v1043_v30 = vpop.f32.mrf.mxu0  ;;  %1663 = vmatpush.msra.mxu0 %v4343_v39  ;;  %v3184_v23 = vld [vmem:[#allocation5 + $0x12c] sm:$0xf0]  ;;  %v3671_v7 = vld [vmem:[#allocation5 + $0x130] sm:$0xf0]  ;;  %v3170_v8 = vld [vmem:[#allocation5 + $0x108] sm:$0xf] }
 0x519   :  { %v1071_v13 = vmax.f32 %v1029_v26, 0.0  ;;  %v1056_v31 = vpop.f32.mrf.mxu1  ;;  %v3187_v25 = vor.u32 %v3669_v22, %v3184_v23  ;;  %v3191_v26 = vor.u32 %v3671_v7, %v3190_v24  ;;  %v3666_v30 = vld [vmem:[#allocation5 + $0x10c] sm:$0xf]  ;;  %v1445_v22 = vperm.slane %v4524_v34, 2 }
 0x51a   :  { %v1074_v32 = vmax.f32 %v1068_v29, 0.0  ;;  %1664 = vmatpush.msra.mxu0 %v4345_v40  ;;  %v3667_v29 = vld [vmem:[#allocation5 + $0x110] sm:$0xf0]  ;;  %v3172_v31 = vld [vmem:[#allocation5 + $0x114] sm:$0xf0]  ;;  %v1447_v7 = vperm.slane %v4524_v34, 3 }
 0x51b   :  { %v1075_v18 = vpack.c.bf16 %v1071_v13, %v1071_v13  ;;  %1638 = vmatpush.bf16.msrb.mxu2 %v3187_v25  ;;  %v3171_v13 = vor.u32 %v3667_v29, %v3170_v8  ;;  %v3845_v25 = vld [vmem:[#allocation16 + $0x18] sm:$0xff]  ;;  %v3846_v8 = vld [vmem:[#allocation16 + $0x10] sm:$0xff]  ;;  %v3848_v34 = vld [vmem:[#allocation16] sm:$0xff] }
 0x51c   :  { %v1078_v33 = vpack.c.bf16 %v1074_v32, %v1074_v32  ;;  %1665 = vmatpush.msra.mxu0 %v4349_v41  ;;  %v3178_v32 = vld [vmem:[#allocation5 + $0x110] sm:$0xf] }
 0x51d   :  { %1347 = vmatmul.bf16.vlgmr.msrb.gmra.mxu3 %v1075_v18  ;;  %v3668_v18 = vld [vmem:[#allocation5 + $0x118] sm:$0xf0] }
 0x51e   :  { %1386 = vmatmul.bf16.vlgmr.msra.gmra.mxu2 %v1078_v33  ;;  %v1030_v3 = vpop.f32.mrf.mxu3  ;;  %1666 = vmatpush.msra.mxu0 %v4355_v42  ;;  %v3175_v33 = vor.u32 %v3666_v30, %v3172_v31  ;;  %v3847_v30 = vld [vmem:[#allocation16 + $0x8] sm:$0xff]  ;;  %v4603_v31 = vld [vmem:[#allocation17 + $0x70] sm:$0xff] }
 0x51f   :  { %v1069_v35 = vpop.f32.mrf.mxu2  ;;  %1648 = vmatpush.bf16.msrb.mxu3 %v3227_v62  ;;  %v3179_v3 = vor.u32 %v3668_v18, %v3178_v32  ;;  %v3142_v62 = vld [vmem:[#allocation5 + $0xc8] sm:$0xf]  ;;  %v4607_v32 = vld [vmem:[#allocation17 + $0x68] sm:$0xff]  ;;  %v4611_v18 = vld [vmem:[#allocation17 + $0x60] sm:$0xff] }
 0x520   :  { %1667 = vmatpush.msra.mxu0 %v4361_v43  ;;  %v3798_v43 = vld [vmem:[%s4764_s10] ss:$0 sm:$0xff]  ;;  %1639 = vmatpush.bf16.msrb.mxu2 %v3175_v33  ;;  %v3158_v35 = vld [vmem:[#allocation5 + $0xf0] sm:$0xf]  ;;  %v4615_v33 = vld [vmem:[#allocation17 + $0x58] sm:$0xff] }
 0x522   :  { %1668 = vmatpush.msra.mxu0 %v4367_v44 }
 0x523   :  { %1649 = vmatpush.bf16.msrb.mxu3 %v3215_v17  ;;  %v3838_v17 = vld [vmem:[#allocation16 + $0x50] sm:$0xff] }
 0x524   :  { %1669 = vmatpush.msra.mxu0 %v4373_v45 }
 0x526   :  { %1670 = vmatpush.msra.mxu0 %v4379_v46 }
 0x527   :  { %1650 = vmatpush.bf16.msrb.mxu3 %v3203_v63 }
 0x528   :  { %1671 = vmatpush.msra.mxu0 %v4385_v47 }
 0x52a   :  { %1672 = vmatpush.msra.mxu0 %v4391_v48 }
 0x52b   :  { %1651 = vmatpush.bf16.msrb.mxu3 %v3191_v26 }
 0x52c   :  { %1673 = vmatpush.msra.mxu0 %v4407_v51 }
 0x52e   :  { %1674 = vmatpush.msra.mxu0 %v4411_v52 }
 0x52f   :  { %1652 = vmatpush.bf16.msrb.mxu3 %v3179_v3  ;;  %v4619_v3 = vld [vmem:[#allocation17 + $0x50] sm:$0xff] }
 0x530   :  { %1675 = vmatpush.msra.mxu0 %v4416_v53 }
 0x532   :  { %1676 = vmatpush.msra.mxu0 %v4423_v54 }
 0x534   :  { %1677 = vmatpush.msra.mxu0 %v4429_v55  ;;  %v3218_v55 = vld [vmem:[#allocation5 + $0x168] sm:$0xf] }
 0x536   :  { %1678 = vmatpush.msra.mxu0 %v4435_v56  ;;  %v3679_v56 = vld [vmem:[#allocation5 + $0x170] sm:$0xf0] }
 0x537   :  { %v3219_v28 = vor.u32 %v3679_v56, %v3218_v55  ;;  %v3662_v56 = vld [vmem:[#allocation5 + $0xe8] sm:$0xf0] }
 0x539   :  { %1622 = vmatpush.bf16.msrb.mxu1 %v3219_v28  ;;  %v3658_v28 = vld [vmem:[#allocation5 + $0xc8] sm:$0xf0] }
 0x53a   :  { %v3135_v58 = vor.u32 %v3658_v28, %v3134_v27 }
 0x594   :  { %v1361_v39 = vpop.f32.mrf.mxu0 }
 0x595   :  { %v1374_v40 = vpop.f32.mrf.mxu1 }
 0x59c   :  { %v1363_v41 = vpop.f32.mrf.mxu0 }
 0x59d   :  { %v1376_v42 = vpop.f32.mrf.mxu1 }
 0x59e   :  { %v3160_v42 = vld [vmem:[#allocation5 + $0xfc] sm:$0xf0] }
 0x5a0   :  { %v1348_v44 = vpop.f32.mrf.mxu3 }
 0x5a1   :  { %v1349_v45 = vadd.f32 %v3798_v43, %v1348_v44  ;;  %v1387_v46 = vpop.f32.mrf.mxu2  ;;  %v3166_v43 = vld [vmem:[#allocation5 + $0xf8] sm:$0xf]  ;;  %v3665_v44 = vld [vmem:[#allocation5 + $0x100] sm:$0xf0] }
 0x5a3   :  { %v1362_v47 = vadd.f32 %v1361_v39, %v1349_v45  ;;  %v3664_v39 = vld [vmem:[#allocation5 + $0xf8] sm:$0xf0] }
 0x5a4   :  { %v3159_v41 = vor.u32 %v3664_v39, %v3158_v35  ;;  %v4623_v35 = vld [vmem:[#allocation17 + $0x48] sm:$0xff]  ;;  %v4627_v39 = vld [vmem:[#allocation17 + $0x40] sm:$0xff] }
 0x5a5   :  { %v1375_v48 = vadd.f32 %v1374_v40, %v1362_v47  ;;  %v3663_v40 = vld [vmem:[#allocation5 + $0xf4] sm:$0xf]  ;;  %v3146_v47 = vld [vmem:[#allocation5 + $0xd8] sm:$0xf] }
 0x5a6   :  { %v3163_v45 = vor.u32 %v3663_v40, %v3160_v42  ;;  %v4631_v40 = vld [vmem:[#allocation17 + $0x38] sm:$0xff]  ;;  %v4639_v42 = vld [vmem:[#allocation17 + $0x28] sm:$0xff] }
 0x5a7   :  { %v1388_v51 = vadd.f32 %v1387_v46, %v1375_v48  ;;  %v3167_v46 = vor.u32 %v3665_v44, %v3166_v43  ;;  %v3661_v48 = vld [vmem:[#allocation5 + $0xe0] sm:$0xf0]  ;;  %v4643_v43 = vld [vmem:[#allocation17 + $0x20] sm:$0xff]  ;;  %v4647_v44 = vld [vmem:[#allocation17 + $0x18] sm:$0xff] }
 0x5a8   :  { %v1350_v52 = vpop.f32.mrf.mxu3  ;;  %1640 = vmatpush.bf16.msrb.mxu2 %v3163_v45  ;;  %v4651_v45 = vld [vmem:[#allocation17 + $0x10] sm:$0xff] }
 0x5a9   :  { %v1391_v53 = vadd.f32 %v1388_v51, %v4529_v9  ;;  %v1389_v54 = vpop.f32.mrf.mxu2  ;;  %v3206_v9 = vld [vmem:[#allocation5 + $0x150] sm:$0xf]  ;;  %1653 = vmatpush.bf16.msrb.mxu3 %v3167_v46  ;;  %v3147_v51 = vor.u32 %v3661_v48, %v3146_v47  ;;  %v3660_v52 = vld [vmem:[#allocation5 + $0xdc] sm:$0xf]  ;;  %v1486_v48 = vld [vmem:[#allocation7 + $0x3] sm:$0x7] }
 0x5aa   :  { %v3207_v12 = vor.u32 %v3676_v10, %v3206_v9  ;;  %v3154_v54 = vld [vmem:[#allocation5 + $0xe0] sm:$0xf]  ;;  %v3833_v10 = vld [vmem:[#allocation16 + $0x78] sm:$0xff]  ;;  %v4655_v46 = vld [vmem:[#allocation17 + $0x8] sm:$0xff] }
 0x5ab   :  { %1408 = vmatmul.f32.vlgmr.msra.gmra.mxu3 %v1391_v53  ;;  %v3155_v36 = vor.u32 %v3662_v56, %v3154_v54  ;;  %v4659_v47 = vld [vmem:[#allocation17] sm:$0xff]  ;;  %v1489_v54 = vperm.slane %v1486_v48, 1 }
 0x5ac   :  { %1623 = vmatpush.bf16.msrb.mxu1 %v3207_v12 }
 0x5ad   :  { %1654 = vmatpush.bf16.msrb.mxu3 %v3155_v36 }
 0x5b0   :  { %1624 = vmatpush.bf16.msrb.mxu1 %v3195_v37  ;;  %v3840_v37 = vld [vmem:[#allocation16 + $0x40] sm:$0xff] }
 0x5b4   :  { %1625 = vmatpush.bf16.msrb.mxu1 %v3183_v6  ;;  %v3844_v6 = vld [vmem:[#allocation16 + $0x20] sm:$0xff] }
 0x5b8   :  { %1626 = vmatpush.bf16.msrb.mxu1 %v3171_v13  ;;  %v4599_v13 = vld [vmem:[#allocation17 + $0x78] sm:$0xff] }
 0x5bc   :  { %1627 = vmatpush.bf16.msrb.mxu1 %v3159_v41  ;;  %v4635_v41 = vld [vmem:[#allocation17 + $0x30] sm:$0xff] }
 0x5c0   :  { %1628 = vmatpush.bf16.msrb.mxu1 %v3147_v51  ;;  %v1488_v51 = vperm.slane %v1486_v48, 0 }
 0x5c4   :  { %1629 = vmatpush.bf16.msrb.mxu1 %v3135_v58 }
 0x5c8   :  { %1686 = vmatpush.msra.mxu1 %v3833_v10 }
 0x5ca   :  { %1687 = vmatpush.msra.mxu1 %v3834_v11 }
 0x5cc   :  { %1688 = vmatpush.msra.mxu1 %v3835_v15 }
 0x5ce   :  { %1689 = vmatpush.msra.mxu1 %v3836_v49 }
 0x5d0   :  { %1690 = vmatpush.msra.mxu1 %v3837_v16 }
 0x5d2   :  { %1691 = vmatpush.msra.mxu1 %v3838_v17 }
 0x5d4   :  { %1692 = vmatpush.msra.mxu1 %v3839_v20 }
 0x5d6   :  { %1693 = vmatpush.msra.mxu1 %v3840_v37 }
 0x5d8   :  { %1694 = vmatpush.msra.mxu1 %v3841_v50 }
 0x5da   :  { %1695 = vmatpush.msra.mxu1 %v3842_v60 }
 0x5dc   :  { %1696 = vmatpush.msra.mxu1 %v3843_v2 }
 0x5de   :  { %1697 = vmatpush.msra.mxu1 %v3844_v6 }
 0x5e0   :  { %1698 = vmatpush.msra.mxu1 %v3845_v25 }
 0x5e2   :  { %1699 = vmatpush.msra.mxu1 %v3846_v8 }
 0x5e4   :  { %1700 = vmatpush.msra.mxu1 %v3847_v30 }
 0x5e6   :  { %1701 = vmatpush.msra.mxu1 %v3848_v34 }
 0x62e   :  { %v1409_v0 = vpop.f32.mrf.mxu3 }
 0x62f   :  { %v4588_v1 = vsub.f32 %v1391_v53, %v1409_v0  ;;  %v3148_v53 = vld [vmem:[#allocation5 + $0xe4] sm:$0xf0]  ;;  %v3139_v0 = vor.u32 %v3657_v59, %v3136_v61  ;;  %v1490_v59 = vperm.slane %v1486_v48, 2 }
 0x630   :  { %v3151_v55 = vor.u32 %v3660_v52, %v3148_v53 }
 0x631   :  { %v1413_v4 = vmul.f32 %v4588_v1, %v4588_v1 }
 0x632   :  { %1641 = vmatpush.bf16.msrb.mxu2 %v3151_v55 }
 0x633   :  { %1430 = vmatmul.f32.vlgmr.msrb.gmra.mxu0 %v1413_v4  ;;  %v3659_v4 = vld [vmem:[#allocation5 + $0xd0] sm:$0xf0] }
 0x634   :  { %v3143_v9 = vor.u32 %v3659_v4, %v3142_v62 }
 0x636   :  { %1642 = vmatpush.bf16.msrb.mxu2 %v3139_v0  ;;  %1655 = vmatpush.bf16.msrb.mxu3 %v3143_v9 }
 0x63a   :  { %1709 = vmatpush.msra.mxu2 %v3833_v10  ;;  %1732 = vmatpush.msra.mxu3 %v3833_v10 }
 0x63c   :  { %1710 = vmatpush.msra.mxu2 %v3834_v11  ;;  %1733 = vmatpush.msra.mxu3 %v3834_v11 }
 0x63e   :  { %1711 = vmatpush.msra.mxu2 %v3835_v15  ;;  %1734 = vmatpush.msra.mxu3 %v3835_v15  ;;  %v3688_v15 = vld [vmem:[#allocation8 + $0x78] sm:$0xff] }
 0x63f   :  { %1859 = vmatpush.bf16.msrb.mxu0 %v3688_v15  ;;  %v3799_v15 = vld [vmem:[#allocation10 + $0x1] ss:$0 sm:$0xff] }
 0x640   :  { %1712 = vmatpush.msra.mxu2 %v3836_v49  ;;  %1735 = vmatpush.msra.mxu3 %v3836_v49  ;;  %v3687_v49 = vld [vmem:[#allocation8 + $0x70] sm:$0xff] }
 0x642   :  { %1713 = vmatpush.msra.mxu2 %v3837_v16  ;;  %1736 = vmatpush.msra.mxu3 %v3837_v16  ;;  %v3686_v16 = vld [vmem:[#allocation8 + $0x68] sm:$0xff] }
 0x643   :  { %1860 = vmatpush.bf16.msrb.mxu0 %v3687_v49 }
 0x644   :  { %1714 = vmatpush.msra.mxu2 %v3838_v17  ;;  %1737 = vmatpush.msra.mxu3 %v3838_v17  ;;  %v3685_v17 = vld [vmem:[#allocation8 + $0x60] sm:$0xff] }
 0x646   :  { %1715 = vmatpush.msra.mxu2 %v3839_v20  ;;  %1738 = vmatpush.msra.mxu3 %v3839_v20 }
 0x647   :  { %1861 = vmatpush.bf16.msrb.mxu0 %v3686_v16 }
 0x648   :  { %1716 = vmatpush.msra.mxu2 %v3840_v37  ;;  %1739 = vmatpush.msra.mxu3 %v3840_v37 }
 0x64a   :  { %1717 = vmatpush.msra.mxu2 %v3841_v50  ;;  %1740 = vmatpush.msra.mxu3 %v3841_v50 }
 0x64b   :  { %1862 = vmatpush.bf16.msrb.mxu0 %v3685_v17 }
 0x64c   :  { %1718 = vmatpush.msra.mxu2 %v3842_v60  ;;  %1741 = vmatpush.msra.mxu3 %v3842_v60  ;;  %v3682_v60 = vld [vmem:[#allocation8 + $0x48] sm:$0xff] }
 0x64e   :  { %1719 = vmatpush.msra.mxu2 %v3843_v2  ;;  %1742 = vmatpush.msra.mxu3 %v3843_v2 }
 0x650   :  { %1720 = vmatpush.msra.mxu2 %v3844_v6  ;;  %1743 = vmatpush.msra.mxu3 %v3844_v6 }
 0x652   :  { %1721 = vmatpush.msra.mxu2 %v3845_v25  ;;  %1744 = vmatpush.msra.mxu3 %v3845_v25 }
 0x654   :  { %1722 = vmatpush.msra.mxu2 %v3846_v8  ;;  %1745 = vmatpush.msra.mxu3 %v3846_v8 }
 0x656   :  { %1723 = vmatpush.msra.mxu2 %v3847_v30  ;;  %1746 = vmatpush.msra.mxu3 %v3847_v30 }
 0x658   :  { %1724 = vmatpush.msra.mxu2 %v3848_v34  ;;  %1747 = vmatpush.msra.mxu3 %v3848_v34 }
 0x6b0   :  { %v1431_v12 = vpop.f32.mrf.mxu0 }
 0x6b1   :  { %v1432_v14 = vadd.f32 1e-05, %v1431_v12 }
 0x6b3   :  { %3817 = vrsqrt.f32 %v1432_v14  ;;  %vm1440_vm9 = vweird.f32 %v1432_v14 }
 0x6b9   :  { %v3818_v19 = vpop.eup %3817 }
 0x6ba   :  { %v1435_v21 = vmul.f32 %v3818_v19, %v1432_v14  ;;  %vm1441_vm8 = vweird.f32 %v3818_v19 }
 0x6bb   :  { %vm1442_vm10 = vmor %vm1440_vm9, %vm1441_vm8 }
 0x6bc   :  { %v1436_v38 = vmul.f32 %v3818_v19, %v1435_v21 }
 0x6be   :  { %v1437_v57 = vmul.f32 0.5, %v1436_v38  ;;  %v3683_v38 = vld [vmem:[#allocation8 + $0x50] sm:$0xff] }
 0x6c0   :  { %v1438_v63 = vsub.f32 1.5, %v1437_v57 }
 0x6c2   :  { %v1439_v5 = vmul.f32 %v3818_v19, %v1438_v63 }
 0x6c4   :  { %v1443_v23 = vsel %vm1442_vm10, %v3818_v19, %v1439_v5  ;;  %v3684_v19 = vld [vmem:[#allocation8 + $0x58] sm:$0xff] }
 0x6c5   :  { %v1444_v24 = vmul.f32 %v1443_v23, %v4588_v1  ;;  %1863 = vmatpush.bf16.msrb.mxu0 %v3684_v19  ;;  %v3681_v23 = vld [vmem:[#allocation8 + $0x40] sm:$0xff] }
 0x6c7   :  { %v1446_v26 = vmul.f32 %v1445_v22, %v1444_v24 }
 0x6c9   :  { %v4595_v29 = vadd.f32 %v1447_v7, %v1446_v26  ;;  %1864 = vmatpush.bf16.msrb.mxu0 %v3683_v38  ;;  %v3377_v38 = vld [vmem:[#allocation11 + $0x1f0] sm:$0xf0] }
 0x6cb   :  { %v1451_v1 = vpack.c.bf16 %v4595_v29, %v4595_v29 }
 0x6cd   :  { %1630 = vmatmul.bf16.vlgmr.msrb.gmra.mxu1 %v1451_v1  ;;  %1643 = vmatmul.bf16.vlgmr.msrb.gmra.mxu2 %v1451_v1 }
 0x6ce   :  { %1656 = vmatmul.bf16.vlgmr.msrb.gmra.mxu3 %v1451_v1  ;;  %1873 = vmatpush.msrb.mxu1 %v4599_v13 }
 0x6cf   :  { %1895 = vmatpush.msrb.mxu2 %v4599_v13  ;;  %1865 = vmatpush.bf16.msrb.mxu0 %v3682_v60 }
 0x6d0   :  { %1874 = vmatpush.msrb.mxu1 %v4603_v31 }
 0x6d1   :  { %1896 = vmatpush.msrb.mxu2 %v4603_v31 }
 0x6d2   :  { %1875 = vmatpush.msrb.mxu1 %v4607_v32 }
 0x6d3   :  { %1897 = vmatpush.msrb.mxu2 %v4607_v32  ;;  %1866 = vmatpush.bf16.msrb.mxu0 %v3681_v23 }
 0x6d4   :  { %1876 = vmatpush.msrb.mxu1 %v4611_v18 }
 0x6d5   :  { %1898 = vmatpush.msrb.mxu2 %v4611_v18 }
 0x6d6   :  { %1877 = vmatpush.msrb.mxu1 %v4615_v33 }
 0x6d7   :  { %1899 = vmatpush.msrb.mxu2 %v4615_v33 }
 0x6d8   :  { %1878 = vmatpush.msrb.mxu1 %v4619_v3 }
 0x6d9   :  { %1900 = vmatpush.msrb.mxu2 %v4619_v3 }
 0x6da   :  { %1879 = vmatpush.msrb.mxu1 %v4623_v35 }
 0x6db   :  { %1901 = vmatpush.msrb.mxu2 %v4623_v35 }
 0x6dc   :  { %1880 = vmatpush.msrb.mxu1 %v4627_v39 }
 0x6dd   :  { %1902 = vmatpush.msrb.mxu2 %v4627_v39 }
 0x6de   :  { %1881 = vmatpush.msrb.mxu1 %v4631_v40 }
 0x6df   :  { %1903 = vmatpush.msrb.mxu2 %v4631_v40 }
 0x6e0   :  { %1882 = vmatpush.msrb.mxu1 %v4635_v41 }
 0x6e1   :  { %1904 = vmatpush.msrb.mxu2 %v4635_v41 }
 0x6e2   :  { %1883 = vmatpush.msrb.mxu1 %v4639_v42 }
 0x6e3   :  { %1905 = vmatpush.msrb.mxu2 %v4639_v42 }
 0x6e4   :  { %1884 = vmatpush.msrb.mxu1 %v4643_v43 }
 0x6e5   :  { %1906 = vmatpush.msrb.mxu2 %v4643_v43 }
 0x6e6   :  { %1885 = vmatpush.msrb.mxu1 %v4647_v44 }
 0x6e7   :  { %1907 = vmatpush.msrb.mxu2 %v4647_v44 }
 0x6e8   :  { %1886 = vmatpush.msrb.mxu1 %v4651_v45 }
 0x6e9   :  { %1908 = vmatpush.msrb.mxu2 %v4651_v45 }
 0x6ea   :  { %1887 = vmatpush.msrb.mxu1 %v4655_v46 }
 0x6eb   :  { %1909 = vmatpush.msrb.mxu2 %v4655_v46 }
 0x6ec   :  { %1888 = vmatpush.msrb.mxu1 %v4659_v47 }
 0x6ed   :  { %1910 = vmatpush.msrb.mxu2 %v4659_v47 }
 0x74a   :  { %v1631_v52 = vpop.f32.mrf.mxu1 }
 0x74b   :  { %v1632_v53 = vadd.f32 %v1631_v52, %v1488_v51 }
 0x74d   :  { %v1661_v56 = vmul.f32 0.35355338, %v1632_v53 }
 0x750   :  { %v1644_v55 = vpop.f32.mrf.mxu2 }
 0x751   :  { %v1645_v27 = vadd.f32 %v1644_v55, %v1489_v54  ;;  %v1657_v28 = vpop.f32.mrf.mxu3 }
 0x752   :  { %v1633_v36 = vpop.f32.mrf.mxu1  ;;  %v4666_v62 = vadd.f32 %v1657_v28, %v1490_v59 }
 0x753   :  { %1683 = vrot.lane.b32.xlu1 %v1645_v27, %s4168_s4  ;;  %1729 = vrot.lane.b32.xlu0 %v1645_v27, %s4169_s28  ;;  %v1662_v58 = vmul.f32 %v1661_v56, %v1645_v27 }
 0x754   :  { %1706 = vrot.lane.b32.xlu2 %v1645_v27, %s4791_s26 }
 0x755   :  { %1679 = vmatmul.f32.vlgmr.msra.gmra.mxu0 %v1662_v58 }
 0x758   :  { %v1646_v61 = vpop.f32.mrf.mxu2 }
 0x759   :  { %v1659_v0 = vpop.f32.mrf.mxu3 }
 0x75b   :  { %1783 = vrot.lane.b32.xlu1 %v4666_v62, %s4169_s28  ;;  %1778 = vrot.lane.b32.xlu0 %v4666_v62, %s4791_s26 }
 0x75c   :  { %1773 = vrot.lane.b32.xlu2 %v4666_v62, %s4168_s4 }
 0x7ae   :  { %v1707_v4 = vpop.permute.xlu2 %1706 }
 0x7af   :  { %v1708_v9 = vmul.f32 %v1707_v4, %v1661_v56 }
 0x7b1   :  { %1725 = vmatmul.f32.vlgmr.msra.gmra.mxu2 %v1708_v9 }
 0x7b6   :  { %v1774_v28 = vpop.permute.xlu2 %1773 }
 0x7c5   :  { %v1684_v10 = vpop.permute.xlu1 %1683  ;;  %v1730_v11 = vpop.permute.xlu0 %1729 }
 0x7c6   :  { %v1685_v12 = vmul.f32 %v1684_v10, %v1661_v56  ;;  %v1731_v14 = vmul.f32 %v1730_v11, %v1661_v56 }
 0x7c8   :  { %1702 = vmatmul.f32.vlgmr.msra.gmra.mxu1 %v1685_v12  ;;  %1748 = vmatmul.f32.vlgmr.msra.gmra.mxu3 %v1731_v14 }
 0x7cd   :  { %v1779_v61 = vpop.permute.xlu0 %1778  ;;  %v1784_v9 = vpop.permute.xlu1 %1783 }
 0x7d2   :  { %v1680_v20 = vpop.f32.mrf.mxu0 }
 0x834   :  { %v1726_v50 = vpop.f32.mrf.mxu2 }
 0x845   :  { %v1703_v21 = vpop.f32.mrf.mxu1 }
 0x846   :  { %v1752_v37 = vmax.f32 %v1680_v20, %v1703_v21 }
 0x848   :  { %v1753_v57 = vmax.f32 %v1752_v37, %v1726_v50 }
 0x84b   :  { %v1749_v63 = vpop.f32.mrf.mxu3 }
 0x84c   :  { %v1754_v2 = vmax.f32 %v1753_v57, %v1749_v63  ;;  %v3720_v57 = vld [vmem:[#allocation11 + $0x1f4] sm:$0xf0] }
 0x84e   :  { %v1755_v5 = vsub.f32 %v1680_v20, %v1754_v2  ;;  %v1758_v22 = vsub.f32 %v1703_v21, %v1754_v2  ;;  %v1761_v6 = vsub.f32 %v1726_v50, %v1754_v2  ;;  %v1764_v24 = vsub.f32 %v1749_v63, %v1754_v2  ;;  %v3375_v20 = vld [vmem:[#allocation11 + $0x1e0] sm:$0xf]  ;;  %v3719_v21 = vld [vmem:[#allocation11 + $0x1ec] sm:$0xf0]  ;;  %v3383_v50 = vld [vmem:[#allocation11 + $0x1e8] sm:$0xf] }
 0x84f   :  { %v3376_v37 = vor.u32 %v3719_v21, %v3375_v20  ;;  %v3384_v63 = vor.u32 %v3720_v57, %v3383_v50  ;;  %v3718_v2 = vld [vmem:[#allocation11 + $0x1ec] sm:$0xf]  ;;  %v3337_v21 = vld [vmem:[#allocation11 + $0x198] sm:$0xf0]  ;;  %v3701_v50 = vld [vmem:[#allocation11 + $0x164] sm:$0xf] }
 0x850   :  { %v1756_v7 = vmul.f32 1.442695, %v1755_v5  ;;  %v1759_v25 = vmul.f32 1.442695, %v1758_v22  ;;  %v1762_v26 = vmul.f32 1.442695, %v1761_v6 }
 0x851   :  { %v1765_v8 = vmul.f32 1.442695, %v1764_v24  ;;  %v3385_v5 = vld [vmem:[#allocation11 + $0x1f8] sm:$0xf0]  ;;  %2135 = vmatpush.bf16.msrb.mxu3 %v3376_v37  ;;  %2161 = vmatpush.bf16.msra.mxu1 %v3384_v63  ;;  %v3359_v24 = vld [vmem:[#allocation11 + $0x1c0] sm:$0xf] }
 0x852   :  { %3819 = vpow2.f32 %v1756_v7  ;;  %v3388_v22 = vor.u32 %v3718_v2, %v3385_v5  ;;  %v3715_v7 = vld [vmem:[#allocation11 + $0x1cc] sm:$0xf0]  ;;  %v3706_v20 = vld [vmem:[#allocation11 + $0x18c] sm:$0xf]  ;;  %v3311_v37 = vld [vmem:[#allocation11 + $0x160] sm:$0xf] }
 0x853   :  { %3821 = vpow2.f32 %v1759_v25  ;;  %v3713_v25 = vld [vmem:[#allocation11 + $0x1c4] sm:$0xf]  ;;  %v3319_v63 = vld [vmem:[#allocation11 + $0x168] sm:$0xf]  ;;  %v3704_v2 = vld [vmem:[#allocation11 + $0x174] sm:$0xf0] }
 0x854   :  { %3823 = vpow2.f32 %v1762_v26  ;;  %2174 = vmatpush.bf16.msra.mxu2 %v3388_v22  ;;  %v3360_v26 = vor.u32 %v3715_v7, %v3359_v24  ;;  %v3320_v22 = vor.u32 %v3704_v2, %v3319_v63  ;;  %v3295_v7 = vld [vmem:[#allocation11 + $0x140] sm:$0xf]  ;;  %v3735_v2 = vld [vmem:[#allocation13 + $0x170] sm:$0xff] }
 0x855   :  { %3825 = vpow2.f32 %v1765_v8  ;;  %v3361_v8 = vld [vmem:[#allocation11 + $0x1d0] sm:$0xf0] }
 0x856   :  { %2136 = vmatpush.bf16.msrb.mxu3 %v3360_v26  ;;  %v3697_v26 = vld [vmem:[#allocation11 + $0x144] sm:$0xf] }
 0x858   :  { %v3820_v30 = vpop.eup %3819 }
 0x859   :  { %v3822_v1 = vpop.eup %3821 }
 0x85a   :  { %v1767_v34 = vadd.f32 %v3822_v1, %v3820_v30  ;;  %v3824_v48 = vpop.eup %3823 }
 0x85b   :  { %v3826_v52 = vpop.eup %3825 }
 0x85c   :  { %v1768_v51 = vadd.f32 %v3824_v48, %v1767_v34  ;;  %v3364_v34 = vor.u32 %v3713_v25, %v3361_v8  ;;  %v3699_v25 = vld [vmem:[#allocation11 + $0x14c] sm:$0xf0] }
 0x85d   :  { %v3296_v8 = vor.u32 %v3699_v25, %v3295_v7  ;;  %v3742_v7 = vld [vmem:[#allocation13 + $0x1a8] sm:$0xff] }
 0x85e   :  { %v1769_v53 = vadd.f32 %v3826_v52, %v1768_v51  ;;  %v3714_v51 = vld [vmem:[#allocation11 + $0x1cc] sm:$0xf] }
 0x85f   :  { %v3726_v25 = vld [vmem:[#allocation13 + $0x128] sm:$0xff] }
 0x860   :  { %3827 = vrcp.f32 %v1769_v53 }
 0x866   :  { %v3828_v54 = vpop.eup %3827 }
 0x867   :  { %v1771_v55 = vmul.f32 %v3828_v54, %v3820_v30  ;;  %v1775_v56 = vmul.f32 %v3828_v54, %v3822_v1  ;;  %v1780_v27 = vmul.f32 %v3828_v54, %v3824_v48  ;;  %v1785_v36 = vmul.f32 %v3828_v54, %v3826_v52  ;;  %v3367_v30 = vld [vmem:[#allocation11 + $0x1c8] sm:$0xf]  ;;  %v3716_v1 = vld [vmem:[#allocation11 + $0x1d4] sm:$0xf0]  ;;  %v3369_v52 = vld [vmem:[#allocation11 + $0x1d8] sm:$0xf0] }
 0x868   :  { %v3368_v48 = vor.u32 %v3716_v1, %v3367_v30  ;;  %v3372_v53 = vor.u32 %v3714_v51, %v3369_v52  ;;  %v3343_v54 = vld [vmem:[#allocation11 + $0x1a0] sm:$0xf]  ;;  %v3297_v30 = vld [vmem:[#allocation11 + $0x150] sm:$0xf0]  ;;  %v3303_v1 = vld [vmem:[#allocation11 + $0x148] sm:$0xf] }
 0x869   :  { %v1772_v58 = vmul.f32 %v1771_v55, %v4666_v62  ;;  %v1776_v59 = vmul.f32 %v1775_v56, %v1774_v28  ;;  %v1781_v4 = vmul.f32 %v1780_v27, %v1779_v61  ;;  %v1786_v11 = vmul.f32 %v1785_v36, %v1784_v9  ;;  %v3717_v62 = vld [vmem:[#allocation11 + $0x1e4] sm:$0xf]  ;;  %v3711_v55 = vld [vmem:[#allocation11 + $0x1ac] sm:$0xf0]  ;;  %v3345_v28 = vld [vmem:[#allocation11 + $0x1b0] sm:$0xf0] }
 0x86a   :  { %v3380_v60 = vor.u32 %v3717_v62, %v3377_v38  ;;  %2162 = vmatpush.bf16.msra.mxu1 %v3368_v48  ;;  %v3709_v56 = vld [vmem:[#allocation11 + $0x1a4] sm:$0xf]  ;;  %2175 = vmatpush.bf16.msra.mxu2 %v3372_v53  ;;  %v3344_v27 = vor.u32 %v3711_v55, %v3343_v54  ;;  %v3351_v36 = vld [vmem:[#allocation11 + $0x1a8] sm:$0xf]  ;;  %v3340_v62 = vor.u32 %v3706_v20, %v3337_v21  ;;  %v3703_v38 = vld [vmem:[#allocation11 + $0x16c] sm:$0xf0] }
 0x86b   :  { %v1777_v0 = vadd.f32 %v1776_v59, %v1772_v58  ;;  %v3712_v58 = vld [vmem:[#allocation11 + $0x1b4] sm:$0xf0]  ;;  %v3348_v59 = vor.u32 %v3709_v56, %v3345_v28  ;;  %v3312_v57 = vor.u32 %v3703_v38, %v3311_v37  ;;  %v3300_v48 = vor.u32 %v3697_v26, %v3297_v30  ;;  %v3698_v52 = vld [vmem:[#allocation11 + $0x14c] sm:$0xf]  ;;  %v3305_v53 = vld [vmem:[#allocation11 + $0x158] sm:$0xf0] }
 0x86c   :  { %2148 = vmatpush.bf16.msra.mxu0 %v3380_v60  ;;  %v3352_v61 = vor.u32 %v3712_v58, %v3351_v36  ;;  %2137 = vmatpush.bf16.msrb.mxu3 %v3344_v27  ;;  %v3313_v60 = vld [vmem:[#allocation11 + $0x170] sm:$0xf0]  ;;  %v3308_v54 = vor.u32 %v3698_v52, %v3305_v53  ;;  %v3279_v55 = vld [vmem:[#allocation11 + $0x120] sm:$0xf]  ;;  %v3695_v56 = vld [vmem:[#allocation11 + $0x12c] sm:$0xf0] }
 0x86d   :  { %v1782_v10 = vadd.f32 %v1781_v4, %v1777_v0  ;;  %v3710_v0 = vld [vmem:[#allocation11 + $0x1ac] sm:$0xf]  ;;  %v3353_v4 = vld [vmem:[#allocation11 + $0x1b8] sm:$0xf0]  ;;  %v3316_v5 = vor.u32 %v3701_v50, %v3313_v60  ;;  %v3280_v27 = vor.u32 %v3695_v56, %v3279_v55  ;;  %v3693_v28 = vld [vmem:[#allocation11 + $0x124] sm:$0xf] }
 0x86e   :  { %v3356_v9 = vor.u32 %v3710_v0, %v3353_v4  ;;  %2163 = vmatpush.bf16.msra.mxu1 %v3352_v61  ;;  %v3281_v36 = vld [vmem:[#allocation11 + $0x130] sm:$0xf0]  ;;  %v3287_v58 = vld [vmem:[#allocation11 + $0x128] sm:$0xf]  ;;  %v3696_v61 = vld [vmem:[#allocation11 + $0x134] sm:$0xf0] }
 0x86f   :  { %v1787_v12 = vadd.f32 %v1786_v11, %v1782_v10  ;;  %v3327_v10 = vld [vmem:[#allocation11 + $0x180] sm:$0xf]  ;;  %v3707_v11 = vld [vmem:[#allocation11 + $0x18c] sm:$0xf0]  ;;  %v3694_v0 = vld [vmem:[#allocation11 + $0x12c] sm:$0xf] }
 0x870   :  { %2149 = vmatpush.bf16.msra.mxu0 %v3364_v34  ;;  %2176 = vmatpush.bf16.msra.mxu2 %v3356_v9  ;;  %v3700_v34 = vld [vmem:[#allocation11 + $0x154] sm:$0xf0]  ;;  %v3289_v4 = vld [vmem:[#allocation11 + $0x138] sm:$0xf0]  ;;  %v3288_v9 = vor.u32 %v3696_v61, %v3287_v58  ;;  %v3690_v21 = vld [vmem:[#allocation11 + $0x10c] sm:$0xf] }
 0x871   :  { %v1788_v14 = vpack.c.bf16 %v1787_v12, %v1787_v12  ;;  %v3705_v12 = vld [vmem:[#allocation11 + $0x184] sm:$0xf]  ;;  %v3304_v51 = vor.u32 %v3700_v34, %v3303_v1  ;;  %v3736_v38 = vld [vmem:[#allocation13 + $0x178] sm:$0xff]  ;;  %v3750_v26 = vld [vmem:[#allocation13 + $0x1e8] sm:$0xff] }
 0x872   :  { %v3744_v50 = vld [vmem:[#allocation13 + $0x1b8] sm:$0xff]  ;;  %v3741_v30 = vld [vmem:[#allocation13 + $0x1a0] sm:$0xff]  ;;  %v3731_v58 = vld [vmem:[#allocation13 + $0x150] sm:$0xff] }
 0x873   :  { %1867 = vmatmul.bf16.vlgmr.msrb.gmra.mxu0 %v1788_v14  ;;  %v3328_v14 = vor.u32 %v3707_v11, %v3327_v10  ;;  %v3292_v10 = vor.u32 %v3694_v0, %v3289_v4  ;;  %v3263_v11 = vld [vmem:[#allocation11 + $0x100] sm:$0xf]  ;;  %v3752_v60 = vld [vmem:[#allocation13 + $0x1f8] sm:$0xff] }
 0x874   :  { %2150 = vmatpush.bf16.msra.mxu0 %v3348_v59  ;;  %2177 = vmatpush.bf16.msra.mxu2 %v3340_v62  ;;  %v3284_v59 = vor.u32 %v3693_v28, %v3281_v36  ;;  %v3273_v62 = vld [vmem:[#allocation11 + $0x118] sm:$0xf0]  ;;  %v3725_v34 = vld [vmem:[#allocation13 + $0x120] sm:$0xff] }
 0x875   :  { %2138 = vmatpush.bf16.msrb.mxu3 %v3328_v14  ;;  %v3689_v14 = vld [vmem:[#allocation11 + $0x104] sm:$0xf]  ;;  %v3276_v37 = vor.u32 %v3690_v21, %v3273_v62  ;;  %v3732_v53 = vld [vmem:[#allocation13 + $0x158] sm:$0xff]  ;;  %v3746_v21 = vld [vmem:[#allocation13 + $0x1c8] sm:$0xff] }
 0x876   :  { %v3724_v55 = vld [vmem:[#allocation13 + $0x118] sm:$0xff]  ;;  %v4680_v28 = vld [vmem:[#allocation14 + $0x4] sm:$0xf] }
 0x877   :  { %v3748_v56 = vld [vmem:[#allocation13 + $0x1d8] sm:$0xff]  ;;  %v1926_v0 = vperm.slane %v4680_v28, 0  ;;  %v3721_v62 = vld [vmem:[#allocation13 + $0x100] sm:$0xff] }
 0x879   :  { %2139 = vmatpush.bf16.msrb.mxu3 %v3312_v57  ;;  %v3728_v57 = vld [vmem:[#allocation13 + $0x138] sm:$0xff] }
 0x87d   :  { %2140 = vmatpush.bf16.msrb.mxu3 %v3296_v8  ;;  %v3733_v8 = vld [vmem:[#allocation13 + $0x160] sm:$0xff] }
 0x881   :  { %2141 = vmatpush.bf16.msrb.mxu3 %v3280_v27 }
 0x8f0   :  { %v1868_v49 = vpop.f32.mrf.mxu0 }
 0x8f1   :  { %v1869_v16 = vadd.f32 %v3799_v15, %v1868_v49  ;;  %v3329_v15 = vld [vmem:[#allocation11 + $0x190] sm:$0xf0]  ;;  %v3335_v49 = vld [vmem:[#allocation11 + $0x188] sm:$0xf] }
 0x8f3   :  { %v1872_v17 = vadd.f32 %v1869_v16, %v4595_v29  ;;  %v3708_v16 = vld [vmem:[#allocation11 + $0x194] sm:$0xf0] }
 0x8f5   :  { %1889 = vmatmul.f32.vlgmr.msrb.gmra.mxu1 %v1872_v17 }
 0x8f8   :  { %v1870_v19 = vpop.f32.mrf.mxu0 }
 0x8f9   :  { %v3336_v19 = vor.u32 %v3708_v16, %v3335_v49  ;;  %v3265_v49 = vld [vmem:[#allocation11 + $0x110] sm:$0xf0]  ;;  %v3271_v16 = vld [vmem:[#allocation11 + $0x108] sm:$0xf] }
 0x8fb   :  { %2164 = vmatpush.bf16.msra.mxu1 %v3336_v19  ;;  %v3268_v19 = vor.u32 %v3689_v14, %v3265_v49  ;;  %v3738_v49 = vld [vmem:[#allocation13 + $0x188] sm:$0xff] }
 0x8ff   :  { %2165 = vmatpush.bf16.msra.mxu1 %v3320_v22 }
 0x903   :  { %2166 = vmatpush.bf16.msra.mxu1 %v3304_v51 }
 0x907   :  { %2167 = vmatpush.bf16.msra.mxu1 %v3288_v9 }
 0x972   :  { %v1890_v6 = vpop.f32.mrf.mxu1 }
 0x973   :  { %v4676_v29 = vsub.f32 %v1872_v17, %v1890_v6  ;;  %v3332_v17 = vor.u32 %v3705_v12, %v3329_v15  ;;  %v3702_v6 = vld [vmem:[#allocation11 + $0x16c] sm:$0xf]  ;;  %v3691_v12 = vld [vmem:[#allocation11 + $0x10c] sm:$0xf0] }
 0x974   :  { %v3264_v15 = vor.u32 %v3691_v12, %v3263_v11 }
 0x975   :  { %v1894_v23 = vmul.f32 %v4676_v29, %v4676_v29  ;;  %2151 = vmatpush.bf16.msra.mxu0 %v3332_v17  ;;  %v3692_v17 = vld [vmem:[#allocation11 + $0x114] sm:$0xf0] }
 0x976   :  { %v3272_v20 = vor.u32 %v3692_v17, %v3271_v16  ;;  %2142 = vmatpush.bf16.msrb.mxu3 %v3264_v15  ;;  %v3730_v15 = vld [vmem:[#allocation13 + $0x148] sm:$0xff]  ;;  %v3723_v16 = vld [vmem:[#allocation13 + $0x110] sm:$0xff] }
 0x977   :  { %1911 = vmatmul.f32.vlgmr.msrb.gmra.mxu2 %v1894_v23  ;;  %v3321_v23 = vld [vmem:[#allocation11 + $0x178] sm:$0xf0]  ;;  %v3747_v17 = vld [vmem:[#allocation13 + $0x1d0] sm:$0xff] }
 0x978   :  { %v3324_v24 = vor.u32 %v3702_v6, %v3321_v23  ;;  %2168 = vmatpush.bf16.msra.mxu1 %v3272_v20  ;;  %v3727_v6 = vld [vmem:[#allocation13 + $0x130] sm:$0xff]  ;;  %v3722_v20 = vld [vmem:[#allocation13 + $0x108] sm:$0xff] }
 0x979   :  { %2152 = vmatpush.bf16.msra.mxu0 %v3316_v5  ;;  %v3743_v5 = vld [vmem:[#allocation13 + $0x1b0] sm:$0xff] }
 0x97a   :  { %2178 = vmatpush.bf16.msra.mxu2 %v3324_v24  ;;  %2457 = vmatpush.bf16.msra.mxu3 %v3728_v57  ;;  %v3751_v23 = vld [vmem:[#allocation13 + $0x1f0] sm:$0xff]  ;;  %v3734_v24 = vld [vmem:[#allocation13 + $0x168] sm:$0xff] }
 0x97c   :  { %2483 = vmatpush.bf16.msrb.mxu1 %v3744_v50 }
 0x97d   :  { %2153 = vmatpush.bf16.msra.mxu0 %v3300_v48  ;;  %v3749_v48 = vld [vmem:[#allocation13 + $0x1e0] sm:$0xff] }
 0x97e   :  { %2179 = vmatpush.bf16.msra.mxu2 %v3308_v54  ;;  %2458 = vmatpush.bf16.msra.mxu3 %v3727_v6  ;;  %v3740_v54 = vld [vmem:[#allocation13 + $0x198] sm:$0xff] }
 0x980   :  { %2484 = vmatpush.bf16.msrb.mxu1 %v3743_v5 }
 0x981   :  { %2154 = vmatpush.bf16.msra.mxu0 %v3284_v59  ;;  %v3739_v59 = vld [vmem:[#allocation13 + $0x190] sm:$0xff] }
 0x982   :  { %2180 = vmatpush.bf16.msra.mxu2 %v3292_v10  ;;  %2459 = vmatpush.bf16.msra.mxu3 %v3726_v25  ;;  %v1928_v10 = vperm.slane %v4680_v28, 1 }
 0x984   :  { %2485 = vmatpush.bf16.msrb.mxu1 %v3742_v7 }
 0x985   :  { %2155 = vmatpush.bf16.msra.mxu0 %v3268_v19  ;;  %v3737_v19 = vld [vmem:[#allocation13 + $0x180] sm:$0xff] }
 0x986   :  { %2181 = vmatpush.bf16.msra.mxu2 %v3276_v37  ;;  %2460 = vmatpush.bf16.msra.mxu3 %v3725_v34  ;;  %v3745_v37 = vld [vmem:[#allocation13 + $0x1c0] sm:$0xff] }
 0x988   :  { %2486 = vmatpush.bf16.msrb.mxu1 %v3741_v30  ;;  %v3800_v30 = vld [vmem:[%s4764_s10 + $0x1] ss:$0 sm:$0xff] }
 0x989   :  { %2470 = vmatpush.bf16.msrb.mxu0 %v3736_v38 }
 0x98a   :  { %2496 = vmatpush.bf16.msrb.mxu2 %v3752_v60  ;;  %2461 = vmatpush.bf16.msra.mxu3 %v3724_v55  ;;  %v2568_v55 = vld [vmem:[%s4768_s14] sm:$0x7] }
 0x98c   :  { %2487 = vmatpush.bf16.msrb.mxu1 %v3740_v54 }
 0x98d   :  { %2471 = vmatpush.bf16.msrb.mxu0 %v3735_v2 }
 0x98e   :  { %2497 = vmatpush.bf16.msrb.mxu2 %v3751_v23  ;;  %2462 = vmatpush.bf16.msra.mxu3 %v3723_v16 }
 0x990   :  { %2488 = vmatpush.bf16.msrb.mxu1 %v3739_v59 }
 0x991   :  { %2472 = vmatpush.bf16.msrb.mxu0 %v3734_v24 }
 0x992   :  { %2498 = vmatpush.bf16.msrb.mxu2 %v3750_v26  ;;  %2463 = vmatpush.bf16.msra.mxu3 %v3722_v20 }
 0x994   :  { %2489 = vmatpush.bf16.msrb.mxu1 %v3738_v49  ;;  %v3761_v49 = vld [vmem:[%s4771_s17] sm:$0xff] }
 0x995   :  { %2473 = vmatpush.bf16.msrb.mxu0 %v3733_v8 }
 0x996   :  { %2499 = vmatpush.bf16.msrb.mxu2 %v3749_v48  ;;  %2464 = vmatpush.bf16.msra.mxu3 %v3721_v62 }
 0x998   :  { %2490 = vmatpush.bf16.msrb.mxu1 %v3737_v19 }
 0x999   :  { %2474 = vmatpush.bf16.msrb.mxu0 %v3732_v53 }
 0x99a   :  { %2500 = vmatpush.bf16.msrb.mxu2 %v3748_v56  ;;  %v2567_v56 = vld [vmem:[%s4793_s29] sm:$0xff] }
 0x99d   :  { %2475 = vmatpush.bf16.msrb.mxu0 %v3731_v58 }
 0x99e   :  { %2501 = vmatpush.bf16.msrb.mxu2 %v3747_v17  ;;  %v3753_v17 = vld [vmem:[#allocation19] sm:$0xff] }
 0x9a1   :  { %2476 = vmatpush.bf16.msrb.mxu0 %v3730_v15  ;;  %v3754_v15 = vld [vmem:[#allocation19 + $0x8] sm:$0xff] }
 0x9a2   :  { %2502 = vmatpush.bf16.msrb.mxu2 %v3746_v21 }
 0x9a6   :  { %2503 = vmatpush.bf16.msrb.mxu2 %v3745_v37 }
 0x9fa   :  { %v1912_v63 = vpop.f32.mrf.mxu2 }
 0x9fb   :  { %v1913_v22 = vadd.f32 1e-05, %v1912_v63 }
 0x9fd   :  { %3829 = vrsqrt.f32 %v1913_v22  ;;  %vm1921_vm12 = vweird.f32 %v1913_v22 }
 0xa03   :  { %v3830_v1 = vpop.eup %3829 }
 0xa04   :  { %v1916_v51 = vmul.f32 %v3830_v1, %v1913_v22  ;;  %vm1922_vm11 = vweird.f32 %v3830_v1 }
 0xa05   :  { %vm1923_vm13 = vmor %vm1921_vm12, %vm1922_vm11 }
 0xa06   :  { %v1917_v52 = vmul.f32 %v3830_v1, %v1916_v51 }
 0xa08   :  { %v1918_v27 = vmul.f32 0.5, %v1917_v52 }
 0xa0a   :  { %v1919_v36 = vsub.f32 1.5, %v1918_v27  ;;  %v3760_v27 = vld [vmem:[#allocation19 + $0x38] sm:$0xff] }
 0xa0c   :  { %v1920_v61 = vmul.f32 %v3830_v1, %v1919_v36 }
 0xa0e   :  { %v1924_v4 = vsel %vm1923_vm13, %v3830_v1, %v1920_v61  ;;  %v3759_v61 = vld [vmem:[#allocation19 + $0x30] sm:$0xff] }
 0xa0f   :  { %v1925_v9 = vmul.f32 %v1924_v4, %v4676_v29  ;;  %v3729_v29 = vld [vmem:[#allocation13 + $0x140] sm:$0xff]  ;;  %v3757_v4 = vld [vmem:[#allocation19 + $0x20] sm:$0xff] }
 0xa10   :  { %2477 = vmatpush.bf16.msrb.mxu0 %v3729_v29 }
 0xa11   :  { %v1927_v11 = vmul.f32 %v1926_v0, %v1925_v9  ;;  %v3758_v0 = vld [vmem:[#allocation19 + $0x28] sm:$0xff]  ;;  %v3756_v9 = vld [vmem:[#allocation19 + $0x18] sm:$0xff] }
 0xa13   :  { %v4685_v12 = vadd.f32 %v1928_v10, %v1927_v11  ;;  %v3755_v10 = vld [vmem:[#allocation19 + $0x10] sm:$0xff] }
 0xa14   :  { %v3762_v11 = vld [vmem:[%s4771_s17 + $0x8] sm:$0xff] }
 0xa15   :  { %v1930_v14 = vpack.c.bf16 %v4685_v12, %v4685_v12 }
 0xa17   :  { %2143 = vmatmul.bf16.vlgmr.msrb.gmra.mxu3 %v1930_v14  ;;  %2156 = vmatmul.bf16.vlgmr.msra.gmra.mxu0 %v1930_v14 }
 0xa18   :  { %2169 = vmatmul.bf16.vlgmr.msra.gmra.mxu1 %v1930_v14  ;;  %2182 = vmatmul.bf16.vlgmr.msra.gmra.mxu2 %v1930_v14 }
 0xa19   :  { %2532 = vmatpush.msra.mxu0 %v4599_v13  ;;  %2510 = vmatpush.msrb.mxu3 %v4599_v13  ;;  %v3260_v13 = vld [vmem:[%s4762_s8 + $0x4] sm:$0xf] }
 0xa1a   :  { %v1967_v38 = vperm.slane %v3260_v13, 0  ;;  %v1970_v50 = vperm.slane %v3260_v13, 3  ;;  %2700 = vmatpush.bf16.msra.mxu2 %v3760_v27  ;;  %2645 = vmatpush.bf16.msra.mxu1 %v3762_v11 }
 0xa1b   :  { %2533 = vmatpush.msra.mxu0 %v4603_v31  ;;  %2511 = vmatpush.msrb.mxu3 %v4603_v31  ;;  %v1968_v31 = vperm.slane %v3260_v13, 1 }
 0xa1d   :  { %2534 = vmatpush.msra.mxu0 %v4607_v32  ;;  %2512 = vmatpush.msrb.mxu3 %v4607_v32  ;;  %v1969_v32 = vperm.slane %v3260_v13, 2 }
 0xa1e   :  { %2701 = vmatpush.bf16.msra.mxu2 %v3759_v61  ;;  %2646 = vmatpush.bf16.msra.mxu1 %v3761_v49 }
 0xa1f   :  { %2535 = vmatpush.msra.mxu0 %v4611_v18  ;;  %2513 = vmatpush.msrb.mxu3 %v4611_v18 }
 0xa21   :  { %2536 = vmatpush.msra.mxu0 %v4615_v33  ;;  %2514 = vmatpush.msrb.mxu3 %v4615_v33 }
 0xa22   :  { %2702 = vmatpush.bf16.msra.mxu2 %v3758_v0 }
 0xa23   :  { %2537 = vmatpush.msra.mxu0 %v4619_v3  ;;  %2515 = vmatpush.msrb.mxu3 %v4619_v3 }
 0xa25   :  { %2538 = vmatpush.msra.mxu0 %v4623_v35  ;;  %2516 = vmatpush.msrb.mxu3 %v4623_v35 }
 0xa26   :  { %2703 = vmatpush.bf16.msra.mxu2 %v3757_v4 }
 0xa27   :  { %2539 = vmatpush.msra.mxu0 %v4627_v39  ;;  %2517 = vmatpush.msrb.mxu3 %v4627_v39 }
 0xa29   :  { %2540 = vmatpush.msra.mxu0 %v4631_v40  ;;  %2518 = vmatpush.msrb.mxu3 %v4631_v40 }
 0xa2a   :  { %2704 = vmatpush.bf16.msra.mxu2 %v3756_v9 }
 0xa2b   :  { %2541 = vmatpush.msra.mxu0 %v4635_v41  ;;  %2519 = vmatpush.msrb.mxu3 %v4635_v41 }
 0xa2d   :  { %2542 = vmatpush.msra.mxu0 %v4639_v42  ;;  %2520 = vmatpush.msrb.mxu3 %v4639_v42 }
 0xa2e   :  { %2705 = vmatpush.bf16.msra.mxu2 %v3755_v10 }
 0xa2f   :  { %2543 = vmatpush.msra.mxu0 %v4643_v43  ;;  %2521 = vmatpush.msrb.mxu3 %v4643_v43 }
 0xa31   :  { %2544 = vmatpush.msra.mxu0 %v4647_v44  ;;  %2522 = vmatpush.msrb.mxu3 %v4647_v44 }
 0xa32   :  { %2706 = vmatpush.bf16.msra.mxu2 %v3754_v15 }
 0xa33   :  { %2545 = vmatpush.msra.mxu0 %v4651_v45  ;;  %2523 = vmatpush.msrb.mxu3 %v4651_v45 }
 0xa35   :  { %2546 = vmatpush.msra.mxu0 %v4655_v46  ;;  %2524 = vmatpush.msrb.mxu3 %v4655_v46 }
 0xa36   :  { %2707 = vmatpush.bf16.msra.mxu2 %v3753_v17 }
 0xa37   :  { %2547 = vmatpush.msra.mxu0 %v4659_v47  ;;  %2525 = vmatpush.msrb.mxu3 %v4659_v47 }
 0xa94   :  { %v2157_v18 = vpop.f32.mrf.mxu0 }
 0xa95   :  { %v2158_v33 = vadd.f32 %v2157_v18, %v1968_v31  ;;  %v2170_v3 = vpop.f32.mrf.mxu1  ;;  %v2563_v18 = vperm.slane %v4680_v28, 2 }
 0xa96   :  { %v2171_v35 = vadd.f32 %v2170_v3, %v1969_v32 }
 0xa97   :  { %v2188_v39 = vmax.f32 %v2158_v33, 0.0 }
 0xa98   :  { %v2189_v40 = vmax.f32 %v2171_v35, 0.0  ;;  %v2565_v35 = vperm.slane %v4680_v28, 3 }
 0xa99   :  { %v2192_v57 = vpack.c.bf16 %v2188_v39, %v2188_v39 }
 0xa9a   :  { %v2193_v41 = vpack.c.bf16 %v2189_v40, %v2189_v40  ;;  %v2144_v60 = vpop.f32.mrf.mxu3 }
 0xa9b   :  { %v2145_v63 = vadd.f32 %v2144_v60, %v1967_v38  ;;  %v2183_v42 = vpop.f32.mrf.mxu2  ;;  %2478 = vmatmul.bf16.vlgmr.msrb.gmra.mxu0 %v2192_v57 }
 0xa9c   :  { %v2184_v2 = vadd.f32 %v2183_v42, %v1970_v50  ;;  %2491 = vmatmul.bf16.vlgmr.msrb.gmra.mxu1 %v2193_v41  ;;  %v2159_v5 = vpop.f32.mrf.mxu0  ;;  %v3802_v41 = vld [vmem:[%s4772_s18] ss:$0 sm:$0xff] }
 0xa9d   :  { %v2187_v43 = vmax.f32 %v2145_v63, 0.0  ;;  %v2172_v22 = vpop.f32.mrf.mxu1 }
 0xa9e   :  { %v2190_v6 = vmax.f32 %v2184_v2, 0.0  ;;  %v3803_v2 = vld [vmem:[%s4773_s19] ss:$0 sm:$0xff] }
 0xa9f   :  { %v2191_v23 = vpack.c.bf16 %v2187_v43, %v2187_v43  ;;  %v3804_v22 = vld [vmem:[#allocation2] ss:$0 sm:$0xff] }
 0xaa0   :  { %v2194_v44 = vpack.c.bf16 %v2190_v6, %v2190_v6 }
 0xaa1   :  { %2465 = vmatmul.bf16.vlgmr.msra.gmra.mxu3 %v2191_v23 }
 0xaa2   :  { %2504 = vmatmul.bf16.vlgmr.msrb.gmra.mxu2 %v2194_v44  ;;  %v2146_v24 = vpop.f32.mrf.mxu3  ;;  %3518 = vmatpush.msk.msra.mxu3 %vm2577_vm14, %v2568_v55 }
 0xaa3   :  { %v2185_v7 = vpop.f32.mrf.mxu2 }
 0xb18   :  { %v2479_v25 = vpop.f32.mrf.mxu0 }
 0xb19   :  { %v2492_v26 = vpop.f32.mrf.mxu1 }
 0xb20   :  { %v2481_v8 = vpop.f32.mrf.mxu0 }
 0xb21   :  { %v2494_v45 = vpop.f32.mrf.mxu1 }
 0xb24   :  { %v2466_v1 = vpop.f32.mrf.mxu3 }
 0xb25   :  { %v2467_v34 = vadd.f32 %v3800_v30, %v2466_v1  ;;  %v2505_v46 = vpop.f32.mrf.mxu2 }
 0xb27   :  { %v2480_v48 = vadd.f32 %v2479_v25, %v2467_v34 }
 0xb29   :  { %v2493_v51 = vadd.f32 %v2492_v26, %v2480_v48 }
 0xb2b   :  { %v2506_v52 = vadd.f32 %v2505_v46, %v2493_v51 }
 0xb2c   :  { %v2468_v47 = vpop.f32.mrf.mxu3 }
 0xb2d   :  { %v2509_v53 = vadd.f32 %v2506_v52, %v4685_v12  ;;  %v2507_v54 = vpop.f32.mrf.mxu2  ;;  %v3801_v12 = vld [vmem:[%s4769_s15] ss:$0 sm:$0xff] }
 0xb2f   :  { %2526 = vmatmul.f32.vlgmr.msrb.gmra.mxu3 %v2509_v53 }
 0xb37   :  { %3519 = vmatmul.msk.f32.vlgmr.msra.gmra.mxu3 %vm2573_vm15, %v2567_v56 }
 0xbb2   :  { %v2527_v36 = vpop.f32.mrf.mxu3 }
 0xbb3   :  { %v2530_v58 = vsub.f32 %v2509_v53, %v2527_v36 }
 0xbb5   :  { %v2531_v59 = vmul.f32 %v2530_v58, %v2530_v58 }
 0xbb7   :  { %2548 = vmatmul.f32.vlgmr.msra.gmra.mxu0 %v2531_v59 }
 0xbba   :  { %v2598_v14 = vpop.f32.mrf.mxu3 }
 0xbbb   :  { %v2599_v16 = vadd.f32 %v3801_v12, %v2598_v14 }
 0xbbd   :  { %v2618_v29 = vpack.c.bf16 %v2599_v16, %v2599_v16 }
 0xbbf   :  { %3528 = vmatmul.msk.bf16.vlgmr.msra.gmra.mxu1 %vm2635_vm0, %v2618_v29 }
 0xc34   :  { %v2549_v19 = vpop.f32.mrf.mxu0 }
 0xc35   :  { %v2550_v20 = vadd.f32 1e-05, %v2549_v19 }
 0xc37   :  { %3831 = vrsqrt.f32 %v2550_v20  ;;  %vm2558_vm2 = vweird.f32 %v2550_v20 }
 0xc3c   :  { %v2648_v50 = vpop.f32.mrf.mxu1 }
 0xc3d   :  { %v3832_v21 = vpop.eup %3831 }
 0xc3e   :  { %v2553_v62 = vmul.f32 %v3832_v21, %v2550_v20  ;;  %vm2559_vm1 = vweird.f32 %v3832_v21 }
 0xc3f   :  { %vm2560_vm3 = vmor %vm2558_vm2, %vm2559_vm1 }
 0xc40   :  { %v2554_v37 = vmul.f32 %v3832_v21, %v2553_v62 }
 0xc42   :  { %v2555_v13 = vmul.f32 0.5, %v2554_v37 }
 0xc44   :  { %v2556_v31 = vsub.f32 1.5, %v2555_v13  ;;  %v2650_v57 = vpop.f32.mrf.mxu1 }
 0xc46   :  { %v2557_v32 = vmul.f32 %v3832_v21, %v2556_v31 }
 0xc48   :  { %v2561_v33 = vsel %vm2560_vm3, %v3832_v21, %v2557_v32 }
 0xc49   :  { %v2562_v3 = vmul.f32 %v2561_v33, %v2530_v58 }
 0xc4b   :  { %v2564_v39 = vmul.f32 %v2563_v18, %v2562_v3 }
 0xc4d   :  { %v2566_v38 = vadd.f32 %v2565_v35, %v2564_v39 }
 0xc4f   :  { %v2601_v40 = vpack.c.bf16 %v2566_v38, %v2566_v38 }
 0xc51   :  { %2708 = vmatmul.bf16.vlgmr.msra.gmra.mxu2 %v2601_v40 }
 0xcd4   :  { %v2709_v60 = vpop.f32.mrf.mxu2 }
 0xcd5   :  { %v2710_v63 = vadd.f32 %v2709_v60, %v2648_v50 }
 0xcd7   :  { %v2717_v42 = vadd.f32 %v3802_v41, %v2710_v63 }
 0xcd9   :  { %v2718_v5 = vmax.f32 %v2717_v42, 0.0 }
 0xcdb   :  { %v2723_v43 = vmul.f32 %v3803_v2, %v2718_v5 }
 0xcdc   :  { %v2711_v28 = vpop.f32.mrf.mxu2 }
 0xcdd   :  { %2724 = vadd.xlane.f32.xlu2 %v2723_v43 }
 0xd50   :  { %v2725_v6 = vpop.xlane.xlu2 %2724 }
 0xd51   :  { %v2730_v23 = vadd.f32 %v3804_v22, %v2725_v6 }
 0xd53   :  { %2732 = vst.msk [vmem:[%s4775_s21] sm:$0xff] %vm2731_vm4, %v2730_v23 }
 0xd54   :  { %2737 = vsyncpa [#allocation4], 1 }
 0xd55   :  { %2738 = vsyncpa [#allocation6], 1 }
 0xd56   :  { %2739 = vsyncpa [#allocation9], 1 }
 0xd57   :  { %2740 = vsyncpa [#allocation12], 1 }
 0xd58   :  { %2741 = vsyncpa [#allocation15], 1 }
 0xd59   :  { %2742 = vsyncpa [#allocation18], 1 }

</bundles_post_ra>
